<compile_context>
chip_gen: v7x
topology: tpu7x:2x2x1
jax: 0.10.0
libtpu: 0.0.40
codegen_flags: <defaults>
</compile_context>

<pallas_src>
import numpy as np
import jax
import jax.numpy as jnp
from jax import lax
from jax.experimental import pallas as pl
from jax.experimental.pallas import tpu as pltpu


def fused_conv3d_pool_lse_relu(x, w, b):
    """x: (N, Cin, D, H, W) f32; w: (Cout, Cin, 3, 3, 3); b: (Cout,).
    Returns (N, 1, D//2, H//2, W//2):  relu(logsumexp_C(maxpool2(conv3d(x))))."""
    N, Cin, D, H, W = x.shape
    Cout, _, k, _, _ = w.shape
    assert k == 3
    assert D % 2 == 0 and H % 2 == 0 and W % 2 == 0
    Dp, Hp, Wp = D // 2, H // 2, W // 2
    Dpad = D + 2
    R = Cin * Dpad            # contraction dim (cin, padded depth)      e.g. 54
    HW = Hp * Wp              # pooled HW size per parity block          e.g. 64
    COLS = 4 * HW             # (hpar, wpar, hp, wp) lane width          e.g. 256
    CD = Cout * Dp            # (co, dp) rows after depth pooling        e.g. 128
    ROWS = 2 * CD             # (dpar, co, dp) rows of the conv result   e.g. 256

    x = x.astype(jnp.float32)
    w = w.astype(jnp.float32)
    b = b.astype(jnp.float32)

    # ---- glue 1: zero-pad + single-pass HW-only im2col (9 taps), ------------
    #      columns parity-major: col = (hpar*2 + wpar)*HW + hp*Wp + wp.
    xp = jnp.pad(x, ((0, 0), (0, 0), (1, 1), (1, 1), (1, 1)))
    taps = []
    for kh in range(3):
        for kw in range(3):
            pars = []
            for hpar in range(2):
                for wpar in range(2):
                    s = xp[:, :, :,
                           kh + hpar: kh + hpar + 2 * Hp: 2,
                           kw + wpar: kw + wpar + 2 * Wp: 2]       # (N,Cin,Dpad,Hp,Wp)
                    pars.append(s.reshape(N, Cin, Dpad, HW))
            taps.append(jnp.concatenate(pars, axis=-1))            # (N,Cin,Dpad,COLS)
    G = jnp.stack(taps, axis=1).reshape(N, 9, R, COLS)             # (N,9,R,COLS)

    # ---- glue 2: banded weights fold the 3 depth taps into the matmul. ------
    # Bband[kh*3+kw, dpar*CD + co*Dp + dp, cin*Dpad + 2*dp + dpar + kd]
    #    = w[co, cin, kd, kh, kw]
    M = np.zeros((2, Dp, Cin, 3, R), np.float32)                   # compile-time const
    for dpar in range(2):
        for dp in range(Dp):
            for cin in range(Cin):
                for kd in range(3):
                    M[dpar, dp, cin, kd, cin * Dpad + 2 * dp + dpar + kd] = 1.0
    wr = jnp.transpose(w, (3, 4, 0, 1, 2))                         # (kh,kw,co,cin,kd)
    Bband = jnp.einsum('abock,pdckq->abpodq', wr, M).reshape(9, ROWS, R)
    bias_rows = jnp.repeat(b, Dp).reshape(CD, 1)                   # row = co*Dp + dp

    def kernel(g_ref, bb_ref, bias_ref, o_ref, acc_ref):
        # Conv: 9 banded MXU matmuls accumulated into VMEM scratch.
        # acc[(dpar,co,dp), (hpar,wpar,hp,wp)] = conv3d output (without bias).
        acc_ref[...] = jnp.dot(bb_ref[0], g_ref[0, 0],
                               preferred_element_type=jnp.float32)
        for i in range(1, 9):
            acc_ref[...] += jnp.dot(bb_ref[i], g_ref[0, i],
                                    preferred_element_type=jnp.float32)

        # 2x2x2 max-pool = max over the 2 dpar row halves x 4 HW-parity blocks.
        p = None
        for dpar in range(2):
            for blk in range(4):
                t = acc_ref[dpar * CD:(dpar + 1) * CD,
                            blk * HW:(blk + 1) * HW]               # (CD, HW)
                p = t if p is None else jnp.maximum(p, t)

        # Bias after the pool (per-channel constant commutes with max).
        p = p + bias_ref[...]                                      # (CD, HW)

        # logsumexp over channels (Cout sublane blocks of Dp rows) + ReLU.
        ch = [p[co * Dp:(co + 1) * Dp, :] for co in range(Cout)]   # each (Dp, HW)
        m = ch[0]
        for c in ch[1:]:
            m = jnp.maximum(m, c)
        s = jnp.exp(ch[0] - m)
        for c in ch[1:]:
            s = s + jnp.exp(c - m)
        o_ref[0] = jnp.maximum(m + jnp.log(s), 0.0)                # (Dp, HW)

    out = pl.pallas_call(
        kernel,
        out_shape=jax.ShapeDtypeStruct((N, Dp, HW), jnp.float32),
        grid_spec=pltpu.PrefetchScalarGridSpec(
            num_scalar_prefetch=0,
            grid=(N,),
            in_specs=[
                pl.BlockSpec((1, 9, R, COLS), lambda n: (n, 0, 0, 0)),
                pl.BlockSpec((9, ROWS, R), lambda n: (0, 0, 0)),   # constant: DMA'd once
                pl.BlockSpec((CD, 1), lambda n: (0, 0)),           # constant: DMA'd once
            ],
            out_specs=pl.BlockSpec((1, Dp, HW), lambda n: (n, 0, 0)),
            scratch_shapes=[pltpu.VMEM((ROWS, COLS), jnp.float32)],
        ),
        compiler_params=pltpu.CompilerParams(
            dimension_semantics=("parallel",)),
    )(G, Bband, bias_rows)

    return out.reshape(N, 1, Dp, Hp, Wp)


model_new_forward = jax.jit(fused_conv3d_pool_lse_relu)


def reference(x, w, b):
    y = lax.conv_general_dilated(
        x, w, window_strides=(1, 1, 1), padding=((1, 1),) * 3,
        dimension_numbers=('NCDHW', 'OIDHW', 'NCDHW'))
    y = y + b.reshape(1, -1, 1, 1, 1)
    y = lax.reduce_window(
        y, -jnp.inf, lax.max,
        window_dimensions=(1, 1, 2, 2, 2),
        window_strides=(1, 1, 2, 2, 2),
        padding='VALID')
    lse = jax.scipy.special.logsumexp(y, axis=1, keepdims=True)
    return jnp.maximum(lse, 0.0)


if __name__ == "__main__":
    in_channels, out_channels, ksize = 3, 16, 3
    N, D, H, W = 2, 16, 16, 16

    key = jax.random.PRNGKey(0)
    kx, kw, kb = jax.random.split(key, 3)

    # Deterministic parameter init (PyTorch-style uniform bounds).
    fan_in = in_channels * ksize ** 3
    bound = 1.0 / (fan_in ** 0.5)
    w = jax.random.uniform(kw, (out_channels, in_channels, ksize, ksize, ksize),
                           jnp.float32, -bound, bound)
    b = jax.random.uniform(kb, (out_channels,), jnp.float32, -bound, bound)
    x = jax.random.normal(kx, (N, in_channels, D, H, W), jnp.float32)

    out = model_new_forward(x, w, b)
    out = jax.block_until_ready(out)

    ref = reference(x, w, b)
    assert out.shape == (N, 1, D // 2, H // 2, W // 2), out.shape
    assert jnp.allclose(out, ref, rtol=1e-3, atol=1e-3), \
        float(jnp.max(jnp.abs(out - ref)))

    print("KERNEL_OK")
</pallas_src>

<mosaic_0001>
module attributes {stable_mosaic.version = 11 : i64} {
  func.func @kernel(%arg0: i32, %arg1: memref<1x9x54x256xf32, #tpu.memory_space<vmem>>, %arg2: memref<9x256x54xf32, #tpu.memory_space<vmem>>, %arg3: memref<128x1xf32, #tpu.memory_space<vmem>>, %arg4: memref<1x8x64xf32, #tpu.memory_space<vmem>>, %arg5: memref<256x256xf32, #tpu.memory_space<vmem>>) attributes {dimension_semantics = [#tpu.dimension_semantics<parallel>], iteration_bounds = array<i64: 2>, scalar_prefetch = 0 : i64, scratch_operands = 1 : i64, tpu.core_type = #tpu.core_type<tc>, window_params = [{transform_indices = @transform_0, window_bounds = array<i64: 1, 9, 54, 256>}, {pipeline_mode = #tpu.pipeline_mode<synchronous>, transform_indices = @transform_1, window_bounds = array<i64: 9, 256, 54>}, {pipeline_mode = #tpu.pipeline_mode<synchronous>, transform_indices = @transform_2, window_bounds = array<i64: 128, 1>}, {transform_indices = @transform_3, window_bounds = array<i64: 1, 8, 64>}]} {
    %c0 = arith.constant 0 : index
    %c0_0 = arith.constant 0 : index
    %c0_1 = arith.constant 0 : index
    %0 = vector.load %arg2[%c0, %c0_0, %c0_1] : memref<9x256x54xf32, #tpu.memory_space<vmem>>, vector<1x256x54xf32>
    %1 = vector.shape_cast %0 : vector<1x256x54xf32> to vector<256x54xf32>
    %c0_2 = arith.constant 0 : index
    %c0_3 = arith.constant 0 : index
    %c0_4 = arith.constant 0 : index
    %c0_5 = arith.constant 0 : index
    %2 = vector.load %arg1[%c0_2, %c0_3, %c0_4, %c0_5] : memref<1x9x54x256xf32, #tpu.memory_space<vmem>>, vector<1x1x54x256xf32>
    %3 = vector.shape_cast %2 : vector<1x1x54x256xf32> to vector<54x256xf32>
    %cst = arith.constant dense<0.000000e+00> : vector<256x256xf32>
    %4 = tpu.matmul %1, %3, %cst {dimension_numbers = #tpu.dot_dimension_numbers<[1], [0], [0], [1], [0, 0, 1, 1], [], []>} : vector<256x54xf32>, vector<54x256xf32>, vector<256x256xf32> -> vector<256x256xf32>
    %c0_6 = arith.constant 0 : index
    %c0_7 = arith.constant 0 : index
    %5 = vector.load %arg5[%c0_6, %c0_7] : memref<256x256xf32, #tpu.memory_space<vmem>>, vector<256x256xf32>
    tpu.vector_store %arg5[%c0_6, %c0_7], %4 {strides = array<i32>} : memref<256x256xf32, #tpu.memory_space<vmem>>, vector<256x256xf32>,
    %c0_8 = arith.constant 0 : index
    %c0_9 = arith.constant 0 : index
    %6 = vector.load %arg5[%c0_8, %c0_9] : memref<256x256xf32, #tpu.memory_space<vmem>>, vector<256x256xf32>
    %c1 = arith.constant 1 : index
    %c0_10 = arith.constant 0 : index
    %c0_11 = arith.constant 0 : index
    %7 = vector.load %arg2[%c1, %c0_10, %c0_11] : memref<9x256x54xf32, #tpu.memory_space<vmem>>, vector<1x256x54xf32>
    %8 = vector.shape_cast %7 : vector<1x256x54xf32> to vector<256x54xf32>
    %c0_12 = arith.constant 0 : index
    %c1_13 = arith.constant 1 : index
    %c0_14 = arith.constant 0 : index
    %c0_15 = arith.constant 0 : index
    %9 = vector.load %arg1[%c0_12, %c1_13, %c0_14, %c0_15] : memref<1x9x54x256xf32, #tpu.memory_space<vmem>>, vector<1x1x54x256xf32>
    %10 = vector.shape_cast %9 : vector<1x1x54x256xf32> to vector<54x256xf32>
    %cst_16 = arith.constant dense<0.000000e+00> : vector<256x256xf32>
    %11 = tpu.matmul %8, %10, %cst_16 {dimension_numbers = #tpu.dot_dimension_numbers<[1], [0], [0], [1], [0, 0, 1, 1], [], []>} : vector<256x54xf32>, vector<54x256xf32>, vector<256x256xf32> -> vector<256x256xf32>
    %12 = arith.addf %6, %11 : vector<256x256xf32>
    %c0_17 = arith.constant 0 : index
    %c0_18 = arith.constant 0 : index
    %13 = vector.load %arg5[%c0_17, %c0_18] : memref<256x256xf32, #tpu.memory_space<vmem>>, vector<256x256xf32>
    tpu.vector_store %arg5[%c0_17, %c0_18], %12 {strides = array<i32>} : memref<256x256xf32, #tpu.memory_space<vmem>>, vector<256x256xf32>,
    %c0_19 = arith.constant 0 : index
    %c0_20 = arith.constant 0 : index
    %14 = vector.load %arg5[%c0_19, %c0_20] : memref<256x256xf32, #tpu.memory_space<vmem>>, vector<256x256xf32>
    %c2 = arith.constant 2 : index
    %c0_21 = arith.constant 0 : index
    %c0_22 = arith.constant 0 : index
    %15 = vector.load %arg2[%c2, %c0_21, %c0_22] : memref<9x256x54xf32, #tpu.memory_space<vmem>>, vector<1x256x54xf32>
    %16 = vector.shape_cast %15 : vector<1x256x54xf32> to vector<256x54xf32>
    %c0_23 = arith.constant 0 : index
    %c2_24 = arith.constant 2 : index
    %c0_25 = arith.constant 0 : index
    %c0_26 = arith.constant 0 : index
    %17 = vector.load %arg1[%c0_23, %c2_24, %c0_25, %c0_26] : memref<1x9x54x256xf32, #tpu.memory_space<vmem>>, vector<1x1x54x256xf32>
    %18 = vector.shape_cast %17 : vector<1x1x54x256xf32> to vector<54x256xf32>
    %cst_27 = arith.constant dense<0.000000e+00> : vector<256x256xf32>
    %19 = tpu.matmul %16, %18, %cst_27 {dimension_numbers = #tpu.dot_dimension_numbers<[1], [0], [0], [1], [0, 0, 1, 1], [], []>} : vector<256x54xf32>, vector<54x256xf32>, vector<256x256xf32> -> vector<256x256xf32>
    %20 = arith.addf %14, %19 : vector<256x256xf32>
    %c0_28 = arith.constant 0 : index
    %c0_29 = arith.constant 0 : index
    %21 = vector.load %arg5[%c0_28, %c0_29] : memref<256x256xf32, #tpu.memory_space<vmem>>, vector<256x256xf32>
    tpu.vector_store %arg5[%c0_28, %c0_29], %20 {strides = array<i32>} : memref<256x256xf32, #tpu.memory_space<vmem>>, vector<256x256xf32>,
    %c0_30 = arith.constant 0 : index
    %c0_31 = arith.constant 0 : index
    %22 = vector.load %arg5[%c0_30, %c0_31] : memref<256x256xf32, #tpu.memory_space<vmem>>, vector<256x256xf32>
    %c3 = arith.constant 3 : index
    %c0_32 = arith.constant 0 : index
    %c0_33 = arith.constant 0 : index
    %23 = vector.load %arg2[%c3, %c0_32, %c0_33] : memref<9x256x54xf32, #tpu.memory_space<vmem>>, vector<1x256x54xf32>
    %24 = vector.shape_cast %23 : vector<1x256x54xf32> to vector<256x54xf32>
    %c0_34 = arith.constant 0 : index
    %c3_35 = arith.constant 3 : index
    %c0_36 = arith.constant 0 : index
    %c0_37 = arith.constant 0 : index
    %25 = vector.load %arg1[%c0_34, %c3_35, %c0_36, %c0_37] : memref<1x9x54x256xf32, #tpu.memory_space<vmem>>, vector<1x1x54x256xf32>
    %26 = vector.shape_cast %25 : vector<1x1x54x256xf32> to vector<54x256xf32>
    %cst_38 = arith.constant dense<0.000000e+00> : vector<256x256xf32>
    %27 = tpu.matmul %24, %26, %cst_38 {dimension_numbers = #tpu.dot_dimension_numbers<[1], [0], [0], [1], [0, 0, 1, 1], [], []>} : vector<256x54xf32>, vector<54x256xf32>, vector<256x256xf32> -> vector<256x256xf32>
    %28 = arith.addf %22, %27 : vector<256x256xf32>
    %c0_39 = arith.constant 0 : index
    %c0_40 = arith.constant 0 : index
    %29 = vector.load %arg5[%c0_39, %c0_40] : memref<256x256xf32, #tpu.memory_space<vmem>>, vector<256x256xf32>
    tpu.vector_store %arg5[%c0_39, %c0_40], %28 {strides = array<i32>} : memref<256x256xf32, #tpu.memory_space<vmem>>, vector<256x256xf32>,
    %c0_41 = arith.constant 0 : index
    %c0_42 = arith.constant 0 : index
    %30 = vector.load %arg5[%c0_41, %c0_42] : memref<256x256xf32, #tpu.memory_space<vmem>>, vector<256x256xf32>
    %c4 = arith.constant 4 : index
    %c0_43 = arith.constant 0 : index
    %c0_44 = arith.constant 0 : index
    %31 = vector.load %arg2[%c4, %c0_43, %c0_44] : memref<9x256x54xf32, #tpu.memory_space<vmem>>, vector<1x256x54xf32>
    %32 = vector.shape_cast %31 : vector<1x256x54xf32> to vector<256x54xf32>
    %c0_45 = arith.constant 0 : index
    %c4_46 = arith.constant 4 : index
    %c0_47 = arith.constant 0 : index
    %c0_48 = arith.constant 0 : index
    %33 = vector.load %arg1[%c0_45, %c4_46, %c0_47, %c0_48] : memref<1x9x54x256xf32, #tpu.memory_space<vmem>>, vector<1x1x54x256xf32>
    %34 = vector.shape_cast %33 : vector<1x1x54x256xf32> to vector<54x256xf32>
    %cst_49 = arith.constant dense<0.000000e+00> : vector<256x256xf32>
    %35 = tpu.matmul %32, %34, %cst_49 {dimension_numbers = #tpu.dot_dimension_numbers<[1], [0], [0], [1], [0, 0, 1, 1], [], []>} : vector<256x54xf32>, vector<54x256xf32>, vector<256x256xf32> -> vector<256x256xf32>
    %36 = arith.addf %30, %35 : vector<256x256xf32>
    %c0_50 = arith.constant 0 : index
    %c0_51 = arith.constant 0 : index
    %37 = vector.load %arg5[%c0_50, %c0_51] : memref<256x256xf32, #tpu.memory_space<vmem>>, vector<256x256xf32>
    tpu.vector_store %arg5[%c0_50, %c0_51], %36 {strides = array<i32>} : memref<256x256xf32, #tpu.memory_space<vmem>>, vector<256x256xf32>,
    %c0_52 = arith.constant 0 : index
    %c0_53 = arith.constant 0 : index
    %38 = vector.load %arg5[%c0_52, %c0_53] : memref<256x256xf32, #tpu.memory_space<vmem>>, vector<256x256xf32>
    %c5 = arith.constant 5 : index
    %c0_54 = arith.constant 0 : index
    %c0_55 = arith.constant 0 : index
    %39 = vector.load %arg2[%c5, %c0_54, %c0_55] : memref<9x256x54xf32, #tpu.memory_space<vmem>>, vector<1x256x54xf32>
    %40 = vector.shape_cast %39 : vector<1x256x54xf32> to vector<256x54xf32>
    %c0_56 = arith.constant 0 : index
    %c5_57 = arith.constant 5 : index
    %c0_58 = arith.constant 0 : index
    %c0_59 = arith.constant 0 : index
    %41 = vector.load %arg1[%c0_56, %c5_57, %c0_58, %c0_59] : memref<1x9x54x256xf32, #tpu.memory_space<vmem>>, vector<1x1x54x256xf32>
    %42 = vector.shape_cast %41 : vector<1x1x54x256xf32> to vector<54x256xf32>
    %cst_60 = arith.constant dense<0.000000e+00> : vector<256x256xf32>
    %43 = tpu.matmul %40, %42, %cst_60 {dimension_numbers = #tpu.dot_dimension_numbers<[1], [0], [0], [1], [0, 0, 1, 1], [], []>} : vector<256x54xf32>, vector<54x256xf32>, vector<256x256xf32> -> vector<256x256xf32>
    %44 = arith.addf %38, %43 : vector<256x256xf32>
    %c0_61 = arith.constant 0 : index
    %c0_62 = arith.constant 0 : index
    %45 = vector.load %arg5[%c0_61, %c0_62] : memref<256x256xf32, #tpu.memory_space<vmem>>, vector<256x256xf32>
    tpu.vector_store %arg5[%c0_61, %c0_62], %44 {strides = array<i32>} : memref<256x256xf32, #tpu.memory_space<vmem>>, vector<256x256xf32>,
    %c0_63 = arith.constant 0 : index
    %c0_64 = arith.constant 0 : index
    %46 = vector.load %arg5[%c0_63, %c0_64] : memref<256x256xf32, #tpu.memory_space<vmem>>, vector<256x256xf32>
    %c6 = arith.constant 6 : index
    %c0_65 = arith.constant 0 : index
    %c0_66 = arith.constant 0 : index
    %47 = vector.load %arg2[%c6, %c0_65, %c0_66] : memref<9x256x54xf32, #tpu.memory_space<vmem>>, vector<1x256x54xf32>
    %48 = vector.shape_cast %47 : vector<1x256x54xf32> to vector<256x54xf32>
    %c0_67 = arith.constant 0 : index
    %c6_68 = arith.constant 6 : index
    %c0_69 = arith.constant 0 : index
    %c0_70 = arith.constant 0 : index
    %49 = vector.load %arg1[%c0_67, %c6_68, %c0_69, %c0_70] : memref<1x9x54x256xf32, #tpu.memory_space<vmem>>, vector<1x1x54x256xf32>
    %50 = vector.shape_cast %49 : vector<1x1x54x256xf32> to vector<54x256xf32>
    %cst_71 = arith.constant dense<0.000000e+00> : vector<256x256xf32>
    %51 = tpu.matmul %48, %50, %cst_71 {dimension_numbers = #tpu.dot_dimension_numbers<[1], [0], [0], [1], [0, 0, 1, 1], [], []>} : vector<256x54xf32>, vector<54x256xf32>, vector<256x256xf32> -> vector<256x256xf32>
    %52 = arith.addf %46, %51 : vector<256x256xf32>
    %c0_72 = arith.constant 0 : index
    %c0_73 = arith.constant 0 : index
    %53 = vector.load %arg5[%c0_72, %c0_73] : memref<256x256xf32, #tpu.memory_space<vmem>>, vector<256x256xf32>
    tpu.vector_store %arg5[%c0_72, %c0_73], %52 {strides = array<i32>} : memref<256x256xf32, #tpu.memory_space<vmem>>, vector<256x256xf32>,
    %c0_74 = arith.constant 0 : index
    %c0_75 = arith.constant 0 : index
    %54 = vector.load %arg5[%c0_74, %c0_75] : memref<256x256xf32, #tpu.memory_space<vmem>>, vector<256x256xf32>
    %c7 = arith.constant 7 : index
    %c0_76 = arith.constant 0 : index
    %c0_77 = arith.constant 0 : index
    %55 = vector.load %arg2[%c7, %c0_76, %c0_77] : memref<9x256x54xf32, #tpu.memory_space<vmem>>, vector<1x256x54xf32>
    %56 = vector.shape_cast %55 : vector<1x256x54xf32> to vector<256x54xf32>
    %c0_78 = arith.constant 0 : index
    %c7_79 = arith.constant 7 : index
    %c0_80 = arith.constant 0 : index
    %c0_81 = arith.constant 0 : index
    %57 = vector.load %arg1[%c0_78, %c7_79, %c0_80, %c0_81] : memref<1x9x54x256xf32, #tpu.memory_space<vmem>>, vector<1x1x54x256xf32>
    %58 = vector.shape_cast %57 : vector<1x1x54x256xf32> to vector<54x256xf32>
    %cst_82 = arith.constant dense<0.000000e+00> : vector<256x256xf32>
    %59 = tpu.matmul %56, %58, %cst_82 {dimension_numbers = #tpu.dot_dimension_numbers<[1], [0], [0], [1], [0, 0, 1, 1], [], []>} : vector<256x54xf32>, vector<54x256xf32>, vector<256x256xf32> -> vector<256x256xf32>
    %60 = arith.addf %54, %59 : vector<256x256xf32>
    %c0_83 = arith.constant 0 : index
    %c0_84 = arith.constant 0 : index
    %61 = vector.load %arg5[%c0_83, %c0_84] : memref<256x256xf32, #tpu.memory_space<vmem>>, vector<256x256xf32>
    tpu.vector_store %arg5[%c0_83, %c0_84], %60 {strides = array<i32>} : memref<256x256xf32, #tpu.memory_space<vmem>>, vector<256x256xf32>,
    %c0_85 = arith.constant 0 : index
    %c0_86 = arith.constant 0 : index
    %62 = vector.load %arg5[%c0_85, %c0_86] : memref<256x256xf32, #tpu.memory_space<vmem>>, vector<256x256xf32>
    %c8 = arith.constant 8 : index
    %c0_87 = arith.constant 0 : index
    %c0_88 = arith.constant 0 : index
    %63 = vector.load %arg2[%c8, %c0_87, %c0_88] : memref<9x256x54xf32, #tpu.memory_space<vmem>>, vector<1x256x54xf32>
    %64 = vector.shape_cast %63 : vector<1x256x54xf32> to vector<256x54xf32>
    %c0_89 = arith.constant 0 : index
    %c8_90 = arith.constant 8 : index
    %c0_91 = arith.constant 0 : index
    %c0_92 = arith.constant 0 : index
    %65 = vector.load %arg1[%c0_89, %c8_90, %c0_91, %c0_92] : memref<1x9x54x256xf32, #tpu.memory_space<vmem>>, vector<1x1x54x256xf32>
    %66 = vector.shape_cast %65 : vector<1x1x54x256xf32> to vector<54x256xf32>
    %cst_93 = arith.constant dense<0.000000e+00> : vector<256x256xf32>
    %67 = tpu.matmul %64, %66, %cst_93 {dimension_numbers = #tpu.dot_dimension_numbers<[1], [0], [0], [1], [0, 0, 1, 1], [], []>} : vector<256x54xf32>, vector<54x256xf32>, vector<256x256xf32> -> vector<256x256xf32>
    %68 = arith.addf %62, %67 : vector<256x256xf32>
    %c0_94 = arith.constant 0 : index
    %c0_95 = arith.constant 0 : index
    %69 = vector.load %arg5[%c0_94, %c0_95] : memref<256x256xf32, #tpu.memory_space<vmem>>, vector<256x256xf32>
    tpu.vector_store %arg5[%c0_94, %c0_95], %68 {strides = array<i32>} : memref<256x256xf32, #tpu.memory_space<vmem>>, vector<256x256xf32>,
    %c0_96 = arith.constant 0 : index
    %c0_97 = arith.constant 0 : index
    %70 = vector.load %arg5[%c0_96, %c0_97] : memref<256x256xf32, #tpu.memory_space<vmem>>, vector<128x64xf32>
    %c0_98 = arith.constant 0 : index
    %c64 = arith.constant 64 : index
    %71 = vector.load %arg5[%c0_98, %c64] : memref<256x256xf32, #tpu.memory_space<vmem>>, vector<128x64xf32>
    %72 = arith.maximumf %70, %71 : vector<128x64xf32>
    %c0_99 = arith.constant 0 : index
    %c128 = arith.constant 128 : index
    %73 = vector.load %arg5[%c0_99, %c128] : memref<256x256xf32, #tpu.memory_space<vmem>>, vector<128x64xf32>
    %74 = arith.maximumf %72, %73 : vector<128x64xf32>
    %c0_100 = arith.constant 0 : index
    %c192 = arith.constant 192 : index
    %75 = vector.load %arg5[%c0_100, %c192] : memref<256x256xf32, #tpu.memory_space<vmem>>, vector<128x64xf32>
    %76 = arith.maximumf %74, %75 : vector<128x64xf32>
    %c128_101 = arith.constant 128 : index
    %c0_102 = arith.constant 0 : index
    %77 = vector.load %arg5[%c128_101, %c0_102] : memref<256x256xf32, #tpu.memory_space<vmem>>, vector<128x64xf32>
    %78 = arith.maximumf %76, %77 : vector<128x64xf32>
    %c128_103 = arith.constant 128 : index
    %c64_104 = arith.constant 64 : index
    %79 = vector.load %arg5[%c128_103, %c64_104] : memref<256x256xf32, #tpu.memory_space<vmem>>, vector<128x64xf32>
    %80 = arith.maximumf %78, %79 : vector<128x64xf32>
    %c128_105 = arith.constant 128 : index
    %c128_106 = arith.constant 128 : index
    %81 = vector.load %arg5[%c128_105, %c128_106] : memref<256x256xf32, #tpu.memory_space<vmem>>, vector<128x64xf32>
    %82 = arith.maximumf %80, %81 : vector<128x64xf32>
    %c128_107 = arith.constant 128 : index
    %c192_108 = arith.constant 192 : index
    %83 = vector.load %arg5[%c128_107, %c192_108] : memref<256x256xf32, #tpu.memory_space<vmem>>, vector<128x64xf32>
    %84 = arith.maximumf %82, %83 : vector<128x64xf32>
    %c0_109 = arith.constant 0 : index
    %c0_110 = arith.constant 0 : index
    %85 = vector.load %arg3[%c0_109, %c0_110] : memref<128x1xf32, #tpu.memory_space<vmem>>, vector<128x1xf32>
    %86 = vector.broadcast %85 : vector<128x1xf32> to vector<128x64xf32>
    %87 = arith.addf %84, %86 : vector<128x64xf32>
    %88 = vector.extract_strided_slice %87 {offsets = [0, 0], sizes = [8, 64], strides = [1, 1]} : vector<128x64xf32> to vector<8x64xf32>
    %89 = vector.extract_strided_slice %87 {offsets = [8, 0], sizes = [8, 64], strides = [1, 1]} : vector<128x64xf32> to vector<8x64xf32>
    %90 = vector.extract_strided_slice %87 {offsets = [16, 0], sizes = [8, 64], strides = [1, 1]} : vector<128x64xf32> to vector<8x64xf32>
    %91 = vector.extract_strided_slice %87 {offsets = [24, 0], sizes = [8, 64], strides = [1, 1]} : vector<128x64xf32> to vector<8x64xf32>
    %92 = vector.extract_strided_slice %87 {offsets = [32, 0], sizes = [8, 64], strides = [1, 1]} : vector<128x64xf32> to vector<8x64xf32>
    %93 = vector.extract_strided_slice %87 {offsets = [40, 0], sizes = [8, 64], strides = [1, 1]} : vector<128x64xf32> to vector<8x64xf32>
    %94 = vector.extract_strided_slice %87 {offsets = [48, 0], sizes = [8, 64], strides = [1, 1]} : vector<128x64xf32> to vector<8x64xf32>
    %95 = vector.extract_strided_slice %87 {offsets = [56, 0], sizes = [8, 64], strides = [1, 1]} : vector<128x64xf32> to vector<8x64xf32>
    %96 = vector.extract_strided_slice %87 {offsets = [64, 0], sizes = [8, 64], strides = [1, 1]} : vector<128x64xf32> to vector<8x64xf32>
    %97 = vector.extract_strided_slice %87 {offsets = [72, 0], sizes = [8, 64], strides = [1, 1]} : vector<128x64xf32> to vector<8x64xf32>
    %98 = vector.extract_strided_slice %87 {offsets = [80, 0], sizes = [8, 64], strides = [1, 1]} : vector<128x64xf32> to vector<8x64xf32>
    %99 = vector.extract_strided_slice %87 {offsets = [88, 0], sizes = [8, 64], strides = [1, 1]} : vector<128x64xf32> to vector<8x64xf32>
    %100 = vector.extract_strided_slice %87 {offsets = [96, 0], sizes = [8, 64], strides = [1, 1]} : vector<128x64xf32> to vector<8x64xf32>
    %101 = vector.extract_strided_slice %87 {offsets = [104, 0], sizes = [8, 64], strides = [1, 1]} : vector<128x64xf32> to vector<8x64xf32>
    %102 = vector.extract_strided_slice %87 {offsets = [112, 0], sizes = [8, 64], strides = [1, 1]} : vector<128x64xf32> to vector<8x64xf32>
    %103 = vector.extract_strided_slice %87 {offsets = [120, 0], sizes = [8, 64], strides = [1, 1]} : vector<128x64xf32> to vector<8x64xf32>
    %104 = arith.maximumf %88, %89 : vector<8x64xf32>
    %105 = arith.maximumf %104, %90 : vector<8x64xf32>
    %106 = arith.maximumf %105, %91 : vector<8x64xf32>
    %107 = arith.maximumf %106, %92 : vector<8x64xf32>
    %108 = arith.maximumf %107, %93 : vector<8x64xf32>
    %109 = arith.maximumf %108, %94 : vector<8x64xf32>
    %110 = arith.maximumf %109, %95 : vector<8x64xf32>
    %111 = arith.maximumf %110, %96 : vector<8x64xf32>
    %112 = arith.maximumf %111, %97 : vector<8x64xf32>
    %113 = arith.maximumf %112, %98 : vector<8x64xf32>
    %114 = arith.maximumf %113, %99 : vector<8x64xf32>
    %115 = arith.maximumf %114, %100 : vector<8x64xf32>
    %116 = arith.maximumf %115, %101 : vector<8x64xf32>
    %117 = arith.maximumf %116, %102 : vector<8x64xf32>
    %118 = arith.maximumf %117, %103 : vector<8x64xf32>
    %119 = arith.subf %88, %118 : vector<8x64xf32>
    %120 = math.exp %119 : vector<8x64xf32>
    %121 = arith.subf %89, %118 : vector<8x64xf32>
    %122 = math.exp %121 : vector<8x64xf32>
    %123 = arith.addf %120, %122 : vector<8x64xf32>
    %124 = arith.subf %90, %118 : vector<8x64xf32>
    %125 = math.exp %124 : vector<8x64xf32>
    %126 = arith.addf %123, %125 : vector<8x64xf32>
    %127 = arith.subf %91, %118 : vector<8x64xf32>
    %128 = math.exp %127 : vector<8x64xf32>
    %129 = arith.addf %126, %128 : vector<8x64xf32>
    %130 = arith.subf %92, %118 : vector<8x64xf32>
    %131 = math.exp %130 : vector<8x64xf32>
    %132 = arith.addf %129, %131 : vector<8x64xf32>
    %133 = arith.subf %93, %118 : vector<8x64xf32>
    %134 = math.exp %133 : vector<8x64xf32>
    %135 = arith.addf %132, %134 : vector<8x64xf32>
    %136 = arith.subf %94, %118 : vector<8x64xf32>
    %137 = math.exp %136 : vector<8x64xf32>
    %138 = arith.addf %135, %137 : vector<8x64xf32>
    %139 = arith.subf %95, %118 : vector<8x64xf32>
    %140 = math.exp %139 : vector<8x64xf32>
    %141 = arith.addf %138, %140 : vector<8x64xf32>
    %142 = arith.subf %96, %118 : vector<8x64xf32>
    %143 = math.exp %142 : vector<8x64xf32>
    %144 = arith.addf %141, %143 : vector<8x64xf32>
    %145 = arith.subf %97, %118 : vector<8x64xf32>
    %146 = math.exp %145 : vector<8x64xf32>
    %147 = arith.addf %144, %146 : vector<8x64xf32>
    %148 = arith.subf %98, %118 : vector<8x64xf32>
    %149 = math.exp %148 : vector<8x64xf32>
    %150 = arith.addf %147, %149 : vector<8x64xf32>
    %151 = arith.subf %99, %118 : vector<8x64xf32>
    %152 = math.exp %151 : vector<8x64xf32>
    %153 = arith.addf %150, %152 : vector<8x64xf32>
    %154 = arith.subf %100, %118 : vector<8x64xf32>
    %155 = math.exp %154 : vector<8x64xf32>
    %156 = arith.addf %153, %155 : vector<8x64xf32>
    %157 = arith.subf %101, %118 : vector<8x64xf32>
    %158 = math.exp %157 : vector<8x64xf32>
    %159 = arith.addf %156, %158 : vector<8x64xf32>
    %160 = arith.subf %102, %118 : vector<8x64xf32>
    %161 = math.exp %160 : vector<8x64xf32>
    %162 = arith.addf %159, %161 : vector<8x64xf32>
    %163 = arith.subf %103, %118 : vector<8x64xf32>
    %164 = math.exp %163 : vector<8x64xf32>
    %165 = arith.addf %162, %164 : vector<8x64xf32>
    %166 = math.log %165 : vector<8x64xf32>
    %167 = arith.addf %118, %166 : vector<8x64xf32>
    %cst_111 = arith.constant 0.000000e+00 : f32
    %168 = vector.broadcast %cst_111 : f32 to vector<8x64xf32>
    %169 = arith.maximumf %167, %168 : vector<8x64xf32>
    %c0_112 = arith.constant 0 : index
    %c0_113 = arith.constant 0 : index
    %c0_114 = arith.constant 0 : index
    %170 = vector.load %arg4[%c0_112, %c0_113, %c0_114] : memref<1x8x64xf32, #tpu.memory_space<vmem>>, vector<1x8x64xf32>
    %171 = vector.shape_cast %170 : vector<1x8x64xf32> to vector<8x64xf32>
    %172 = vector.shape_cast %169 : vector<8x64xf32> to vector<1x8x64xf32>
    tpu.vector_store %arg4[%c0_112, %c0_113, %c0_114], %172 {strides = array<i32>} : memref<1x8x64xf32, #tpu.memory_space<vmem>>, vector<1x8x64xf32>,
    return
  }
  func.func @transform_0(%arg0: i32) -> (i32, i32, i32, i32) {
    %c0_i32 = arith.constant 0 : i32
    %c0_i32_0 = arith.constant 0 : i32
    %c0_i32_1 = arith.constant 0 : i32
    %c0_i32_2 = arith.constant 0 : i32
    return %arg0, %c0_i32, %c0_i32_0, %c0_i32_1 : i32, i32, i32, i32
  }
  func.func @transform_1(%arg0: i32) -> (i32, i32, i32) {
    %c0_i32 = arith.constant 0 : i32
    %c0_i32_0 = arith.constant 0 : i32
    %c0_i32_1 = arith.constant 0 : i32
    %c0_i32_2 = arith.constant 0 : i32
    return %c0_i32, %c0_i32_0, %c0_i32_1 : i32, i32, i32
  }
  func.func @transform_2(%arg0: i32) -> (i32, i32) {
    %c0_i32 = arith.constant 0 : i32
    %c0_i32_0 = arith.constant 0 : i32
    %c0_i32_1 = arith.constant 0 : i32
    return %c0_i32, %c0_i32_0 : i32, i32
  }
  func.func @transform_3(%arg0: i32) -> (i32, i32, i32) {
    %c0_i32 = arith.constant 0 : i32
    %c0_i32_0 = arith.constant 0 : i32
    %c0_i32_1 = arith.constant 0 : i32
    return %arg0, %c0_i32, %c0_i32_0 : i32, i32, i32
  }
}

</mosaic_0001>

<bundles_post_ra>
// kernel: fused_conv3d_pool_lse_relu.1
= control target key start
LH: loop header
LB: loop body
LE: loop exit
PB: predicated region body
PF: predicated region fallthrough
CT: control target
= control target key end

     0   :  { %s7505_s12 = smov 0   ;;  %s9764_s0 = inlined_call_operand.vmem [shape: f32[2,9,54,256], index: 0, kind: input, shape index: {}]   ;;  %s9765_s1 = inlined_call_operand.vmem [shape: f32[9,256,54], index: 1, kind: input, shape index: {}]   ;;  %s9766_s2 = inlined_call_operand.vmem [shape: f32[128,1], index: 2, kind: input, shape index: {}]   ;;  %s9767_s3 = inlined_call_operand.vmem [shape: f32[2,8,64], index: 3, kind: output, shape index: {}]  }
   0x1 LB: > { %s6113_s13 = sadd.s32 4294967295, %s7480_s12   ;;  %p6117_p0 = scmp.ge.s32.totalorder %s7480_s12, 1  ;;  %s7480_s12 = sphi %s7505_s12, %s13_s12  }
   0x2   : > { %p137_p1 = scmp.lt.s32.totalorder %s7480_s12, 3 }
   0x4   : > { %p138_p2 = pnand %p6117_p0, %p137_p1 }
   0x6   : > { %141 = sbr.rel (%p138_p2) target bundleno = 1027 (0x403), region = 32 }
   0xd   : > { %p160_p3 = scmp.lt.s32.totalorder %s6113_s13, 1  ;;  %v7482_v0 = vmov 0.0   ;;  %vm312_vm0 = vcmask 1045504   ;;  %v169_v41 = vld [vmem:[%s9765_s1] sm:$0xff]  ;;  %vm215_vm1 = vcmask 441344   ;;  %v170_v61 = vld [vmem:[%s9765_s1 + $0x8] sm:$0xff] }
   0xe   : > { %383 = vmatprep.mubr.f32.mxu1 %v7482_v0  ;;  %2715 = vmatprep.mubr.f32.mxu0 %v7482_v0  ;;  %v6394_v51 = vld [vmem:[%s9765_s1 + $0x400] sm:$0xff]  ;;  %vm6058_vm2 = vcmask 523264  }
   0xf   : > { %s9850_s13 = smov (!%p160_p3, %s6113_s13), 1 }
  0x10   : > { %s7424_s14 = smul.u32 1008, %s9850_s13  ;;  %s6119_s18 = sshll.u32 %s9850_s13, 3 }
  0x11   : > { %s168_s21 = scalar_lea.vmem %s9767_s3, %s6119_s18 }
  0x12   : > { %s7521_s17 = scalar_lea.vmem %s9764_s0, %s7424_s14 }
  0x13   : > { %v202_v1 = vld [vmem:[%s7521_s17 + $0x8] sm:$0xff]  ;;  %v204_v2 = vld [vmem:[%s7521_s17 + $0x18] sm:$0xff]  ;;  %v201_v6 = vld [vmem:[%s7521_s17] sm:$0xff] }
  0x14   : > { %v6427_v3 = vld [vmem:[%s7521_s17 + $0x1c8] sm:$0xff]  ;;  %v6796_v4 = vpack.c.bf16 %v204_v2, %v202_v1  ;;  %v6429_v5 = vld [vmem:[%s7521_s17 + $0x1d8] sm:$0xff]  ;;  %v203_v7 = vld [vmem:[%s7521_s17 + $0x10] sm:$0xff] }
  0x15   : > { %v7529_v8 = vpack.c.bf16 %v6429_v5, %v6427_v3  ;;  %v6798_v9 = vpack.c.bf16 %v203_v7, %v201_v6  ;;  %v6426_v10 = vld [vmem:[%s7521_s17 + $0x1c0] sm:$0xff]  ;;  %v6428_v11 = vld [vmem:[%s7521_s17 + $0x1d0] sm:$0xff]  ;;  %v206_v12 = vld [vmem:[%s7521_s17 + $0x28] sm:$0xff] }
  0x16   : > { %6797 = vmatprep.subr.bf16.mxu1 %v6796_v4  ;;  %v7534_v13 = vpack.c.bf16 %v6428_v11, %v6426_v10  ;;  %v208_v14 = vld [vmem:[%s7521_s17 + $0x38] sm:$0xff]  ;;  %v6431_v15 = vld [vmem:[%s7521_s17 + $0x1e8] sm:$0xff]  ;;  %v205_v19 = vld [vmem:[%s7521_s17 + $0x20] sm:$0xff] }
  0x17   : > { %v6433_v16 = vld [vmem:[%s7521_s17 + $0x1f8] sm:$0xff]  ;;  %6845 = vmatprep.subr.bf16.mxu0 %v7529_v8  ;;  %6799 = vmatpush1.bf16.msra.mxu1 %v6798_v9  ;;  %v6800_v17 = vpack.c.bf16 %v208_v14, %v206_v12  ;;  %v207_v20 = vld [vmem:[%s7521_s17 + $0x30] sm:$0xff]  ;;  %v6430_v21 = vld [vmem:[%s7521_s17 + $0x1e0] sm:$0xff] }
  0x18   : > { %v7540_v18 = vpack.c.bf16 %v6433_v16, %v6431_v15  ;;  %6847 = vmatpush1.bf16.msra.mxu0 %v7534_v13  ;;  %v6802_v22 = vpack.c.bf16 %v207_v20, %v205_v19  ;;  %v6432_v23 = vld [vmem:[%s7521_s17 + $0x1f0] sm:$0xff]  ;;  %v210_v24 = vld [vmem:[%s7521_s17 + $0x48] sm:$0xff]  ;;  %v212_v25 = vld [vmem:[%s7521_s17 + $0x58] sm:$0xff] }
  0x19   : > { %6801 = vmatprep.subr.bf16.mxu1 %v6800_v17  ;;  %v7550_v26 = vpack.c.bf16 %v6432_v23, %v6430_v21  ;;  %v6804_v27 = vpack.c.bf16 %v212_v25, %v210_v24  ;;  %v6435_v28 = vld [vmem:[%s7521_s17 + $0x208] sm:$0xff]  ;;  %v6437_v29 = vld [vmem:[%s7521_s17 + $0x218] sm:$0xff]  ;;  %v209_v30 = vld [vmem:[%s7521_s17 + $0x40] sm:$0xff] }
  0x1a   : > { %6849 = vmatprep.subr.bf16.mxu0 %v7540_v18  ;;  %v7555_v31 = vpack.c.bf16 %v6437_v29, %v6435_v28  ;;  %v211_v32 = vld [vmem:[%s7521_s17 + $0x50] sm:$0xff]  ;;  %v6434_v33 = vld [vmem:[%s7521_s17 + $0x200] sm:$0xff]  ;;  %v214_v37 = vld [vmem:[%s7521_s17 + $0x68] sm:$0x3f] }
  0x1b   : > { %v6436_v34 = vld [vmem:[%s7521_s17 + $0x210] sm:$0xff]  ;;  %6803 = vmatpush1.bf16.msra.mxu1 %v6802_v22  ;;  %v6806_v35 = vpack.c.bf16 %v211_v32, %v209_v30  ;;  %v6439_v38 = vld [vmem:[%s7521_s17 + $0x228] sm:$0x3f]  ;;  %v6507_v39 = vld [vmem:[%s7521_s17 + $0x238] sm:$0xff] }
  0x1c   : > { %6851 = vmatpush1.bf16.msra.mxu0 %v7550_v26  ;;  %6805 = vmatprep.subr.bf16.mxu1 %v6804_v27  ;;  %v7561_v36 = vpack.c.bf16 %v6436_v34, %v6434_v33  ;;  %v6509_v40 = vld [vmem:[%s7521_s17 + $0x248] sm:$0xff]  ;;  %v6506_v42 = vld [vmem:[%s7521_s17 + $0x230] sm:$0xff]  ;;  %v6508_v43 = vld [vmem:[%s7521_s17 + $0x240] sm:$0xff] }
  0x1d   : > { %6853 = vmatprep.subr.bf16.mxu0 %v7555_v31  ;;  %v213_v44 = vld [vmem:[%s7521_s17 + $0x60] sm:$0x3f]  ;;  %v6187_v45 = vld [vmem:[%s7521_s17 + $0x78] sm:$0xff]  ;;  %v6189_v46 = vld [vmem:[%s7521_s17 + $0x88] sm:$0xff]  ;;  %v6856_v48 = vpack.c.bf16 %v6509_v40, %v6507_v39  ;;  %v6858_v52 = vpack.c.bf16 %v6508_v43, %v6506_v42 }
  0x1e   : > { %v6438_v47 = vld [vmem:[%s7521_s17 + $0x220] sm:$0x3f]  ;;  %v6511_v49 = vld [vmem:[%s7521_s17 + $0x258] sm:$0xff]  ;;  %v6513_v50 = vld [vmem:[%s7521_s17 + $0x268] sm:$0xff]  ;;  %v6808_v53 = vpack.c.bf16 %v6189_v46, %v6187_v45 }
  0x1f   : > { %6807 = vmatpush1.bf16.msra.mxu1 %v6806_v35  ;;  %v6186_v54 = vld [vmem:[%s7521_s17 + $0x70] sm:$0xff]  ;;  %v6188_v55 = vld [vmem:[%s7521_s17 + $0x80] sm:$0xff]  ;;  %v6860_v57 = vpack.c.bf16 %v6513_v50, %v6511_v49  ;;  %v6191_v59 = vld [vmem:[%s7521_s17 + $0x98] sm:$0xff] }
  0x20   : > { %6855 = vmatpush1.bf16.msra.mxu0 %v7561_v36  ;;  %6120 = vmatprep.subr.msk.mxu1 %vm312_vm0, %v214_v37  ;;  %v6510_v56 = vld [vmem:[%s7521_s17 + $0x250] sm:$0xff]  ;;  %v6512_v58 = vld [vmem:[%s7521_s17 + $0x260] sm:$0xff]  ;;  %v6193_v60 = vld [vmem:[%s7521_s17 + $0xa8] sm:$0xff]  ;;  %v6810_v2 = vpack.c.bf16 %v6188_v55, %v6186_v54 }
  0x21   : > { %6440 = vmatprep.subr.msk.mxu0 %vm312_vm0, %v6439_v38  ;;  %v6515_v62 = vld [vmem:[%s7521_s17 + $0x278] sm:$0xff]  ;;  %v6517_v63 = vld [vmem:[%s7521_s17 + $0x288] sm:$0xff]  ;;  %v6862_v3 = vpack.c.bf16 %v6512_v58, %v6510_v56  ;;  %v6812_v4 = vpack.c.bf16 %v6193_v60, %v6191_v59  ;;  %v6190_v5 = vld [vmem:[%s7521_s17 + $0x90] sm:$0xff] }
  0x22   : > { %v6395_v1 = vld [vmem:[%s9765_s1 + $0x408] sm:$0xff]  ;;  %v6192_v6 = vld [vmem:[%s7521_s17 + $0xa0] sm:$0xff]  ;;  %v6864_v7 = vpack.c.bf16 %v6517_v63, %v6515_v62  ;;  %v6514_v9 = vld [vmem:[%s7521_s17 + $0x270] sm:$0xff] }
  0x23   : > { %6121 = vmatpush1.msk.msra.mxu1 %vm312_vm0, %v213_v44  ;;  %v6516_v10 = vld [vmem:[%s7521_s17 + $0x280] sm:$0xff]  ;;  %v171_v11 = vld [vmem:[%s9765_s1 + $0x10] sm:$0xff]  ;;  %v6814_v14 = vpack.c.bf16 %v6192_v6, %v6190_v5  ;;  %v6195_v16 = vld [vmem:[%s7521_s17 + $0xb8] sm:$0xff] }
  0x24   : > { %6441 = vmatpush1.msk.msra.mxu0 %vm312_vm0, %v6438_v47  ;;  %6122 = vmatmul.mubr.msk.f32.vlgmr.msra.gmra.mrb[0].mxu1 %vm215_vm1, %v169_v41  ;;  %v6396_v12 = vld [vmem:[%s9765_s1 + $0x410] sm:$0xff]  ;;  %v6866_v15 = vpack.c.bf16 %v6516_v10, %v6514_v9  ;;  %v6197_v17 = vld [vmem:[%s7521_s17 + $0xc8] sm:$0xff]  ;;  %v172_v19 = vld [vmem:[%s9765_s1 + $0x18] sm:$0xff] }
  0x25   : > { %6442 = vmatmul.mubr.msk.f32.vlgmr.msra.gmra.mrb[0].mxu0 %vm215_vm1, %v6394_v51  ;;  %6857 = vmatprep.subr.bf16.mxu0 %v6856_v48  ;;  %v6816_v20 = vpack.c.bf16 %v6197_v17, %v6195_v16  ;;  %v6194_v21 = vld [vmem:[%s7521_s17 + $0xb0] sm:$0xff]  ;;  %v6196_v22 = vld [vmem:[%s7521_s17 + $0xc0] sm:$0xff]  ;;  %v6519_v23 = vld [vmem:[%s7521_s17 + $0x298] sm:$0x3f] }
  0x26   : > { %6859 = vmatpush1.bf16.msra.mxu0 %v6858_v52  ;;  %389 = vmatprep.mubr.f32.mxu1 %v7482_v0  ;;  %v6587_v24 = vld [vmem:[%s7521_s17 + $0x2a8] sm:$0xff]  ;;  %v6589_v25 = vld [vmem:[%s7521_s17 + $0x2b8] sm:$0xff]  ;;  %v6818_v28 = vpack.c.bf16 %v6196_v22, %v6194_v21  ;;  %v6518_v29 = vld [vmem:[%s7521_s17 + $0x290] sm:$0x3f] }
  0x27   : > { %2721 = vmatprep.mubr.f32.mxu0 %v7482_v0  ;;  %6809 = vmatprep.subr.bf16.mxu1 %v6808_v53  ;;  %v6397_v27 = vld [vmem:[%s9765_s1 + $0x418] sm:$0xff]  ;;  %v6868_v30 = vpack.c.bf16 %v6589_v25, %v6587_v24  ;;  %v173_v32 = vld [vmem:[%s9765_s1 + $0x20] sm:$0xff]  ;;  %v6198_v35 = vld [vmem:[%s7521_s17 + $0xd0] sm:$0x3f] }
  0x28   : > { %6123 = vmatmul.mubr.msk.f32.gmra.mrb[2].mxu1 %vm215_vm1, %v170_v61  ;;  %6861 = vmatprep.subr.bf16.mxu0 %v6860_v57  ;;  %v6398_v33 = vld [vmem:[%s9765_s1 + $0x420] sm:$0xff]  ;;  %v6199_v34 = vld [vmem:[%s7521_s17 + $0xd8] sm:$0x3f]  ;;  %v174_v37 = vld [vmem:[%s9765_s1 + $0x28] sm:$0xff] }
  0x29   : > { %6443 = vmatmul.mubr.msk.f32.gmra.mrb[2].mxu0 %vm215_vm1, %v6395_v1  ;;  %395 = vmatprep.mubr.f32.mxu1 %v7482_v0  ;;  %v6399_v38 = vld [vmem:[%s9765_s1 + $0x428] sm:$0xff]  ;;  %v175_v39 = vld [vmem:[%s9765_s1 + $0x30] sm:$0xff]  ;;  %v6269_v42 = vld [vmem:[%s7521_s17 + $0xf8] sm:$0xff] }
  0x2a   : > { %2727 = vmatprep.mubr.f32.mxu0 %v7482_v0  ;;  %6811 = vmatpush1.bf16.msra.mxu1 %v6810_v2  ;;  %v6400_v40 = vld [vmem:[%s9765_s1 + $0x430] sm:$0xff]  ;;  %v6267_v41 = vld [vmem:[%s7521_s17 + $0xe8] sm:$0xff]  ;;  %v176_v44 = vld [vmem:[%s9765_s1 + $0x38] sm:$0xff] }
  0x2b   : > { %6863 = vmatpush1.bf16.msra.mxu0 %v6862_v3  ;;  %6813 = vmatprep.subr.bf16.mxu1 %v6812_v4  ;;  %v6820_v43 = vpack.c.bf16 %v6269_v42, %v6267_v41  ;;  %v6401_v45 = vld [vmem:[%s9765_s1 + $0x438] sm:$0xff]  ;;  %v177_v46 = vld [vmem:[%s9765_s1 + $0x40] sm:$0xff]  ;;  %v178_v48 = vld [vmem:[%s9765_s1 + $0x48] sm:$0xff] }
  0x2c   : > { %6124 = vmatmul.mubr.msk.f32.gmra.mrb[4].mxu1 %vm215_vm1, %v171_v11  ;;  %6865 = vmatprep.subr.bf16.mxu0 %v6864_v7  ;;  %v6402_v47 = vld [vmem:[%s9765_s1 + $0x440] sm:$0xff]  ;;  %v6403_v49 = vld [vmem:[%s9765_s1 + $0x448] sm:$0xff]  ;;  %v179_v50 = vld [vmem:[%s9765_s1 + $0x50] sm:$0xff] }
  0x2d   : > { %6444 = vmatmul.mubr.msk.f32.gmra.mrb[4].mxu0 %vm215_vm1, %v6396_v12  ;;  %401 = vmatprep.mubr.f32.mxu1 %v7482_v0  ;;  %v6404_v51 = vld [vmem:[%s9765_s1 + $0x450] sm:$0xff]  ;;  %v180_v52 = vld [vmem:[%s9765_s1 + $0x58] sm:$0xff]  ;;  %v181_v54 = vld [vmem:[%s9765_s1 + $0x60] sm:$0xff] }
  0x2e   : > { %2733 = vmatprep.mubr.f32.mxu0 %v7482_v0  ;;  %6815 = vmatpush1.bf16.msra.mxu1 %v6814_v14  ;;  %v6405_v53 = vld [vmem:[%s9765_s1 + $0x458] sm:$0xff]  ;;  %v6406_v55 = vld [vmem:[%s9765_s1 + $0x460] sm:$0xff]  ;;  %v182_v56 = vld [vmem:[%s9765_s1 + $0x68] sm:$0xff] }
  0x2f   : > { %6867 = vmatpush1.bf16.msra.mxu0 %v6866_v15  ;;  %6817 = vmatprep.subr.bf16.mxu1 %v6816_v20  ;;  %v6407_v57 = vld [vmem:[%s9765_s1 + $0x468] sm:$0xff]  ;;  %v183_v58 = vld [vmem:[%s9765_s1 + $0x70] sm:$0xff]  ;;  %v184_v60 = vld [vmem:[%s9765_s1 + $0x78] sm:$0xff] }
  0x30   : > { %6125 = vmatmul.mubr.msk.f32.gmra.mrb[6].mxu1 %vm215_vm1, %v172_v19  ;;  %6520 = vmatprep.subr.msk.mxu0 %vm312_vm0, %v6519_v23  ;;  %v6408_v59 = vld [vmem:[%s9765_s1 + $0x470] sm:$0xff]  ;;  %v6409_v61 = vld [vmem:[%s9765_s1 + $0x478] sm:$0xff]  ;;  %v6586_v62 = vld [vmem:[%s7521_s17 + $0x2a0] sm:$0xff] }
  0x31   : > { %6445 = vmatmul.mubr.msk.f32.gmra.mrb[6].mxu0 %vm215_vm1, %v6397_v27  ;;  %407 = vmatprep.mubr.f32.mxu1 %v7482_v0  ;;  %v6588_v63 = vld [vmem:[%s7521_s17 + $0x2b0] sm:$0xff]  ;;  %v6591_v1 = vld [vmem:[%s7521_s17 + $0x2c8] sm:$0xff]  ;;  %v6593_v2 = vld [vmem:[%s7521_s17 + $0x2d8] sm:$0xff] }
  0x32   : > { %2739 = vmatprep.mubr.f32.mxu0 %v7482_v0  ;;  %6819 = vmatpush1.bf16.msra.mxu1 %v6818_v28  ;;  %v185_v3 = vld [vmem:[%s9765_s1 + $0x80] sm:$0xff]  ;;  %v6870_v5 = vpack.c.bf16 %v6588_v63, %v6586_v62  ;;  %v6872_v6 = vpack.c.bf16 %v6593_v2, %v6591_v1  ;;  %v6592_v9 = vld [vmem:[%s7521_s17 + $0x2d0] sm:$0xff]  ;;  %v6595_v10 = vld [vmem:[%s7521_s17 + $0x2e8] sm:$0xff] }
  0x33   : > { %6521 = vmatpush1.msk.msra.mxu0 %vm312_vm0, %v6518_v29  ;;  %6200 = vmatprep.subr.msk.mxu1 %vm312_vm0, %v6199_v34  ;;  %v6474_v4 = vld [vmem:[%s9765_s1 + $0x500] sm:$0xff]  ;;  %v6597_v11 = vld [vmem:[%s7521_s17 + $0x2f8] sm:$0xff]  ;;  %v186_v12 = vld [vmem:[%s9765_s1 + $0x88] sm:$0xff] }
  0x34   : > { %6126 = vmatmul.mubr.msk.f32.gmra.mrb[8].mxu1 %vm215_vm1, %v173_v32  ;;  %6869 = vmatprep.subr.bf16.mxu0 %v6868_v30  ;;  %v6590_v7 = vld [vmem:[%s7521_s17 + $0x2c0] sm:$0xff]  ;;  %v6475_v14 = vld [vmem:[%s9765_s1 + $0x508] sm:$0xff]  ;;  %v6876_v16 = vpack.c.bf16 %v6597_v11, %v6595_v10  ;;  %v6596_v19 = vld [vmem:[%s7521_s17 + $0x2f0] sm:$0xff] }
  0x35   : > { %6446 = vmatmul.mubr.msk.f32.gmra.mrb[8].mxu0 %vm215_vm1, %v6398_v33  ;;  %413 = vmatprep.mubr.f32.mxu1 %v7482_v0  ;;  %v6874_v15 = vpack.c.bf16 %v6592_v9, %v6590_v7  ;;  %v6594_v17 = vld [vmem:[%s7521_s17 + $0x2e0] sm:$0xff]  ;;  %v187_v20 = vld [vmem:[%s9765_s1 + $0x90] sm:$0xff]  ;;  %v6599_v23 = vld [vmem:[%s7521_s17 + $0x308] sm:$0x3f] }
  0x36   : > { %2745 = vmatprep.mubr.f32.mxu0 %v7482_v0  ;;  %6201 = vmatpush1.msk.msra.mxu1 %vm312_vm0, %v6198_v35  ;;  %v6476_v21 = vld [vmem:[%s9765_s1 + $0x510] sm:$0xff]  ;;  %v6878_v22 = vpack.c.bf16 %v6596_v19, %v6594_v17  ;;  %v6667_v24 = vld [vmem:[%s7521_s17 + $0x318] sm:$0xff]  ;;  %v6669_v25 = vld [vmem:[%s7521_s17 + $0x328] sm:$0xff] }
  0x37   : > { %6821 = vmatprep.subr.bf16.mxu1 %v6820_v43  ;;  %v188_v27 = vld [vmem:[%s9765_s1 + $0x98] sm:$0xff]  ;;  %v6598_v29 = vld [vmem:[%s7521_s17 + $0x300] sm:$0x3f]  ;;  %v6880_v30 = vpack.c.bf16 %v6669_v25, %v6667_v24  ;;  %v190_v34 = vld [vmem:[%s9765_s1 + $0xa8] sm:$0xff] }
  0x38   : > { %6127 = vmatmul.mubr.msk.f32.gmra.mrb[10].mxu1 %vm215_vm1, %v174_v37  ;;  %v6477_v28 = vld [vmem:[%s9765_s1 + $0x518] sm:$0xff]  ;;  %v189_v32 = vld [vmem:[%s9765_s1 + $0xa0] sm:$0xff]  ;;  %v6479_v35 = vld [vmem:[%s9765_s1 + $0x528] sm:$0xff] }
  0x39   : > { %6447 = vmatmul.mubr.msk.f32.gmra.mrb[10].mxu0 %vm215_vm1, %v6399_v38  ;;  %419 = vmatprep.mubr.f32.mxu1 %v7482_v0  ;;  %v6478_v33 = vld [vmem:[%s9765_s1 + $0x520] sm:$0xff]  ;;  %v191_v37 = vld [vmem:[%s9765_s1 + $0xb0] sm:$0xff]  ;;  %v194_v43 = vld [vmem:[%s9765_s1 + $0xc8] sm:$0xff] }
  0x3a   : > { %2751 = vmatprep.mubr.f32.mxu0 %v7482_v0  ;;  %v6480_v38 = vld [vmem:[%s9765_s1 + $0x530] sm:$0xff]  ;;  %v193_v41 = vld [vmem:[%s9765_s1 + $0xc0] sm:$0xff]  ;;  %v6491_v7 = vld [vmem:[%s9765_s1 + $0x588] sm:$0xff] }
  0x3b   : > { %v6482_v42 = vld [vmem:[%s9765_s1 + $0x540] sm:$0xff]  ;;  %v6279_v17 = vld [vmem:[%s7521_s17 + $0x148] sm:$0x3f]  ;;  %v6157_v19 = vld [vmem:[%s9765_s1 + $0x118] sm:$0xff] }
  0x3c   : > { %6128 = vmatmul.mubr.msk.f32.gmra.mrb[12].mxu1 %vm215_vm1, %v175_v39  ;;  %v192_v39 = vld [vmem:[%s9765_s1 + $0xb8] sm:$0xff]  ;;  %v6490_v62 = vld [vmem:[%s9765_s1 + $0x580] sm:$0xff] }
  0x3d   : > { %6448 = vmatmul.mubr.msk.f32.gmra.mrb[12].mxu0 %vm215_vm1, %v6400_v40  ;;  %425 = vmatprep.mubr.f32.mxu1 %v7482_v0  ;;  %v6481_v40 = vld [vmem:[%s9765_s1 + $0x538] sm:$0xff]  ;;  %v6270_v2 = vld [vmem:[%s7521_s17 + $0x100] sm:$0xff] }
  0x3e   : > { %2757 = vmatprep.mubr.f32.mxu0 %v7482_v0  ;;  %v6274_v11 = vld [vmem:[%s7521_s17 + $0x120] sm:$0xff] }
  0x3f   : > { %v6158_v24 = vld [vmem:[%s9765_s1 + $0x120] sm:$0xff] }
  0x40   : > { %6129 = vmatmul.mubr.msk.f32.gmra.mrb[14].mxu1 %vm215_vm1, %v176_v44  ;;  %v6483_v44 = vld [vmem:[%s9765_s1 + $0x548] sm:$0xff] }
  0x41   : > { %6449 = vmatmul.mubr.msk.f32.gmra.mrb[14].mxu0 %vm215_vm1, %v6401_v45  ;;  %431 = vmatprep.mubr.f32.mxu1 %v7482_v0  ;;  %v195_v45 = vld [vmem:[%s9765_s1 + $0xd0] sm:$0xff] }
  0x42   : > { %2763 = vmatprep.mubr.f32.mxu0 %v7482_v0 }
  0x44   : > { %6130 = vmatmul.mubr.msk.f32.gmra.mrb[16].mxu1 %vm215_vm1, %v177_v46  ;;  %v6484_v46 = vld [vmem:[%s9765_s1 + $0x550] sm:$0xff] }
  0x45   : > { %6450 = vmatmul.mubr.msk.f32.gmra.mrb[16].mxu0 %vm215_vm1, %v6402_v47  ;;  %437 = vmatprep.mubr.f32.mxu1 %v7482_v0  ;;  %v196_v47 = vld [vmem:[%s9765_s1 + $0xd8] sm:$0xff] }
  0x46   : > { %2769 = vmatprep.mubr.f32.mxu0 %v7482_v0 }
  0x48   : > { %6131 = vmatmul.mubr.msk.f32.gmra.mrb[18].mxu1 %vm215_vm1, %v178_v48  ;;  %v6485_v48 = vld [vmem:[%s9765_s1 + $0x558] sm:$0xff] }
  0x49   : > { %6451 = vmatmul.mubr.msk.f32.gmra.mrb[18].mxu0 %vm215_vm1, %v6403_v49  ;;  %443 = vmatprep.mubr.f32.mxu1 %v7482_v0  ;;  %v197_v49 = vld [vmem:[%s9765_s1 + $0xe0] sm:$0xff] }
  0x4a   : > { %2775 = vmatprep.mubr.f32.mxu0 %v7482_v0 }
  0x4c   : > { %6132 = vmatmul.mubr.msk.f32.gmra.mrb[20].mxu1 %vm215_vm1, %v179_v50  ;;  %v6486_v50 = vld [vmem:[%s9765_s1 + $0x560] sm:$0xff] }
  0x4d   : > { %6452 = vmatmul.mubr.msk.f32.gmra.mrb[20].mxu0 %vm215_vm1, %v6404_v51  ;;  %449 = vmatprep.mubr.f32.mxu1 %v7482_v0  ;;  %v198_v51 = vld [vmem:[%s9765_s1 + $0xe8] sm:$0xff] }
  0x4e   : > { %2781 = vmatprep.mubr.f32.mxu0 %v7482_v0 }
  0x50   : > { %6133 = vmatmul.mubr.msk.f32.gmra.mrb[22].mxu1 %vm215_vm1, %v180_v52  ;;  %v6487_v52 = vld [vmem:[%s9765_s1 + $0x568] sm:$0xff] }
  0x51   : > { %6453 = vmatmul.mubr.msk.f32.gmra.mrb[22].mxu0 %vm215_vm1, %v6405_v53  ;;  %455 = vmatprep.mubr.f32.mxu1 %v7482_v0  ;;  %v199_v53 = vld [vmem:[%s9765_s1 + $0xf0] sm:$0xff] }
  0x52   : > { %2787 = vmatprep.mubr.f32.mxu0 %v7482_v0 }
  0x54   : > { %6134 = vmatmul.mubr.msk.f32.gmra.mrb[24].mxu1 %vm215_vm1, %v181_v54  ;;  %v6488_v54 = vld [vmem:[%s9765_s1 + $0x570] sm:$0xff] }
  0x55   : > { %6454 = vmatmul.mubr.msk.f32.gmra.mrb[24].mxu0 %vm215_vm1, %v6406_v55  ;;  %461 = vmatprep.mubr.f32.mxu1 %v7482_v0  ;;  %v200_v55 = vld [vmem:[%s9765_s1 + $0xf8] sm:$0xff] }
  0x56   : > { %2793 = vmatprep.mubr.f32.mxu0 %v7482_v0 }
  0x58   : > { %6135 = vmatmul.mubr.msk.f32.gmra.mrb[26].mxu1 %vm215_vm1, %v182_v56  ;;  %v6489_v56 = vld [vmem:[%s9765_s1 + $0x578] sm:$0xff] }
  0x59   : > { %6455 = vmatmul.mubr.msk.f32.gmra.mrb[26].mxu0 %vm215_vm1, %v6407_v57  ;;  %467 = vmatprep.mubr.f32.mxu1 %v7482_v0  ;;  %v6266_v57 = vld [vmem:[%s7521_s17 + $0xe0] sm:$0xff] }
  0x5a   : > { %2799 = vmatprep.mubr.f32.mxu0 %v7482_v0 }
  0x5c   : > { %6136 = vmatmul.mubr.msk.f32.gmra.mrb[28].mxu1 %vm215_vm1, %v183_v58  ;;  %v6268_v58 = vld [vmem:[%s7521_s17 + $0xf0] sm:$0xff] }
  0x5d   : > { %6456 = vmatmul.mubr.msk.f32.gmra.mrb[28].mxu0 %vm215_vm1, %v6408_v59  ;;  %473 = vmatprep.mubr.f32.mxu1 %v7482_v0  ;;  %v6271_v59 = vld [vmem:[%s7521_s17 + $0x108] sm:$0xff]  ;;  %v6822_v63 = vpack.c.bf16 %v6268_v58, %v6266_v57  ;;  %v6554_v57 = vld [vmem:[%s9765_s1 + $0x600] sm:$0xff] }
  0x5e   : > { %2805 = vmatprep.mubr.f32.mxu0 %v7482_v0 }
  0x60   : > { %6137 = vmatmul.mubr.msk.f32.gmra.mrb[30].mxu1 %vm215_vm1, %v184_v60  ;;  %v6273_v60 = vld [vmem:[%s7521_s17 + $0x118] sm:$0xff] }
  0x61   : > { %6457 = vmatmul.mubr.msk.f32.gmra.mrb[30].mxu0 %vm215_vm1, %v6409_v61  ;;  %479 = vmatprep.mubr.f32.mxu1 %v7482_v0  ;;  %v6154_v61 = vld [vmem:[%s9765_s1 + $0x100] sm:$0xff]  ;;  %v6824_v1 = vpack.c.bf16 %v6273_v60, %v6271_v59  ;;  %v6670_v60 = vld [vmem:[%s7521_s17 + $0x330] sm:$0xff] }
  0x62   : > { %3314 = vmatprep.mubr.f32.mxu0 %v7482_v0 }
  0x64   : > { %6138 = vmatmul.mubr.msk.f32.gmra.mrb[32].mxu1 %vm215_vm1, %v185_v3  ;;  %v6272_v3 = vld [vmem:[%s7521_s17 + $0x110] sm:$0xff] }
  0x65   : > { %6522 = vmatmul.mubr.msk.f32.vlgmr.msra.gmra.mrb[0].mxu0 %vm215_vm1, %v6474_v4  ;;  %485 = vmatprep.mubr.f32.mxu1 %v7482_v0  ;;  %v6275_v4 = vld [vmem:[%s7521_s17 + $0x128] sm:$0xff]  ;;  %v6826_v9 = vpack.c.bf16 %v6272_v3, %v6270_v2 }
  0x66   : > { %6871 = vmatpush1.bf16.msra.mxu0 %v6870_v5  ;;  %3320 = vmatprep.mubr.f32.mxu0 %v7482_v0  ;;  %v6277_v5 = vld [vmem:[%s7521_s17 + $0x138] sm:$0xff]  ;;  %v6555_v2 = vld [vmem:[%s9765_s1 + $0x608] sm:$0xff] }
  0x67   : > { %6873 = vmatprep.subr.bf16.mxu0 %v6872_v6  ;;  %v6155_v6 = vld [vmem:[%s9765_s1 + $0x108] sm:$0xff]  ;;  %v6828_v10 = vpack.c.bf16 %v6277_v5, %v6275_v4  ;;  %v6674_v5 = vld [vmem:[%s7521_s17 + $0x350] sm:$0xff] }
  0x68   : > { %6139 = vmatmul.mubr.msk.f32.gmra.mrb[34].mxu1 %vm215_vm1, %v186_v12  ;;  %v6276_v12 = vld [vmem:[%s7521_s17 + $0x130] sm:$0xff] }
  0x69   : > { %6523 = vmatmul.mubr.msk.f32.gmra.mrb[2].mxu0 %vm215_vm1, %v6475_v14  ;;  %491 = vmatprep.mubr.f32.mxu1 %v7482_v0  ;;  %v6156_v14 = vld [vmem:[%s9765_s1 + $0x110] sm:$0xff] }
  0x6a   : > { %3326 = vmatprep.mubr.f32.mxu0 %v7482_v0  ;;  %6875 = vmatpush1.bf16.msra.mxu0 %v6874_v15  ;;  %v6492_v15 = vld [vmem:[%s9765_s1 + $0x590] sm:$0xff] }
  0x6b   : > { %6877 = vmatprep.subr.bf16.mxu0 %v6876_v16  ;;  %v6830_v16 = vpack.c.bf16 %v6276_v12, %v6274_v11  ;;  %v6679_v11 = vld [vmem:[%s7521_s17 + $0x378] sm:$0x3f]  ;;  %v6747_v12 = vld [vmem:[%s7521_s17 + $0x388] sm:$0xff] }
  0x6c   : > { %6140 = vmatmul.mubr.msk.f32.gmra.mrb[36].mxu1 %vm215_vm1, %v187_v20  ;;  %v6493_v20 = vld [vmem:[%s9765_s1 + $0x598] sm:$0xff] }
  0x6d   : > { %6524 = vmatmul.mubr.msk.f32.gmra.mrb[4].mxu0 %vm215_vm1, %v6476_v21  ;;  %497 = vmatprep.mubr.f32.mxu1 %v7482_v0  ;;  %v6278_v21 = vld [vmem:[%s7521_s17 + $0x140] sm:$0x3f] }
  0x6e   : > { %3332 = vmatprep.mubr.f32.mxu0 %v7482_v0  ;;  %6879 = vmatpush1.bf16.msra.mxu0 %v6878_v22  ;;  %v6347_v22 = vld [vmem:[%s7521_s17 + $0x158] sm:$0xff] }
  0x6f   : > { %6600 = vmatprep.subr.msk.mxu0 %vm312_vm0, %v6599_v23  ;;  %v6349_v23 = vld [vmem:[%s7521_s17 + $0x168] sm:$0xff] }
  0x70   : > { %6141 = vmatmul.mubr.msk.f32.gmra.mrb[38].mxu1 %vm215_vm1, %v188_v27  ;;  %v6832_v25 = vpack.c.bf16 %v6349_v23, %v6347_v22  ;;  %v6494_v27 = vld [vmem:[%s9765_s1 + $0x5a0] sm:$0xff]  ;;  %v6175_v22 = vld [vmem:[%s9765_s1 + $0x1a8] sm:$0xff] }
  0x71   : > { %6525 = vmatmul.mubr.msk.f32.gmra.mrb[6].mxu0 %vm215_vm1, %v6477_v28  ;;  %503 = vmatprep.mubr.f32.mxu1 %v7482_v0  ;;  %v6159_v28 = vld [vmem:[%s9765_s1 + $0x128] sm:$0xff] }
  0x72   : > { %3338 = vmatprep.mubr.f32.mxu0 %v7482_v0  ;;  %6601 = vmatpush1.msk.msra.mxu0 %vm312_vm0, %v6598_v29  ;;  %v6495_v29 = vld [vmem:[%s9765_s1 + $0x5a8] sm:$0xff] }
  0x73   : > { %6881 = vmatprep.subr.bf16.mxu0 %v6880_v30  ;;  %v6160_v30 = vld [vmem:[%s9765_s1 + $0x130] sm:$0xff]  ;;  %v6559_v23 = vld [vmem:[%s9765_s1 + $0x628] sm:$0xff] }
  0x74   : > { %6142 = vmatmul.mubr.msk.f32.gmra.mrb[40].mxu1 %vm215_vm1, %v189_v32  ;;  %v6496_v32 = vld [vmem:[%s9765_s1 + $0x5b0] sm:$0xff] }
  0x75   : > { %6526 = vmatmul.mubr.msk.f32.gmra.mrb[8].mxu0 %vm215_vm1, %v6478_v33  ;;  %509 = vmatprep.mubr.f32.mxu1 %v7482_v0  ;;  %v6161_v33 = vld [vmem:[%s9765_s1 + $0x138] sm:$0xff] }
  0x76   : > { %3344 = vmatprep.mubr.f32.mxu0 %v7482_v0 }
  0x78   : > { %6143 = vmatmul.mubr.msk.f32.gmra.mrb[42].mxu1 %vm215_vm1, %v190_v34  ;;  %v6497_v34 = vld [vmem:[%s9765_s1 + $0x5b8] sm:$0xff] }
  0x79   : > { %6527 = vmatmul.mubr.msk.f32.gmra.mrb[10].mxu0 %vm215_vm1, %v6479_v35  ;;  %515 = vmatprep.mubr.f32.mxu1 %v7482_v0  ;;  %v6162_v35 = vld [vmem:[%s9765_s1 + $0x140] sm:$0xff] }
  0x7a   : > { %3350 = vmatprep.mubr.f32.mxu0 %v7482_v0 }
  0x7c   : > { %6144 = vmatmul.mubr.msk.f32.gmra.mrb[44].mxu1 %vm215_vm1, %v191_v37  ;;  %v6498_v37 = vld [vmem:[%s9765_s1 + $0x5c0] sm:$0xff] }
  0x7d   : > { %6528 = vmatmul.mubr.msk.f32.gmra.mrb[12].mxu0 %vm215_vm1, %v6480_v38  ;;  %521 = vmatprep.mubr.f32.mxu1 %v7482_v0  ;;  %v6163_v38 = vld [vmem:[%s9765_s1 + $0x148] sm:$0xff] }
  0x7e   : > { %3356 = vmatprep.mubr.f32.mxu0 %v7482_v0 }
  0x80   : > { %6145 = vmatmul.mubr.msk.f32.gmra.mrb[46].mxu1 %vm215_vm1, %v192_v39  ;;  %v6499_v39 = vld [vmem:[%s9765_s1 + $0x5c8] sm:$0xff] }
  0x81   : > { %6529 = vmatmul.mubr.msk.f32.gmra.mrb[14].mxu0 %vm215_vm1, %v6481_v40  ;;  %527 = vmatprep.mubr.f32.mxu1 %v7482_v0  ;;  %v6164_v40 = vld [vmem:[%s9765_s1 + $0x150] sm:$0xff] }
  0x82   : > { %3362 = vmatprep.mubr.f32.mxu0 %v7482_v0 }
  0x84   : > { %6146 = vmatmul.mubr.msk.f32.gmra.mrb[48].mxu1 %vm215_vm1, %v193_v41  ;;  %v6500_v41 = vld [vmem:[%s9765_s1 + $0x5d0] sm:$0xff] }
  0x85   : > { %6530 = vmatmul.mubr.msk.f32.gmra.mrb[16].mxu0 %vm215_vm1, %v6482_v42  ;;  %533 = vmatprep.mubr.f32.mxu1 %v7482_v0  ;;  %v6165_v42 = vld [vmem:[%s9765_s1 + $0x158] sm:$0xff] }
  0x86   : > { %3368 = vmatprep.mubr.f32.mxu0 %v7482_v0 }
  0x88   : > { %6147 = vmatmul.mubr.msk.f32.gmra.mrb[50].mxu1 %vm215_vm1, %v194_v43  ;;  %v6501_v43 = vld [vmem:[%s9765_s1 + $0x5d8] sm:$0xff] }
  0x89   : > { %6531 = vmatmul.mubr.msk.f32.gmra.mrb[18].mxu0 %vm215_vm1, %v6483_v44  ;;  %539 = vmatprep.mubr.f32.mxu1 %v7482_v0  ;;  %v6166_v44 = vld [vmem:[%s9765_s1 + $0x160] sm:$0xff] }
  0x8a   : > { %3374 = vmatprep.mubr.f32.mxu0 %v7482_v0 }
  0x8c   : > { %6148 = vmatmul.mubr.msk.f32.gmra.mrb[52].mxu1 %vm215_vm1, %v195_v45  ;;  %v6502_v45 = vld [vmem:[%s9765_s1 + $0x5e0] sm:$0xff] }
  0x8d   : > { %6532 = vmatmul.mubr.msk.f32.gmra.mrb[20].mxu0 %vm215_vm1, %v6484_v46  ;;  %545 = vmatprep.mubr.f32.mxu1 %v7482_v0  ;;  %v6167_v46 = vld [vmem:[%s9765_s1 + $0x168] sm:$0xff] }
  0x8e   : > { %3380 = vmatprep.mubr.f32.mxu0 %v7482_v0 }
  0x90   : > { %6149 = vmatmul.mubr.msk.f32.gmra.mrb[54].mxu1 %vm215_vm1, %v196_v47  ;;  %v6503_v47 = vld [vmem:[%s9765_s1 + $0x5e8] sm:$0xff] }
  0x91   : > { %6533 = vmatmul.mubr.msk.f32.gmra.mrb[22].mxu0 %vm215_vm1, %v6485_v48  ;;  %551 = vmatprep.mubr.f32.mxu1 %v7482_v0  ;;  %v6168_v48 = vld [vmem:[%s9765_s1 + $0x170] sm:$0xff] }
  0x92   : > { %3386 = vmatprep.mubr.f32.mxu0 %v7482_v0 }
  0x94   : > { %6150 = vmatmul.mubr.msk.f32.gmra.mrb[56].mxu1 %vm215_vm1, %v197_v49  ;;  %v6504_v49 = vld [vmem:[%s9765_s1 + $0x5f0] sm:$0xff] }
  0x95   : > { %6534 = vmatmul.mubr.msk.f32.gmra.mrb[24].mxu0 %vm215_vm1, %v6486_v50  ;;  %557 = vmatprep.mubr.f32.mxu1 %v7482_v0  ;;  %v6169_v50 = vld [vmem:[%s9765_s1 + $0x178] sm:$0xff] }
  0x96   : > { %3392 = vmatprep.mubr.f32.mxu0 %v7482_v0 }
  0x98   : > { %6151 = vmatmul.mubr.msk.f32.gmra.mrb[58].mxu1 %vm215_vm1, %v198_v51  ;;  %v6505_v51 = vld [vmem:[%s9765_s1 + $0x5f8] sm:$0xff] }
  0x99   : > { %6535 = vmatmul.mubr.msk.f32.gmra.mrb[26].mxu0 %vm215_vm1, %v6487_v52  ;;  %563 = vmatprep.mubr.f32.mxu1 %v7482_v0  ;;  %v6666_v52 = vld [vmem:[%s7521_s17 + $0x310] sm:$0xff] }
  0x9a   : > { %3398 = vmatprep.mubr.f32.mxu0 %v7482_v0 }
  0x9c   : > { %6152 = vmatmul.mubr.msk.f32.gmra.mrb[60].mxu1 %vm215_vm1, %v199_v53  ;;  %v6668_v53 = vld [vmem:[%s7521_s17 + $0x320] sm:$0xff] }
  0x9d   : > { %6536 = vmatmul.mubr.msk.f32.gmra.mrb[28].mxu0 %vm215_vm1, %v6488_v54  ;;  %569 = vmatprep.mubr.f32.mxu1 %v7482_v0  ;;  %v6671_v54 = vld [vmem:[%s7521_s17 + $0x338] sm:$0xff]  ;;  %v6882_v58 = vpack.c.bf16 %v6668_v53, %v6666_v52  ;;  %v6570_v52 = vld [vmem:[%s9765_s1 + $0x680] sm:$0xff] }
  0x9e   : > { %3404 = vmatprep.mubr.f32.mxu0 %v7482_v0 }
  0xa0   : > { %6153 = vmatmul.mubr.msk.f32.gmra.mrb[62].mxu1 %vm215_vm1, %v200_v55  ;;  %v6673_v55 = vld [vmem:[%s7521_s17 + $0x348] sm:$0xff] }
  0xa1   : > { %6537 = vmatmul.mubr.msk.f32.gmra.mrb[30].mxu0 %vm215_vm1, %v6489_v56  ;;  %918 = vmatprep.mubr.f32.mxu1 %v7482_v0  ;;  %v6170_v56 = vld [vmem:[%s9765_s1 + $0x180] sm:$0xff]  ;;  %v6884_v59 = vpack.c.bf16 %v6673_v55, %v6671_v54  ;;  %v6350_v55 = vld [vmem:[%s7521_s17 + $0x170] sm:$0xff] }
  0xa2   : > { %3410 = vmatprep.mubr.f32.mxu0 %v7482_v0 }
  0xa4   : > { %6202 = vmatmul.mubr.msk.f32.vlgmr.msra.gmra.mrb[0].mxu1 %vm215_vm1, %v6154_v61  ;;  %v6672_v61 = vld [vmem:[%s7521_s17 + $0x340] sm:$0xff] }
  0xa5   : > { %6538 = vmatmul.mubr.msk.f32.gmra.mrb[32].mxu0 %vm215_vm1, %v6490_v62  ;;  %924 = vmatprep.mubr.f32.mxu1 %v7482_v0  ;;  %v6675_v62 = vld [vmem:[%s7521_s17 + $0x358] sm:$0xff]  ;;  %v6886_v3 = vpack.c.bf16 %v6672_v61, %v6670_v60  ;;  %v6571_v60 = vld [vmem:[%s9765_s1 + $0x688] sm:$0xff] }
  0xa6   : > { %3416 = vmatprep.mubr.f32.mxu0 %v7482_v0  ;;  %6823 = vmatpush1.bf16.msra.mxu1 %v6822_v63  ;;  %v6677_v63 = vld [vmem:[%s7521_s17 + $0x368] sm:$0xff] }
  0xa7   : > { %6825 = vmatprep.subr.bf16.mxu1 %v6824_v1  ;;  %v6171_v1 = vld [vmem:[%s9765_s1 + $0x188] sm:$0xff]  ;;  %v6888_v4 = vpack.c.bf16 %v6677_v63, %v6675_v62  ;;  %v6354_v63 = vld [vmem:[%s7521_s17 + $0x190] sm:$0xff] }
  0xa8   : > { %6203 = vmatmul.mubr.msk.f32.gmra.mrb[2].mxu1 %vm215_vm1, %v6155_v6  ;;  %v6676_v6 = vld [vmem:[%s7521_s17 + $0x360] sm:$0xff] }
  0xa9   : > { %6539 = vmatmul.mubr.msk.f32.gmra.mrb[34].mxu0 %vm215_vm1, %v6491_v7  ;;  %930 = vmatprep.mubr.f32.mxu1 %v7482_v0  ;;  %v6172_v7 = vld [vmem:[%s9765_s1 + $0x190] sm:$0xff] }
  0xaa   : > { %3422 = vmatprep.mubr.f32.mxu0 %v7482_v0  ;;  %6827 = vmatpush1.bf16.msra.mxu1 %v6826_v9  ;;  %v6556_v9 = vld [vmem:[%s9765_s1 + $0x610] sm:$0xff] }
  0xab   : > { %6829 = vmatprep.subr.bf16.mxu1 %v6828_v10  ;;  %v6890_v10 = vpack.c.bf16 %v6676_v6, %v6674_v5  ;;  %v6359_v5 = vld [vmem:[%s7521_s17 + $0x1b8] sm:$0x3f] }
  0xac   : > { %6204 = vmatmul.mubr.msk.f32.gmra.mrb[4].mxu1 %vm215_vm1, %v6156_v14  ;;  %v6749_v14 = vld [vmem:[%s7521_s17 + $0x398] sm:$0xff] }
  0xad   : > { %6540 = vmatmul.mubr.msk.f32.gmra.mrb[36].mxu0 %vm215_vm1, %v6492_v15  ;;  %936 = vmatprep.mubr.f32.mxu1 %v7482_v0  ;;  %v6173_v15 = vld [vmem:[%s9765_s1 + $0x198] sm:$0xff] }
  0xae   : > { %3428 = vmatprep.mubr.f32.mxu0 %v7482_v0  ;;  %6831 = vmatpush1.bf16.msra.mxu1 %v6830_v16  ;;  %v6557_v16 = vld [vmem:[%s9765_s1 + $0x618] sm:$0xff] }
  0xaf   : > { %6280 = vmatprep.subr.msk.mxu1 %vm312_vm0, %v6279_v17  ;;  %v6678_v17 = vld [vmem:[%s7521_s17 + $0x370] sm:$0x3f]  ;;  %v6237_v6 = vld [vmem:[%s9765_s1 + $0x218] sm:$0xff] }
  0xb0   : > { %6205 = vmatmul.mubr.msk.f32.gmra.mrb[6].mxu1 %vm215_vm1, %v6157_v19  ;;  %v6892_v19 = vpack.c.bf16 %v6749_v14, %v6747_v12  ;;  %v6239_v12 = vld [vmem:[%s9765_s1 + $0x228] sm:$0xff] }
  0xb1   : > { %6541 = vmatmul.mubr.msk.f32.gmra.mrb[38].mxu0 %vm215_vm1, %v6493_v20  ;;  %942 = vmatprep.mubr.f32.mxu1 %v7482_v0  ;;  %v6174_v20 = vld [vmem:[%s9765_s1 + $0x1a0] sm:$0xff]  ;;  %v6575_v14 = vld [vmem:[%s9765_s1 + $0x6a8] sm:$0xff] }
  0xb2   : > { %3434 = vmatprep.mubr.f32.mxu0 %v7482_v0  ;;  %6281 = vmatpush1.msk.msra.mxu1 %vm312_vm0, %v6278_v21  ;;  %v6558_v21 = vld [vmem:[%s9765_s1 + $0x620] sm:$0xff] }
  0xb3   : > { %6833 = vmatprep.subr.bf16.mxu1 %v6832_v25  ;;  %v6560_v25 = vld [vmem:[%s9765_s1 + $0x630] sm:$0xff] }
  0xb4   : > { %6206 = vmatmul.mubr.msk.f32.gmra.mrb[8].mxu1 %vm215_vm1, %v6158_v24  ;;  %v6176_v24 = vld [vmem:[%s9765_s1 + $0x1b0] sm:$0xff] }
  0xb5   : > { %6542 = vmatmul.mubr.msk.f32.gmra.mrb[40].mxu0 %vm215_vm1, %v6494_v27  ;;  %948 = vmatprep.mubr.f32.mxu1 %v7482_v0  ;;  %v6177_v27 = vld [vmem:[%s9765_s1 + $0x1b8] sm:$0xff] }
  0xb6   : > { %3440 = vmatprep.mubr.f32.mxu0 %v7482_v0 }
  0xb8   : > { %6207 = vmatmul.mubr.msk.f32.gmra.mrb[10].mxu1 %vm215_vm1, %v6159_v28  ;;  %v6561_v28 = vld [vmem:[%s9765_s1 + $0x638] sm:$0xff] }
  0xb9   : > { %6543 = vmatmul.mubr.msk.f32.gmra.mrb[42].mxu0 %vm215_vm1, %v6495_v29  ;;  %954 = vmatprep.mubr.f32.mxu1 %v7482_v0  ;;  %v6178_v29 = vld [vmem:[%s9765_s1 + $0x1c0] sm:$0xff] }
  0xba   : > { %3446 = vmatprep.mubr.f32.mxu0 %v7482_v0 }
  0xbc   : > { %6208 = vmatmul.mubr.msk.f32.gmra.mrb[12].mxu1 %vm215_vm1, %v6160_v30  ;;  %v6562_v30 = vld [vmem:[%s9765_s1 + $0x640] sm:$0xff] }
  0xbd   : > { %6544 = vmatmul.mubr.msk.f32.gmra.mrb[44].mxu0 %vm215_vm1, %v6496_v32  ;;  %960 = vmatprep.mubr.f32.mxu1 %v7482_v0  ;;  %v6179_v32 = vld [vmem:[%s9765_s1 + $0x1c8] sm:$0xff] }
  0xbe   : > { %3452 = vmatprep.mubr.f32.mxu0 %v7482_v0 }
  0xc0   : > { %6209 = vmatmul.mubr.msk.f32.gmra.mrb[14].mxu1 %vm215_vm1, %v6161_v33  ;;  %v6563_v33 = vld [vmem:[%s9765_s1 + $0x648] sm:$0xff] }
  0xc1   : > { %6545 = vmatmul.mubr.msk.f32.gmra.mrb[46].mxu0 %vm215_vm1, %v6497_v34  ;;  %966 = vmatprep.mubr.f32.mxu1 %v7482_v0  ;;  %v6180_v34 = vld [vmem:[%s9765_s1 + $0x1d0] sm:$0xff] }
  0xc2   : > { %3458 = vmatprep.mubr.f32.mxu0 %v7482_v0 }
  0xc4   : > { %6210 = vmatmul.mubr.msk.f32.gmra.mrb[16].mxu1 %vm215_vm1, %v6162_v35  ;;  %v6564_v35 = vld [vmem:[%s9765_s1 + $0x650] sm:$0xff] }
  0xc5   : > { %6546 = vmatmul.mubr.msk.f32.gmra.mrb[48].mxu0 %vm215_vm1, %v6498_v37  ;;  %972 = vmatprep.mubr.f32.mxu1 %v7482_v0  ;;  %v6181_v37 = vld [vmem:[%s9765_s1 + $0x1d8] sm:$0xff] }
  0xc6   : > { %3464 = vmatprep.mubr.f32.mxu0 %v7482_v0 }
  0xc8   : > { %6211 = vmatmul.mubr.msk.f32.gmra.mrb[18].mxu1 %vm215_vm1, %v6163_v38  ;;  %v6565_v38 = vld [vmem:[%s9765_s1 + $0x658] sm:$0xff] }
  0xc9   : > { %6547 = vmatmul.mubr.msk.f32.gmra.mrb[50].mxu0 %vm215_vm1, %v6499_v39  ;;  %978 = vmatprep.mubr.f32.mxu1 %v7482_v0  ;;  %v6182_v39 = vld [vmem:[%s9765_s1 + $0x1e0] sm:$0xff] }
  0xca   : > { %3470 = vmatprep.mubr.f32.mxu0 %v7482_v0 }
  0xcc   : > { %6212 = vmatmul.mubr.msk.f32.gmra.mrb[20].mxu1 %vm215_vm1, %v6164_v40  ;;  %v6566_v40 = vld [vmem:[%s9765_s1 + $0x660] sm:$0xff] }
  0xcd   : > { %6548 = vmatmul.mubr.msk.f32.gmra.mrb[52].mxu0 %vm215_vm1, %v6500_v41  ;;  %984 = vmatprep.mubr.f32.mxu1 %v7482_v0  ;;  %v6183_v41 = vld [vmem:[%s9765_s1 + $0x1e8] sm:$0xff] }
  0xce   : > { %3476 = vmatprep.mubr.f32.mxu0 %v7482_v0 }
  0xd0   : > { %6213 = vmatmul.mubr.msk.f32.gmra.mrb[22].mxu1 %vm215_vm1, %v6165_v42  ;;  %v6567_v42 = vld [vmem:[%s9765_s1 + $0x668] sm:$0xff] }
  0xd1   : > { %6549 = vmatmul.mubr.msk.f32.gmra.mrb[54].mxu0 %vm215_vm1, %v6501_v43  ;;  %990 = vmatprep.mubr.f32.mxu1 %v7482_v0  ;;  %v6184_v43 = vld [vmem:[%s9765_s1 + $0x1f0] sm:$0xff] }
  0xd2   : > { %3482 = vmatprep.mubr.f32.mxu0 %v7482_v0 }
  0xd4   : > { %6214 = vmatmul.mubr.msk.f32.gmra.mrb[24].mxu1 %vm215_vm1, %v6166_v44  ;;  %v6568_v44 = vld [vmem:[%s9765_s1 + $0x670] sm:$0xff] }
  0xd5   : > { %6550 = vmatmul.mubr.msk.f32.gmra.mrb[56].mxu0 %vm215_vm1, %v6502_v45  ;;  %996 = vmatprep.mubr.f32.mxu1 %v7482_v0  ;;  %v6185_v45 = vld [vmem:[%s9765_s1 + $0x1f8] sm:$0xff] }
  0xd6   : > { %3488 = vmatprep.mubr.f32.mxu0 %v7482_v0 }
  0xd8   : > { %6215 = vmatmul.mubr.msk.f32.gmra.mrb[26].mxu1 %vm215_vm1, %v6167_v46  ;;  %v6569_v46 = vld [vmem:[%s9765_s1 + $0x678] sm:$0xff] }
  0xd9   : > { %6551 = vmatmul.mubr.msk.f32.gmra.mrb[58].mxu0 %vm215_vm1, %v6503_v47  ;;  %1002 = vmatprep.mubr.f32.mxu1 %v7482_v0  ;;  %v6346_v47 = vld [vmem:[%s7521_s17 + $0x150] sm:$0xff] }
  0xda   : > { %3494 = vmatprep.mubr.f32.mxu0 %v7482_v0 }
  0xdc   : > { %6216 = vmatmul.mubr.msk.f32.gmra.mrb[28].mxu1 %vm215_vm1, %v6168_v48  ;;  %v6348_v48 = vld [vmem:[%s7521_s17 + $0x160] sm:$0xff] }
  0xdd   : > { %6552 = vmatmul.mubr.msk.f32.gmra.mrb[60].mxu0 %vm215_vm1, %v6504_v49  ;;  %1008 = vmatprep.mubr.f32.mxu1 %v7482_v0  ;;  %v6351_v49 = vld [vmem:[%s7521_s17 + $0x178] sm:$0xff]  ;;  %v6834_v53 = vpack.c.bf16 %v6348_v48, %v6346_v47  ;;  %v6752_v47 = vld [vmem:[%s7521_s17 + $0x3b0] sm:$0xff]  ;;  %v6755_v48 = vld [vmem:[%s7521_s17 + $0x3c8] sm:$0xff] }
  0xde   : > { %3500 = vmatprep.mubr.f32.mxu0 %v7482_v0 }
  0xe0   : > { %6217 = vmatmul.mubr.msk.f32.gmra.mrb[30].mxu1 %vm215_vm1, %v6169_v50  ;;  %v6353_v50 = vld [vmem:[%s7521_s17 + $0x188] sm:$0xff] }
  0xe1   : > { %6553 = vmatmul.mubr.msk.f32.gmra.mrb[62].mxu0 %vm215_vm1, %v6505_v51  ;;  %1014 = vmatprep.mubr.f32.mxu1 %v7482_v0  ;;  %v6234_v51 = vld [vmem:[%s9765_s1 + $0x200] sm:$0xff]  ;;  %v6836_v54 = vpack.c.bf16 %v6353_v50, %v6351_v49  ;;  %v6757_v49 = vld [vmem:[%s7521_s17 + $0x3d8] sm:$0xff]  ;;  %v6251_v50 = vld [vmem:[%s9765_s1 + $0x288] sm:$0xff] }
  0xe2   : > { %3913 = vmatprep.mubr.f32.mxu0 %v7482_v0 }
  0xe4   : > { %6218 = vmatmul.mubr.msk.f32.gmra.mrb[32].mxu1 %vm215_vm1, %v6170_v56  ;;  %v6352_v56 = vld [vmem:[%s7521_s17 + $0x180] sm:$0xff] }
  0xe5   : > { %6602 = vmatmul.mubr.msk.f32.vlgmr.msra.gmra.mrb[0].mxu0 %vm215_vm1, %v6554_v57  ;;  %1020 = vmatprep.mubr.f32.mxu1 %v7482_v0  ;;  %v6355_v57 = vld [vmem:[%s7521_s17 + $0x198] sm:$0xff]  ;;  %v6838_v61 = vpack.c.bf16 %v6352_v56, %v6350_v55  ;;  %v6756_v55 = vld [vmem:[%s7521_s17 + $0x3d0] sm:$0xff] }
  0xe6   : > { %6883 = vmatpush1.bf16.msra.mxu0 %v6882_v58  ;;  %3919 = vmatprep.mubr.f32.mxu0 %v7482_v0  ;;  %v6357_v58 = vld [vmem:[%s7521_s17 + $0x1a8] sm:$0xff]  ;;  %v6252_v56 = vld [vmem:[%s9765_s1 + $0x290] sm:$0xff] }
  0xe7   : > { %6885 = vmatprep.subr.bf16.mxu0 %v6884_v59  ;;  %v6235_v59 = vld [vmem:[%s9765_s1 + $0x208] sm:$0xff]  ;;  %v6840_v62 = vpack.c.bf16 %v6357_v58, %v6355_v57  ;;  %v6636_v57 = vld [vmem:[%s9765_s1 + $0x710] sm:$0xff] }
  0xe8   : > { %6219 = vmatmul.mubr.msk.f32.gmra.mrb[34].mxu1 %vm215_vm1, %v6171_v1  ;;  %v6356_v1 = vld [vmem:[%s7521_s17 + $0x1a0] sm:$0xff] }
  0xe9   : > { %6603 = vmatmul.mubr.msk.f32.gmra.mrb[2].mxu0 %vm215_vm1, %v6555_v2  ;;  %1026 = vmatprep.mubr.f32.mxu1 %v7482_v0  ;;  %v6236_v2 = vld [vmem:[%s9765_s1 + $0x210] sm:$0xff] }
  0xea   : > { %3925 = vmatprep.mubr.f32.mxu0 %v7482_v0  ;;  %6887 = vmatpush1.bf16.msra.mxu0 %v6886_v3  ;;  %v6572_v3 = vld [vmem:[%s9765_s1 + $0x690] sm:$0xff] }
  0xeb   : > { %6889 = vmatprep.subr.bf16.mxu0 %v6888_v4  ;;  %v6842_v4 = vpack.c.bf16 %v6356_v1, %v6354_v63  ;;  %v6254_v63 = vld [vmem:[%s9765_s1 + $0x2a0] sm:$0xff] }
  0xec   : > { %6220 = vmatmul.mubr.msk.f32.gmra.mrb[36].mxu1 %vm215_vm1, %v6172_v7  ;;  %v6573_v7 = vld [vmem:[%s9765_s1 + $0x698] sm:$0xff]  ;;  %v6638_v1 = vld [vmem:[%s9765_s1 + $0x720] sm:$0xff] }
  0xed   : > { %6604 = vmatmul.mubr.msk.f32.gmra.mrb[4].mxu0 %vm215_vm1, %v6556_v9  ;;  %1032 = vmatprep.mubr.f32.mxu1 %v7482_v0  ;;  %v6358_v9 = vld [vmem:[%s7521_s17 + $0x1b0] sm:$0x3f] }
  0xee   : > { %3931 = vmatprep.mubr.f32.mxu0 %v7482_v0  ;;  %6891 = vmatpush1.bf16.msra.mxu0 %v6890_v10  ;;  %v6238_v10 = vld [vmem:[%s9765_s1 + $0x220] sm:$0xff] }
  0xef   : > { %6680 = vmatprep.subr.msk.mxu0 %vm312_vm0, %v6679_v11  ;;  %v6574_v11 = vld [vmem:[%s9765_s1 + $0x6a0] sm:$0xff] }
  0xf0   : > { %6221 = vmatmul.mubr.msk.f32.gmra.mrb[38].mxu1 %vm215_vm1, %v6173_v15  ;;  %v6576_v15 = vld [vmem:[%s9765_s1 + $0x6b0] sm:$0xff] }
  0xf1   : > { %6605 = vmatmul.mubr.msk.f32.gmra.mrb[6].mxu0 %vm215_vm1, %v6557_v16  ;;  %1038 = vmatprep.mubr.f32.mxu1 %v7482_v0  ;;  %v6241_v16 = vld [vmem:[%s9765_s1 + $0x238] sm:$0xff] }
  0xf2   : > { %3937 = vmatprep.mubr.f32.mxu0 %v7482_v0  ;;  %6681 = vmatpush1.msk.msra.mxu0 %vm312_vm0, %v6678_v17  ;;  %v6577_v17 = vld [vmem:[%s9765_s1 + $0x6b8] sm:$0xff] }
  0xf3   : > { %6893 = vmatprep.subr.bf16.mxu0 %v6892_v19  ;;  %v6242_v19 = vld [vmem:[%s9765_s1 + $0x240] sm:$0xff] }
  0xf4   : > { %6222 = vmatmul.mubr.msk.f32.gmra.mrb[40].mxu1 %vm215_vm1, %v6174_v20  ;;  %v6578_v20 = vld [vmem:[%s9765_s1 + $0x6c0] sm:$0xff] }
  0xf5   : > { %6606 = vmatmul.mubr.msk.f32.gmra.mrb[8].mxu0 %vm215_vm1, %v6558_v21  ;;  %1044 = vmatprep.mubr.f32.mxu1 %v7482_v0  ;;  %v6243_v21 = vld [vmem:[%s9765_s1 + $0x248] sm:$0xff] }
  0xf6   : > { %3943 = vmatprep.mubr.f32.mxu0 %v7482_v0 }
  0xf8   : > { %6223 = vmatmul.mubr.msk.f32.gmra.mrb[42].mxu1 %vm215_vm1, %v6175_v22  ;;  %v6579_v22 = vld [vmem:[%s9765_s1 + $0x6c8] sm:$0xff] }
  0xf9   : > { %6607 = vmatmul.mubr.msk.f32.gmra.mrb[10].mxu0 %vm215_vm1, %v6559_v23  ;;  %1050 = vmatprep.mubr.f32.mxu1 %v7482_v0  ;;  %v6244_v23 = vld [vmem:[%s9765_s1 + $0x250] sm:$0xff] }
  0xfa   : > { %3949 = vmatprep.mubr.f32.mxu0 %v7482_v0 }
  0xfc   : > { %6224 = vmatmul.mubr.msk.f32.gmra.mrb[44].mxu1 %vm215_vm1, %v6176_v24  ;;  %v6580_v24 = vld [vmem:[%s9765_s1 + $0x6d0] sm:$0xff] }
  0xfd   : > { %6608 = vmatmul.mubr.msk.f32.gmra.mrb[12].mxu0 %vm215_vm1, %v6560_v25  ;;  %1056 = vmatprep.mubr.f32.mxu1 %v7482_v0  ;;  %v6245_v25 = vld [vmem:[%s9765_s1 + $0x258] sm:$0xff] }
  0xfe   : > { %3955 = vmatprep.mubr.f32.mxu0 %v7482_v0 }
 0x100   : > { %6225 = vmatmul.mubr.msk.f32.gmra.mrb[46].mxu1 %vm215_vm1, %v6177_v27  ;;  %v6581_v27 = vld [vmem:[%s9765_s1 + $0x6d8] sm:$0xff] }
 0x101   : > { %6609 = vmatmul.mubr.msk.f32.gmra.mrb[14].mxu0 %vm215_vm1, %v6561_v28  ;;  %1062 = vmatprep.mubr.f32.mxu1 %v7482_v0  ;;  %v6246_v28 = vld [vmem:[%s9765_s1 + $0x260] sm:$0xff] }
 0x102   : > { %3961 = vmatprep.mubr.f32.mxu0 %v7482_v0 }
 0x104   : > { %6226 = vmatmul.mubr.msk.f32.gmra.mrb[48].mxu1 %vm215_vm1, %v6178_v29  ;;  %v6582_v29 = vld [vmem:[%s9765_s1 + $0x6e0] sm:$0xff] }
 0x105   : > { %6610 = vmatmul.mubr.msk.f32.gmra.mrb[16].mxu0 %vm215_vm1, %v6562_v30  ;;  %1068 = vmatprep.mubr.f32.mxu1 %v7482_v0  ;;  %v6247_v30 = vld [vmem:[%s9765_s1 + $0x268] sm:$0xff] }
 0x106   : > { %3967 = vmatprep.mubr.f32.mxu0 %v7482_v0 }
 0x108   : > { %6227 = vmatmul.mubr.msk.f32.gmra.mrb[50].mxu1 %vm215_vm1, %v6179_v32  ;;  %v6583_v32 = vld [vmem:[%s9765_s1 + $0x6e8] sm:$0xff] }
 0x109   : > { %6611 = vmatmul.mubr.msk.f32.gmra.mrb[18].mxu0 %vm215_vm1, %v6563_v33  ;;  %1074 = vmatprep.mubr.f32.mxu1 %v7482_v0  ;;  %v6248_v33 = vld [vmem:[%s9765_s1 + $0x270] sm:$0xff] }
 0x10a   : > { %3973 = vmatprep.mubr.f32.mxu0 %v7482_v0 }
 0x10c   : > { %6228 = vmatmul.mubr.msk.f32.gmra.mrb[52].mxu1 %vm215_vm1, %v6180_v34  ;;  %v6584_v34 = vld [vmem:[%s9765_s1 + $0x6f0] sm:$0xff] }
 0x10d   : > { %6612 = vmatmul.mubr.msk.f32.gmra.mrb[20].mxu0 %vm215_vm1, %v6564_v35  ;;  %1080 = vmatprep.mubr.f32.mxu1 %v7482_v0  ;;  %v6249_v35 = vld [vmem:[%s9765_s1 + $0x278] sm:$0xff] }
 0x10e   : > { %3979 = vmatprep.mubr.f32.mxu0 %v7482_v0 }
 0x110   : > { %6229 = vmatmul.mubr.msk.f32.gmra.mrb[54].mxu1 %vm215_vm1, %v6181_v37  ;;  %v6585_v37 = vld [vmem:[%s9765_s1 + $0x6f8] sm:$0xff] }
 0x111   : > { %6613 = vmatmul.mubr.msk.f32.gmra.mrb[22].mxu0 %vm215_vm1, %v6565_v38  ;;  %1086 = vmatprep.mubr.f32.mxu1 %v7482_v0  ;;  %v6746_v38 = vld [vmem:[%s7521_s17 + $0x380] sm:$0xff] }
 0x112   : > { %3985 = vmatprep.mubr.f32.mxu0 %v7482_v0 }
 0x114   : > { %6230 = vmatmul.mubr.msk.f32.gmra.mrb[56].mxu1 %vm215_vm1, %v6182_v39  ;;  %v6748_v39 = vld [vmem:[%s7521_s17 + $0x390] sm:$0xff] }
 0x115   : > { %6614 = vmatmul.mubr.msk.f32.gmra.mrb[24].mxu0 %vm215_vm1, %v6566_v40  ;;  %1092 = vmatprep.mubr.f32.mxu1 %v7482_v0  ;;  %v6751_v40 = vld [vmem:[%s7521_s17 + $0x3a8] sm:$0xff] }
 0x116   : > { %3991 = vmatprep.mubr.f32.mxu0 %v7482_v0 }
 0x118   : > { %6231 = vmatmul.mubr.msk.f32.gmra.mrb[58].mxu1 %vm215_vm1, %v6183_v41  ;;  %v6753_v41 = vld [vmem:[%s7521_s17 + $0x3b8] sm:$0xff] }
 0x119   : > { %6615 = vmatmul.mubr.msk.f32.gmra.mrb[26].mxu0 %vm215_vm1, %v6567_v42  ;;  %1098 = vmatprep.mubr.f32.mxu1 %v7482_v0  ;;  %v6250_v42 = vld [vmem:[%s9765_s1 + $0x280] sm:$0xff] }
 0x11a   : > { %3997 = vmatprep.mubr.f32.mxu0 %v7482_v0 }
 0x11c   : > { %6232 = vmatmul.mubr.msk.f32.gmra.mrb[60].mxu1 %vm215_vm1, %v6184_v43  ;;  %v6634_v43 = vld [vmem:[%s9765_s1 + $0x700] sm:$0xff] }
 0x11d   : > { %6616 = vmatmul.mubr.msk.f32.gmra.mrb[28].mxu0 %vm215_vm1, %v6568_v44  ;;  %1104 = vmatprep.mubr.f32.mxu1 %v7482_v0  ;;  %v6894_v44 = vpack.c.bf16 %v6748_v39, %v6746_v38  ;;  %v6320_v38 = vld [vmem:[%s9765_s1 + $0x330] sm:$0xff] }
 0x11e   : > { %4003 = vmatprep.mubr.f32.mxu0 %v7482_v0  ;;  %v6656_v39 = vld [vmem:[%s9765_s1 + $0x7b0] sm:$0xff] }
 0x120   : > { %6233 = vmatmul.mubr.msk.f32.gmra.mrb[62].mxu1 %vm215_vm1, %v6185_v45  ;;  %v6896_v45 = vpack.c.bf16 %v6753_v41, %v6751_v40  ;;  %v6321_v40 = vld [vmem:[%s9765_s1 + $0x338] sm:$0xff] }
 0x121   : > { %6617 = vmatmul.mubr.msk.f32.gmra.mrb[30].mxu0 %vm215_vm1, %v6569_v46  ;;  %1517 = vmatprep.mubr.f32.mxu1 %v7482_v0  ;;  %v6750_v46 = vld [vmem:[%s7521_s17 + $0x3a0] sm:$0xff]  ;;  %v6657_v41 = vld [vmem:[%s9765_s1 + $0x7b8] sm:$0xff] }
 0x122   : > { %4009 = vmatprep.mubr.f32.mxu0 %v7482_v0 }
 0x124   : > { %6282 = vmatmul.mubr.msk.f32.vlgmr.msra.gmra.mrb[0].mxu1 %vm215_vm1, %v6234_v51  ;;  %v6635_v51 = vld [vmem:[%s9765_s1 + $0x708] sm:$0xff] }
 0x125   : > { %6618 = vmatmul.mubr.msk.f32.gmra.mrb[32].mxu0 %vm215_vm1, %v6570_v52  ;;  %1523 = vmatprep.mubr.f32.mxu1 %v7482_v0  ;;  %v6898_v52 = vpack.c.bf16 %v6752_v47, %v6750_v46  ;;  %v6324_v46 = vld [vmem:[%s9765_s1 + $0x350] sm:$0xff] }
 0x126   : > { %4015 = vmatprep.mubr.f32.mxu0 %v7482_v0  ;;  %6835 = vmatpush1.bf16.msra.mxu1 %v6834_v53  ;;  %v6900_v53 = vpack.c.bf16 %v6757_v49, %v6755_v48  ;;  %v6660_v47 = vld [vmem:[%s9765_s1 + $0x7d0] sm:$0xff]  ;;  %v6325_v48 = vld [vmem:[%s9765_s1 + $0x358] sm:$0xff] }
 0x127   : > { %6837 = vmatprep.subr.bf16.mxu1 %v6836_v54  ;;  %v6754_v54 = vld [vmem:[%s7521_s17 + $0x3c0] sm:$0xff]  ;;  %v6661_v49 = vld [vmem:[%s9765_s1 + $0x7d8] sm:$0xff] }
 0x128   : > { %6283 = vmatmul.mubr.msk.f32.gmra.mrb[2].mxu1 %vm215_vm1, %v6235_v59  ;;  %v6902_v58 = vpack.c.bf16 %v6756_v55, %v6754_v54  ;;  %v6759_v59 = vld [vmem:[%s7521_s17 + $0x3e8] sm:$0x3f]  ;;  %v6328_v54 = vld [vmem:[%s9765_s1 + $0x370] sm:$0xff] }
 0x129   : > { %6619 = vmatmul.mubr.msk.f32.gmra.mrb[34].mxu0 %vm215_vm1, %v6571_v60  ;;  %1529 = vmatprep.mubr.f32.mxu1 %v7482_v0  ;;  %v6253_v60 = vld [vmem:[%s9765_s1 + $0x298] sm:$0xff]  ;;  %v6664_v55 = vld [vmem:[%s9765_s1 + $0x7f0] sm:$0xff] }
 0x12a   : > { %4021 = vmatprep.mubr.f32.mxu0 %v7482_v0  ;;  %6839 = vmatpush1.bf16.msra.mxu1 %v6838_v61  ;;  %v6637_v61 = vld [vmem:[%s9765_s1 + $0x718] sm:$0xff] }
 0x12b   : > { %6841 = vmatprep.subr.bf16.mxu1 %v6840_v62  ;;  %v6758_v62 = vld [vmem:[%s7521_s17 + $0x3e0] sm:$0x3f] }
 0x12c   : > { %6284 = vmatmul.mubr.msk.f32.gmra.mrb[4].mxu1 %vm215_vm1, %v6236_v2  ;;  %v6255_v2 = vld [vmem:[%s9765_s1 + $0x2a8] sm:$0xff] }
 0x12d   : > { %6620 = vmatmul.mubr.msk.f32.gmra.mrb[36].mxu0 %vm215_vm1, %v6572_v3  ;;  %1535 = vmatprep.mubr.f32.mxu1 %v7482_v0  ;;  %v6639_v3 = vld [vmem:[%s9765_s1 + $0x728] sm:$0xff] }
 0x12e   : > { %4027 = vmatprep.mubr.f32.mxu0 %v7482_v0  ;;  %6843 = vmatpush1.bf16.msra.mxu1 %v6842_v4  ;;  %v6256_v4 = vld [vmem:[%s9765_s1 + $0x2b0] sm:$0xff] }
 0x12f   : > { %6360 = vmatprep.subr.msk.mxu1 %vm312_vm0, %v6359_v5  ;;  %v6640_v5 = vld [vmem:[%s9765_s1 + $0x730] sm:$0xff] }
 0x130   : > { %6285 = vmatmul.mubr.msk.f32.gmra.mrb[6].mxu1 %vm215_vm1, %v6237_v6  ;;  %v6257_v6 = vld [vmem:[%s9765_s1 + $0x2b8] sm:$0xff] }
 0x131   : > { %6621 = vmatmul.mubr.msk.f32.gmra.mrb[38].mxu0 %vm215_vm1, %v6573_v7  ;;  %1541 = vmatprep.mubr.f32.mxu1 %v7482_v0  ;;  %v6641_v7 = vld [vmem:[%s9765_s1 + $0x738] sm:$0xff] }
 0x132   : > { %4033 = vmatprep.mubr.f32.mxu0 %v7482_v0  ;;  %6361 = vmatpush1.msk.msra.mxu1 %vm312_vm0, %v6358_v9  ;;  %v6258_v9 = vld [vmem:[%s9765_s1 + $0x2c0] sm:$0xff] }
 0x133   : > { %6904 = vmatprep.subr.bf16.mxu1 %v7529_v8  ;;  %v6240_v8 = vld [vmem:[%s9765_s1 + $0x230] sm:$0xff] }
 0x134   : > { %6286 = vmatmul.mubr.msk.f32.gmra.mrb[8].mxu1 %vm215_vm1, %v6238_v10  ;;  %v6642_v10 = vld [vmem:[%s9765_s1 + $0x740] sm:$0xff] }
 0x135   : > { %6622 = vmatmul.mubr.msk.f32.gmra.mrb[40].mxu0 %vm215_vm1, %v6574_v11  ;;  %1547 = vmatprep.mubr.f32.mxu1 %v7482_v0  ;;  %v6259_v11 = vld [vmem:[%s9765_s1 + $0x2c8] sm:$0xff] }
 0x136   : > { %4039 = vmatprep.mubr.f32.mxu0 %v7482_v0 }
 0x138   : > { %6287 = vmatmul.mubr.msk.f32.gmra.mrb[10].mxu1 %vm215_vm1, %v6239_v12  ;;  %v6643_v12 = vld [vmem:[%s9765_s1 + $0x748] sm:$0xff] }
 0x139   : > { %6623 = vmatmul.mubr.msk.f32.gmra.mrb[42].mxu0 %vm215_vm1, %v6575_v14  ;;  %1553 = vmatprep.mubr.f32.mxu1 %v7482_v0  ;;  %v6260_v14 = vld [vmem:[%s9765_s1 + $0x2d0] sm:$0xff] }
 0x13a   : > { %4045 = vmatprep.mubr.f32.mxu0 %v7482_v0 }
 0x13c   : > { %6288 = vmatmul.mubr.msk.f32.gmra.mrb[12].mxu1 %vm215_vm1, %v6240_v8  ;;  %v6644_v8 = vld [vmem:[%s9765_s1 + $0x750] sm:$0xff] }
 0x13d   : > { %6624 = vmatmul.mubr.msk.f32.gmra.mrb[44].mxu0 %vm215_vm1, %v6576_v15  ;;  %1559 = vmatprep.mubr.f32.mxu1 %v7482_v0  ;;  %v6261_v15 = vld [vmem:[%s9765_s1 + $0x2d8] sm:$0xff] }
 0x13e   : > { %4051 = vmatprep.mubr.f32.mxu0 %v7482_v0 }
 0x140   : > { %6289 = vmatmul.mubr.msk.f32.gmra.mrb[14].mxu1 %vm215_vm1, %v6241_v16  ;;  %v6645_v16 = vld [vmem:[%s9765_s1 + $0x758] sm:$0xff] }
 0x141   : > { %6625 = vmatmul.mubr.msk.f32.gmra.mrb[46].mxu0 %vm215_vm1, %v6577_v17  ;;  %1565 = vmatprep.mubr.f32.mxu1 %v7482_v0  ;;  %v6262_v17 = vld [vmem:[%s9765_s1 + $0x2e0] sm:$0xff] }
 0x142   : > { %4057 = vmatprep.mubr.f32.mxu0 %v7482_v0 }
 0x144   : > { %6290 = vmatmul.mubr.msk.f32.gmra.mrb[16].mxu1 %vm215_vm1, %v6242_v19  ;;  %v6646_v19 = vld [vmem:[%s9765_s1 + $0x760] sm:$0xff] }
 0x145   : > { %6626 = vmatmul.mubr.msk.f32.gmra.mrb[48].mxu0 %vm215_vm1, %v6578_v20  ;;  %1571 = vmatprep.mubr.f32.mxu1 %v7482_v0  ;;  %v6263_v20 = vld [vmem:[%s9765_s1 + $0x2e8] sm:$0xff] }
 0x146   : > { %4063 = vmatprep.mubr.f32.mxu0 %v7482_v0 }
 0x148   : > { %6291 = vmatmul.mubr.msk.f32.gmra.mrb[18].mxu1 %vm215_vm1, %v6243_v21  ;;  %v6647_v21 = vld [vmem:[%s9765_s1 + $0x768] sm:$0xff] }
 0x149   : > { %6627 = vmatmul.mubr.msk.f32.gmra.mrb[50].mxu0 %vm215_vm1, %v6579_v22  ;;  %1577 = vmatprep.mubr.f32.mxu1 %v7482_v0  ;;  %v6264_v22 = vld [vmem:[%s9765_s1 + $0x2f0] sm:$0xff] }
 0x14a   : > { %4069 = vmatprep.mubr.f32.mxu0 %v7482_v0 }
 0x14c   : > { %6292 = vmatmul.mubr.msk.f32.gmra.mrb[20].mxu1 %vm215_vm1, %v6244_v23  ;;  %v6648_v23 = vld [vmem:[%s9765_s1 + $0x770] sm:$0xff] }
 0x14d   : > { %6628 = vmatmul.mubr.msk.f32.gmra.mrb[52].mxu0 %vm215_vm1, %v6580_v24  ;;  %1583 = vmatprep.mubr.f32.mxu1 %v7482_v0  ;;  %v6265_v24 = vld [vmem:[%s9765_s1 + $0x2f8] sm:$0xff] }
 0x14e   : > { %4075 = vmatprep.mubr.f32.mxu0 %v7482_v0 }
 0x150   : > { %6293 = vmatmul.mubr.msk.f32.gmra.mrb[22].mxu1 %vm215_vm1, %v6245_v25  ;;  %v6649_v25 = vld [vmem:[%s9765_s1 + $0x778] sm:$0xff] }
 0x151   : > { %6629 = vmatmul.mubr.msk.f32.gmra.mrb[54].mxu0 %vm215_vm1, %v6581_v27  ;;  %1589 = vmatprep.mubr.f32.mxu1 %v7482_v0  ;;  %v6314_v27 = vld [vmem:[%s9765_s1 + $0x300] sm:$0xff] }
 0x152   : > { %4081 = vmatprep.mubr.f32.mxu0 %v7482_v0 }
 0x154   : > { %6294 = vmatmul.mubr.msk.f32.gmra.mrb[24].mxu1 %vm215_vm1, %v6246_v28  ;;  %v6650_v28 = vld [vmem:[%s9765_s1 + $0x780] sm:$0xff] }
 0x155   : > { %6630 = vmatmul.mubr.msk.f32.gmra.mrb[56].mxu0 %vm215_vm1, %v6582_v29  ;;  %1595 = vmatprep.mubr.f32.mxu1 %v7482_v0  ;;  %v6315_v29 = vld [vmem:[%s9765_s1 + $0x308] sm:$0xff] }
 0x156   : > { %4087 = vmatprep.mubr.f32.mxu0 %v7482_v0 }
 0x158   : > { %6295 = vmatmul.mubr.msk.f32.gmra.mrb[26].mxu1 %vm215_vm1, %v6247_v30  ;;  %v6651_v30 = vld [vmem:[%s9765_s1 + $0x788] sm:$0xff] }
 0x159   : > { %6631 = vmatmul.mubr.msk.f32.gmra.mrb[58].mxu0 %vm215_vm1, %v6583_v32  ;;  %1601 = vmatprep.mubr.f32.mxu1 %v7482_v0  ;;  %v6316_v32 = vld [vmem:[%s9765_s1 + $0x310] sm:$0xff] }
 0x15a   : > { %4093 = vmatprep.mubr.f32.mxu0 %v7482_v0 }
 0x15c   : > { %6296 = vmatmul.mubr.msk.f32.gmra.mrb[28].mxu1 %vm215_vm1, %v6248_v33  ;;  %v6652_v33 = vld [vmem:[%s9765_s1 + $0x790] sm:$0xff] }
 0x15d   : > { %6632 = vmatmul.mubr.msk.f32.gmra.mrb[60].mxu0 %vm215_vm1, %v6584_v34  ;;  %1607 = vmatprep.mubr.f32.mxu1 %v7482_v0  ;;  %v6654_v34 = vld [vmem:[%s9765_s1 + $0x7a0] sm:$0xff] }
 0x15e   : > { %4099 = vmatprep.mubr.f32.mxu0 %v7482_v0 }
 0x160   : > { %6297 = vmatmul.mubr.msk.f32.gmra.mrb[30].mxu1 %vm215_vm1, %v6249_v35  ;;  %v6319_v35 = vld [vmem:[%s9765_s1 + $0x328] sm:$0xff] }
 0x161   : > { %6633 = vmatmul.mubr.msk.f32.gmra.mrb[62].mxu0 %vm215_vm1, %v6585_v37  ;;  %1613 = vmatprep.mubr.f32.mxu1 %v7482_v0  ;;  %v6655_v37 = vld [vmem:[%s9765_s1 + $0x7a8] sm:$0xff] }
 0x162   : > { %4512 = vmatprep.mubr.f32.mxu0 %v7482_v0 }
 0x164   : > { %6298 = vmatmul.mubr.msk.f32.gmra.mrb[32].mxu1 %vm215_vm1, %v6250_v42  ;;  %v6322_v42 = vld [vmem:[%s9765_s1 + $0x340] sm:$0xff] }
 0x165   : > { %6682 = vmatmul.mubr.msk.f32.vlgmr.msra.gmra.mrb[0].mxu0 %vm215_vm1, %v6634_v43  ;;  %1619 = vmatprep.mubr.f32.mxu1 %v7482_v0  ;;  %v6658_v43 = vld [vmem:[%s9765_s1 + $0x7c0] sm:$0xff] }
 0x166   : > { %6895 = vmatpush1.bf16.msra.mxu0 %v6894_v44  ;;  %4518 = vmatprep.mubr.f32.mxu0 %v7482_v0  ;;  %v6323_v44 = vld [vmem:[%s9765_s1 + $0x348] sm:$0xff] }
 0x167   : > { %6897 = vmatprep.subr.bf16.mxu0 %v6896_v45  ;;  %v6659_v45 = vld [vmem:[%s9765_s1 + $0x7c8] sm:$0xff] }
 0x168   : > { %6299 = vmatmul.mubr.msk.f32.gmra.mrb[34].mxu1 %vm215_vm1, %v6251_v50  ;;  %v6326_v50 = vld [vmem:[%s9765_s1 + $0x360] sm:$0xff] }
 0x169   : > { %6683 = vmatmul.mubr.msk.f32.gmra.mrb[2].mxu0 %vm215_vm1, %v6635_v51  ;;  %1625 = vmatprep.mubr.f32.mxu1 %v7482_v0  ;;  %v6662_v51 = vld [vmem:[%s9765_s1 + $0x7e0] sm:$0xff] }
 0x16a   : > { %4524 = vmatprep.mubr.f32.mxu0 %v7482_v0  ;;  %6899 = vmatpush1.bf16.msra.mxu0 %v6898_v52  ;;  %v6327_v52 = vld [vmem:[%s9765_s1 + $0x368] sm:$0xff] }
 0x16b   : > { %6901 = vmatprep.subr.bf16.mxu0 %v6900_v53  ;;  %v6663_v53 = vld [vmem:[%s9765_s1 + $0x7e8] sm:$0xff] }
 0x16c   : > { %6300 = vmatmul.mubr.msk.f32.gmra.mrb[36].mxu1 %vm215_vm1, %v6252_v56  ;;  %v6329_v56 = vld [vmem:[%s9765_s1 + $0x378] sm:$0xff] }
 0x16d   : > { %6684 = vmatmul.mubr.msk.f32.gmra.mrb[4].mxu0 %vm215_vm1, %v6636_v57  ;;  %1631 = vmatprep.mubr.f32.mxu1 %v7482_v0  ;;  %v6665_v57 = vld [vmem:[%s9765_s1 + $0x7f8] sm:$0xff] }
 0x16e   : > { %4530 = vmatprep.mubr.f32.mxu0 %v7482_v0  ;;  %6903 = vmatpush1.bf16.msra.mxu0 %v6902_v58  ;;  %v6330_v58 = vld [vmem:[%s9765_s1 + $0x380] sm:$0xff] }
 0x16f   : > { %6760 = vmatprep.subr.msk.mxu0 %vm312_vm0, %v6759_v59  ;;  %v6714_v59 = vld [vmem:[%s9765_s1 + $0x800] sm:$0xff] }
 0x170   : > { %6301 = vmatmul.mubr.msk.f32.gmra.mrb[38].mxu1 %vm215_vm1, %v6253_v60  ;;  %v7483_v60 = vmov 0  }
 0x171   : > { %6685 = vmatmul.mubr.msk.f32.gmra.mrb[6].mxu0 %vm215_vm1, %v6637_v61  ;;  %1637 = vmatprep.mubr.f32.mxu1 %v7482_v0  ;;  %v6331_v61 = vld [vmem:[%s9765_s1 + $0x388] sm:$0xff] }
 0x172   : > { %4536 = vmatprep.mubr.f32.mxu0 %v7482_v0  ;;  %6761 = vmatpush1.msk.msra.mxu0 %vm312_vm0, %v6758_v62  ;;  %v6715_v62 = vld [vmem:[%s9765_s1 + $0x808] sm:$0xff] }
 0x173   : > { %7436 = vset.pattern.permute.xlu0 %v7483_v60  ;;  %7437 = vset.pattern.permute.xlu1 %v7483_v60  ;;  %v6418_v60 = vld [vmem:[%s9765_s1 + $0x4c0] sm:$0xff] }
 0x174   : > { %6302 = vmatmul.mubr.msk.f32.gmra.mrb[40].mxu1 %vm215_vm1, %v6254_v63  ;;  %v6332_v63 = vld [vmem:[%s9765_s1 + $0x390] sm:$0xff] }
 0x175   : > { %6686 = vmatmul.mubr.msk.f32.gmra.mrb[8].mxu0 %vm215_vm1, %v6638_v1  ;;  %1643 = vmatprep.mubr.f32.mxu1 %v7482_v0  ;;  %v6716_v1 = vld [vmem:[%s9765_s1 + $0x810] sm:$0xff] }
 0x176   : > { %4542 = vmatprep.mubr.f32.mxu0 %v7482_v0 }
 0x178   : > { %6303 = vmatmul.mubr.msk.f32.gmra.mrb[42].mxu1 %vm215_vm1, %v6255_v2  ;;  %v6333_v2 = vld [vmem:[%s9765_s1 + $0x398] sm:$0xff] }
 0x179   : > { %6687 = vmatmul.mubr.msk.f32.gmra.mrb[10].mxu0 %vm215_vm1, %v6639_v3  ;;  %1649 = vmatprep.mubr.f32.mxu1 %v7482_v0  ;;  %v6717_v3 = vld [vmem:[%s9765_s1 + $0x818] sm:$0xff] }
 0x17a   : > { %4548 = vmatprep.mubr.f32.mxu0 %v7482_v0 }
 0x17c   : > { %6304 = vmatmul.mubr.msk.f32.gmra.mrb[44].mxu1 %vm215_vm1, %v6256_v4  ;;  %v6334_v4 = vld [vmem:[%s9765_s1 + $0x3a0] sm:$0xff] }
 0x17d   : > { %6688 = vmatmul.mubr.msk.f32.gmra.mrb[12].mxu0 %vm215_vm1, %v6640_v5  ;;  %1655 = vmatprep.mubr.f32.mxu1 %v7482_v0  ;;  %v6718_v5 = vld [vmem:[%s9765_s1 + $0x820] sm:$0xff] }
 0x17e   : > { %4554 = vmatprep.mubr.f32.mxu0 %v7482_v0 }
 0x180   : > { %6305 = vmatmul.mubr.msk.f32.gmra.mrb[46].mxu1 %vm215_vm1, %v6257_v6  ;;  %v6335_v6 = vld [vmem:[%s9765_s1 + $0x3a8] sm:$0xff] }
 0x181   : > { %6689 = vmatmul.mubr.msk.f32.gmra.mrb[14].mxu0 %vm215_vm1, %v6641_v7  ;;  %1661 = vmatprep.mubr.f32.mxu1 %v7482_v0  ;;  %v6719_v7 = vld [vmem:[%s9765_s1 + $0x828] sm:$0xff] }
 0x182   : > { %4560 = vmatprep.mubr.f32.mxu0 %v7482_v0 }
 0x184   : > { %6306 = vmatmul.mubr.msk.f32.gmra.mrb[48].mxu1 %vm215_vm1, %v6258_v9  ;;  %v5864_v9 = vld [vmem:[%s9766_s2] sm:$0xff] }
 0x185   : > { %6690 = vmatmul.mubr.msk.f32.gmra.mrb[16].mxu0 %vm215_vm1, %v6642_v10  ;;  %1667 = vmatprep.mubr.f32.mxu1 %v7482_v0  ;;  %v6336_v10 = vld [vmem:[%s9765_s1 + $0x3b0] sm:$0xff] }
 0x186   : > { %4566 = vmatprep.mubr.f32.mxu0 %v7482_v0  ;;  %5882 = vperm.xlu0 %7436, %v5864_v9   ;;  %v6743_v9 = vld [vmem:[%s9765_s1 + $0x8e8] sm:$0xff] }
 0x188   : > { %6307 = vmatmul.mubr.msk.f32.gmra.mrb[50].mxu1 %vm215_vm1, %v6259_v11  ;;  %v6720_v11 = vld [vmem:[%s9765_s1 + $0x830] sm:$0xff] }
 0x189   : > { %6691 = vmatmul.mubr.msk.f32.gmra.mrb[18].mxu0 %vm215_vm1, %v6643_v12  ;;  %1673 = vmatprep.mubr.f32.mxu1 %v7482_v0  ;;  %v5866_v12 = vld [vmem:[%s9766_s2 + $0x10] sm:$0xff] }
 0x18a   : > { %4572 = vmatprep.mubr.f32.mxu0 %v7482_v0  ;;  %5892 = vperm.xlu0 %7436, %v5866_v12   ;;  %v6425_v12 = vld [vmem:[%s9765_s1 + $0x4f8] sm:$0xff] }
 0x18c   : > { %6308 = vmatmul.mubr.msk.f32.gmra.mrb[52].mxu1 %vm215_vm1, %v6260_v14  ;;  %v6337_v14 = vld [vmem:[%s9765_s1 + $0x3b8] sm:$0xff] }
 0x18d   : > { %6692 = vmatmul.mubr.msk.f32.gmra.mrb[20].mxu0 %vm215_vm1, %v6644_v8  ;;  %1679 = vmatprep.mubr.f32.mxu1 %v7482_v0  ;;  %v6721_v8 = vld [vmem:[%s9765_s1 + $0x838] sm:$0xff] }
 0x18e   : > { %4578 = vmatprep.mubr.f32.mxu0 %v7482_v0 }
 0x190   : > { %6309 = vmatmul.mubr.msk.f32.gmra.mrb[54].mxu1 %vm215_vm1, %v6261_v15  ;;  %v5868_v15 = vld [vmem:[%s9766_s2 + $0x20] sm:$0xff] }
 0x191   : > { %6693 = vmatmul.mubr.msk.f32.gmra.mrb[22].mxu0 %vm215_vm1, %v6645_v16  ;;  %1685 = vmatprep.mubr.f32.mxu1 %v7482_v0  ;;  %v6338_v16 = vld [vmem:[%s9765_s1 + $0x3c0] sm:$0xff] }
 0x192   : > { %4584 = vmatprep.mubr.f32.mxu0 %v7482_v0  ;;  %5902 = vperm.xlu0 %7436, %v5868_v15  }
 0x194   : > { %6310 = vmatmul.mubr.msk.f32.gmra.mrb[56].mxu1 %vm215_vm1, %v6262_v17  ;;  %v6722_v17 = vld [vmem:[%s9765_s1 + $0x840] sm:$0xff] }
 0x195   : > { %6694 = vmatmul.mubr.msk.f32.gmra.mrb[24].mxu0 %vm215_vm1, %v6646_v19  ;;  %1691 = vmatprep.mubr.f32.mxu1 %v7482_v0  ;;  %v5869_v19 = vld [vmem:[%s9766_s2 + $0x28] sm:$0xff] }
 0x196   : > { %4590 = vmatprep.mubr.f32.mxu0 %v7482_v0  ;;  %5907 = vperm.xlu0 %7436, %v5869_v19  }
 0x198   : > { %6311 = vmatmul.mubr.msk.f32.gmra.mrb[58].mxu1 %vm215_vm1, %v6263_v20  ;;  %v6339_v20 = vld [vmem:[%s9765_s1 + $0x3c8] sm:$0xff] }
 0x199   : > { %6695 = vmatmul.mubr.msk.f32.gmra.mrb[26].mxu0 %vm215_vm1, %v6647_v21  ;;  %1697 = vmatprep.mubr.f32.mxu1 %v7482_v0  ;;  %v6723_v21 = vld [vmem:[%s9765_s1 + $0x848] sm:$0xff] }
 0x19a   : > { %4596 = vmatprep.mubr.f32.mxu0 %v7482_v0 }
 0x19c   : > { %6312 = vmatmul.mubr.msk.f32.gmra.mrb[60].mxu1 %vm215_vm1, %v6264_v22  ;;  %v5870_v22 = vld [vmem:[%s9766_s2 + $0x30] sm:$0xff] }
 0x19d   : > { %6696 = vmatmul.mubr.msk.f32.gmra.mrb[28].mxu0 %vm215_vm1, %v6648_v23  ;;  %1703 = vmatprep.mubr.f32.mxu1 %v7482_v0  ;;  %v6340_v23 = vld [vmem:[%s9765_s1 + $0x3d0] sm:$0xff] }
 0x19e   : > { %4602 = vmatprep.mubr.f32.mxu0 %v7482_v0  ;;  %5912 = vperm.xlu0 %7436, %v5870_v22  }
 0x1a0   : > { %6313 = vmatmul.mubr.msk.f32.gmra.mrb[62].mxu1 %vm215_vm1, %v6265_v24  ;;  %v6724_v24 = vld [vmem:[%s9765_s1 + $0x850] sm:$0xff] }
 0x1a1   : > { %6697 = vmatmul.mubr.msk.f32.gmra.mrb[30].mxu0 %vm215_vm1, %v6649_v25  ;;  %2116 = vmatprep.mubr.f32.mxu1 %v7482_v0  ;;  %v5871_v25 = vld [vmem:[%s9766_s2 + $0x38] sm:$0xff] }
 0x1a2   : > { %4608 = vmatprep.mubr.f32.mxu0 %v7482_v0  ;;  %5917 = vperm.xlu0 %7436, %v5871_v25  }
 0x1a4   : > { %6362 = vmatmul.mubr.msk.f32.vlgmr.msra.gmra.mrb[0].mxu1 %vm215_vm1, %v6314_v27  ;;  %v5865_v27 = vld [vmem:[%s9766_s2 + $0x8] sm:$0xff] }
 0x1a5   : > { %6698 = vmatmul.mubr.msk.f32.gmra.mrb[32].mxu0 %vm215_vm1, %v6650_v28  ;;  %2122 = vmatprep.mubr.f32.mxu1 %v7482_v0  ;;  %v6341_v28 = vld [vmem:[%s9765_s1 + $0x3d8] sm:$0xff] }
 0x1a6   : > { %4614 = vmatprep.mubr.f32.mxu0 %v7482_v0  ;;  %6908 = vmatpush1.bf16.msra.mxu1 %v7534_v13  ;;  %v6317_v13 = vld [vmem:[%s9765_s1 + $0x318] sm:$0xff] }
 0x1a7   : > { %6905 = vmatprep.subr.bf16.mxu1 %v7540_v18  ;;  %v6653_v18 = vld [vmem:[%s9765_s1 + $0x798] sm:$0xff]  ;;  %5887 = vperm.xlu1 %7437, %v5865_v27  }
 0x1a8   : > { %6363 = vmatmul.mubr.msk.f32.gmra.mrb[2].mxu1 %vm215_vm1, %v6315_v29  ;;  %v6725_v29 = vld [vmem:[%s9765_s1 + $0x858] sm:$0xff] }
 0x1a9   : > { %6699 = vmatmul.mubr.msk.f32.gmra.mrb[34].mxu0 %vm215_vm1, %v6651_v30  ;;  %2128 = vmatprep.mubr.f32.mxu1 %v7482_v0  ;;  %v5872_v30 = vld [vmem:[%s9766_s2 + $0x40] sm:$0xff] }
 0x1aa   : > { %4620 = vmatprep.mubr.f32.mxu0 %v7482_v0  ;;  %6909 = vmatpush1.bf16.msra.mxu1 %v7550_v26  ;;  %v7472_v26 = vld [vmem:[%s7521_s17 + $0x228] sm:$0x3f] }
 0x1ab   : > { %6906 = vmatprep.subr.bf16.mxu1 %v7555_v31  ;;  %v6318_v31 = vld [vmem:[%s9765_s1 + $0x320] sm:$0xff]  ;;  %5922 = vperm.xlu0 %7436, %v5872_v30  }
 0x1ac   : > { %6364 = vmatmul.mubr.msk.f32.gmra.mrb[4].mxu1 %vm215_vm1, %v6316_v32  ;;  %v5867_v32 = vld [vmem:[%s9766_s2 + $0x18] sm:$0xff] }
 0x1ad   : > { %6700 = vmatmul.mubr.msk.f32.gmra.mrb[36].mxu0 %vm215_vm1, %v6652_v33  ;;  %2134 = vmatprep.mubr.f32.mxu1 %v7482_v0  ;;  %v6342_v33 = vld [vmem:[%s9765_s1 + $0x3e0] sm:$0xff] }
 0x1ae   : > { %4626 = vmatprep.mubr.f32.mxu0 %v7482_v0  ;;  %6910 = vmatpush1.bf16.msra.mxu1 %v7561_v36  ;;  %v7473_v36 = vld [vmem:[%s7521_s17 + $0x220] sm:$0x3f]  ;;  %s7484_s17 = smov 64  }
 0x1af   : > { %6907 = vmatprep.subr.msk.mxu1 %vm312_vm0, %v7472_v26  ;;  %5897 = vperm.xlu1 %7437, %v5867_v32   ;;  %v5876_v26 = vld [vmem:[%s9766_s2 + $0x60] sm:$0xff] }
 0x1b0   : > { %6365 = vmatmul.mubr.msk.f32.gmra.mrb[6].mxu1 %vm215_vm1, %v6317_v13  ;;  %v6726_v13 = vld [vmem:[%s9765_s1 + $0x860] sm:$0xff] }
 0x1b1   : > { %6701 = vmatmul.mubr.msk.f32.gmra.mrb[38].mxu0 %vm215_vm1, %v6653_v18  ;;  %2140 = vmatprep.mubr.f32.mxu1 %v7482_v0  ;;  %v5873_v18 = vld [vmem:[%s9766_s2 + $0x48] sm:$0xff] }
 0x1b2   : > { %4632 = vmatprep.mubr.f32.mxu0 %v7482_v0  ;;  %6911 = vmatpush1.msk.msra.mxu1 %vm312_vm0, %v7473_v36  ;;  %v5874_v36 = vld [vmem:[%s9766_s2 + $0x50] sm:$0xff] }
 0x1b3   : > { %5927 = vperm.xlu0 %7436, %v5873_v18   ;;  %5942 = vperm.xlu1 %7437, %v5876_v26  }
 0x1b4   : > { %6366 = vmatmul.mubr.msk.f32.gmra.mrb[8].mxu1 %vm215_vm1, %v6318_v31  ;;  %v6343_v31 = vld [vmem:[%s9765_s1 + $0x3e8] sm:$0xff] }
 0x1b5   : > { %6702 = vmatmul.mubr.msk.f32.gmra.mrb[40].mxu0 %vm215_vm1, %v6654_v34  ;;  %2146 = vmatprep.mubr.f32.mxu1 %v7482_v0  ;;  %v6727_v34 = vld [vmem:[%s9765_s1 + $0x868] sm:$0xff] }
 0x1b6   : > { %4638 = vmatprep.mubr.f32.mxu0 %v7482_v0 }
 0x1b7   : > { %5932 = vperm.xlu0 %7436, %v5874_v36  }
 0x1b8   : > { %6367 = vmatmul.mubr.msk.f32.gmra.mrb[10].mxu1 %vm215_vm1, %v6319_v35  ;;  %v5877_v35 = vld [vmem:[%s9766_s2 + $0x68] sm:$0xff] }
 0x1b9   : > { %6703 = vmatmul.mubr.msk.f32.gmra.mrb[42].mxu0 %vm215_vm1, %v6655_v37  ;;  %2152 = vmatprep.mubr.f32.mxu1 %v7482_v0  ;;  %v6344_v37 = vld [vmem:[%s9765_s1 + $0x3f0] sm:$0xff] }
 0x1ba   : > { %4644 = vmatprep.mubr.f32.mxu0 %v7482_v0  ;;  %5947 = vperm.xlu1 %7437, %v5877_v35  }
 0x1bc   : > { %6368 = vmatmul.mubr.msk.f32.gmra.mrb[12].mxu1 %vm215_vm1, %v6320_v38  ;;  %v6728_v38 = vld [vmem:[%s9765_s1 + $0x870] sm:$0xff] }
 0x1bd   : > { %6704 = vmatmul.mubr.msk.f32.gmra.mrb[44].mxu0 %vm215_vm1, %v6656_v39  ;;  %2158 = vmatprep.mubr.f32.mxu1 %v7482_v0  ;;  %v5875_v39 = vld [vmem:[%s9766_s2 + $0x58] sm:$0xff] }
 0x1be   : > { %4650 = vmatprep.mubr.f32.mxu0 %v7482_v0  ;;  %5937 = vperm.xlu0 %7436, %v5875_v39  }
 0x1c0   : > { %6369 = vmatmul.mubr.msk.f32.gmra.mrb[14].mxu1 %vm215_vm1, %v6321_v40  ;;  %v5878_v40 = vld [vmem:[%s9766_s2 + $0x70] sm:$0xff] }
 0x1c1   : > { %6705 = vmatmul.mubr.msk.f32.gmra.mrb[46].mxu0 %vm215_vm1, %v6657_v41  ;;  %2164 = vmatprep.mubr.f32.mxu1 %v7482_v0  ;;  %v6345_v41 = vld [vmem:[%s9765_s1 + $0x3f8] sm:$0xff] }
 0x1c2   : > { %4656 = vmatprep.mubr.f32.mxu0 %v7482_v0  ;;  %5952 = vperm.xlu1 %7437, %v5878_v40  }
 0x1c4   : > { %6370 = vmatmul.mubr.msk.f32.gmra.mrb[16].mxu1 %vm215_vm1, %v6322_v42  ;;  %v6729_v42 = vld [vmem:[%s9765_s1 + $0x878] sm:$0xff] }
 0x1c5   : > { %6706 = vmatmul.mubr.msk.f32.gmra.mrb[48].mxu0 %vm215_vm1, %v6658_v43  ;;  %2170 = vmatprep.mubr.f32.mxu1 %v7482_v0  ;;  %v5879_v43 = vld [vmem:[%s9766_s2 + $0x78] sm:$0xff] }
 0x1c6   : > { %4662 = vmatprep.mubr.f32.mxu0 %v7482_v0  ;;  %5957 = vperm.xlu0 %7436, %v5879_v43  }
 0x1c8   : > { %6371 = vmatmul.mubr.msk.f32.gmra.mrb[18].mxu1 %vm215_vm1, %v6323_v44  ;;  %v6410_v44 = vld [vmem:[%s9765_s1 + $0x480] sm:$0xff] }
 0x1c9   : > { %6707 = vmatmul.mubr.msk.f32.gmra.mrb[50].mxu0 %vm215_vm1, %v6659_v45  ;;  %2176 = vmatprep.mubr.f32.mxu1 %v7482_v0  ;;  %v6730_v45 = vld [vmem:[%s9765_s1 + $0x880] sm:$0xff] }
 0x1ca   : > { %4668 = vmatprep.mubr.f32.mxu0 %v7482_v0 }
 0x1cc   : > { %6372 = vmatmul.mubr.msk.f32.gmra.mrb[20].mxu1 %vm215_vm1, %v6324_v46  ;;  %v6411_v46 = vld [vmem:[%s9765_s1 + $0x488] sm:$0xff] }
 0x1cd   : > { %6708 = vmatmul.mubr.msk.f32.gmra.mrb[52].mxu0 %vm215_vm1, %v6660_v47  ;;  %2182 = vmatprep.mubr.f32.mxu1 %v7482_v0  ;;  %v6731_v47 = vld [vmem:[%s9765_s1 + $0x888] sm:$0xff] }
 0x1ce   : > { %4674 = vmatprep.mubr.f32.mxu0 %v7482_v0 }
 0x1d0   : > { %6373 = vmatmul.mubr.msk.f32.gmra.mrb[22].mxu1 %vm215_vm1, %v6325_v48  ;;  %v6412_v48 = vld [vmem:[%s9765_s1 + $0x490] sm:$0xff] }
 0x1d1   : > { %6709 = vmatmul.mubr.msk.f32.gmra.mrb[54].mxu0 %vm215_vm1, %v6661_v49  ;;  %2188 = vmatprep.mubr.f32.mxu1 %v7482_v0  ;;  %v6732_v49 = vld [vmem:[%s9765_s1 + $0x890] sm:$0xff] }
 0x1d2   : > { %4680 = vmatprep.mubr.f32.mxu0 %v7482_v0 }
 0x1d4   : > { %6374 = vmatmul.mubr.msk.f32.gmra.mrb[24].mxu1 %vm215_vm1, %v6326_v50  ;;  %v6413_v50 = vld [vmem:[%s9765_s1 + $0x498] sm:$0xff] }
 0x1d5   : > { %6710 = vmatmul.mubr.msk.f32.gmra.mrb[56].mxu0 %vm215_vm1, %v6662_v51  ;;  %2194 = vmatprep.mubr.f32.mxu1 %v7482_v0  ;;  %v6733_v51 = vld [vmem:[%s9765_s1 + $0x898] sm:$0xff] }
 0x1d6   : > { %4686 = vmatprep.mubr.f32.mxu0 %v7482_v0 }
 0x1d8   : > { %6375 = vmatmul.mubr.msk.f32.gmra.mrb[26].mxu1 %vm215_vm1, %v6327_v52  ;;  %v6414_v52 = vld [vmem:[%s9765_s1 + $0x4a0] sm:$0xff] }
 0x1d9   : > { %6711 = vmatmul.mubr.msk.f32.gmra.mrb[58].mxu0 %vm215_vm1, %v6663_v53  ;;  %2200 = vmatprep.mubr.f32.mxu1 %v7482_v0  ;;  %v6734_v53 = vld [vmem:[%s9765_s1 + $0x8a0] sm:$0xff] }
 0x1da   : > { %4692 = vmatprep.mubr.f32.mxu0 %v7482_v0 }
 0x1dc   : > { %6376 = vmatmul.mubr.msk.f32.gmra.mrb[28].mxu1 %vm215_vm1, %v6328_v54  ;;  %v6415_v54 = vld [vmem:[%s9765_s1 + $0x4a8] sm:$0xff] }
 0x1dd   : > { %6712 = vmatmul.mubr.msk.f32.gmra.mrb[60].mxu0 %vm215_vm1, %v6664_v55  ;;  %2206 = vmatprep.mubr.f32.mxu1 %v7482_v0  ;;  %v6735_v55 = vld [vmem:[%s9765_s1 + $0x8a8] sm:$0xff] }
 0x1de   : > { %4698 = vmatprep.mubr.f32.mxu0 %v7482_v0 }
 0x1e0   : > { %6377 = vmatmul.mubr.msk.f32.gmra.mrb[30].mxu1 %vm215_vm1, %v6329_v56  ;;  %v6416_v56 = vld [vmem:[%s9765_s1 + $0x4b0] sm:$0xff] }
 0x1e1   : > { %6713 = vmatmul.mubr.msk.f32.gmra.mrb[62].mxu0 %vm215_vm1, %v6665_v57  ;;  %2212 = vmatprep.mubr.f32.mxu1 %v7482_v0  ;;  %v6736_v57 = vld [vmem:[%s9765_s1 + $0x8b0] sm:$0xff] }
 0x1e2   : > { %5111 = vmatprep.mubr.f32.mxu0 %v7482_v0 }
 0x1e4   : > { %6378 = vmatmul.mubr.msk.f32.gmra.mrb[32].mxu1 %vm215_vm1, %v6330_v58  ;;  %v6417_v58 = vld [vmem:[%s9765_s1 + $0x4b8] sm:$0xff] }
 0x1e5   : > { %6762 = vmatmul.mubr.msk.f32.vlgmr.msra.gmra.mrb[0].mxu0 %vm215_vm1, %v6714_v59  ;;  %2218 = vmatprep.mubr.f32.mxu1 %v7482_v0  ;;  %v6737_v59 = vld [vmem:[%s9765_s1 + $0x8b8] sm:$0xff] }
 0x1e6   : > { %5117 = vmatprep.mubr.f32.mxu0 %v7482_v0 }
 0x1e8   : > { %6379 = vmatmul.mubr.msk.f32.gmra.mrb[34].mxu1 %vm215_vm1, %v6331_v61  ;;  %v6738_v61 = vld [vmem:[%s9765_s1 + $0x8c0] sm:$0xff] }
 0x1e9   : > { %6763 = vmatmul.mubr.msk.f32.gmra.mrb[2].mxu0 %vm215_vm1, %v6715_v62  ;;  %2224 = vmatprep.mubr.f32.mxu1 %v7482_v0  ;;  %v6419_v62 = vld [vmem:[%s9765_s1 + $0x4c8] sm:$0xff] }
 0x1ea   : > { %5123 = vmatprep.mubr.f32.mxu0 %v7482_v0 }
 0x1ec   : > { %6380 = vmatmul.mubr.msk.f32.gmra.mrb[36].mxu1 %vm215_vm1, %v6332_v63  ;;  %v6739_v63 = vld [vmem:[%s9765_s1 + $0x8c8] sm:$0xff] }
 0x1ed   : > { %6764 = vmatmul.mubr.msk.f32.gmra.mrb[4].mxu0 %vm215_vm1, %v6716_v1  ;;  %2230 = vmatprep.mubr.f32.mxu1 %v7482_v0  ;;  %v6420_v1 = vld [vmem:[%s9765_s1 + $0x4d0] sm:$0xff] }
 0x1ee   : > { %5129 = vmatprep.mubr.f32.mxu0 %v7482_v0 }
 0x1f0   : > { %6381 = vmatmul.mubr.msk.f32.gmra.mrb[38].mxu1 %vm215_vm1, %v6333_v2  ;;  %v6740_v2 = vld [vmem:[%s9765_s1 + $0x8d0] sm:$0xff] }
 0x1f1   : > { %6765 = vmatmul.mubr.msk.f32.gmra.mrb[6].mxu0 %vm215_vm1, %v6717_v3  ;;  %2236 = vmatprep.mubr.f32.mxu1 %v7482_v0  ;;  %v6421_v3 = vld [vmem:[%s9765_s1 + $0x4d8] sm:$0xff] }
 0x1f2   : > { %5135 = vmatprep.mubr.f32.mxu0 %v7482_v0 }
 0x1f4   : > { %6382 = vmatmul.mubr.msk.f32.gmra.mrb[40].mxu1 %vm215_vm1, %v6334_v4  ;;  %v6741_v4 = vld [vmem:[%s9765_s1 + $0x8d8] sm:$0xff] }
 0x1f5   : > { %6766 = vmatmul.mubr.msk.f32.gmra.mrb[8].mxu0 %vm215_vm1, %v6718_v5  ;;  %2242 = vmatprep.mubr.f32.mxu1 %v7482_v0  ;;  %v6422_v5 = vld [vmem:[%s9765_s1 + $0x4e0] sm:$0xff] }
 0x1f6   : > { %5141 = vmatprep.mubr.f32.mxu0 %v7482_v0 }
 0x1f8   : > { %6383 = vmatmul.mubr.msk.f32.gmra.mrb[42].mxu1 %vm215_vm1, %v6335_v6  ;;  %v6742_v6 = vld [vmem:[%s9765_s1 + $0x8e0] sm:$0xff] }
 0x1f9   : > { %6767 = vmatmul.mubr.msk.f32.gmra.mrb[10].mxu0 %vm215_vm1, %v6719_v7  ;;  %2248 = vmatprep.mubr.f32.mxu1 %v7482_v0  ;;  %v6423_v7 = vld [vmem:[%s9765_s1 + $0x4e8] sm:$0xff] }
 0x1fa   : > { %5147 = vmatprep.mubr.f32.mxu0 %v7482_v0 }
 0x1fc   : > { %6384 = vmatmul.mubr.msk.f32.gmra.mrb[44].mxu1 %vm215_vm1, %v6336_v10  ;;  %v6424_v10 = vld [vmem:[%s9765_s1 + $0x4f0] sm:$0xff] }
 0x1fd   : > { %6768 = vmatmul.mubr.msk.f32.gmra.mrb[12].mxu0 %vm215_vm1, %v6720_v11  ;;  %2254 = vmatprep.mubr.f32.mxu1 %v7482_v0  ;;  %v6744_v11 = vld [vmem:[%s9765_s1 + $0x8f0] sm:$0xff] }
 0x1fe   : > { %5153 = vmatprep.mubr.f32.mxu0 %v7482_v0 }
 0x200   : > { %6385 = vmatmul.mubr.msk.f32.gmra.mrb[46].mxu1 %vm215_vm1, %v6337_v14  ;;  %v6745_v14 = vld [vmem:[%s9765_s1 + $0x8f8] sm:$0xff] }
 0x201   : > { %6769 = vmatmul.mubr.msk.f32.gmra.mrb[14].mxu0 %vm215_vm1, %v6721_v8  ;;  %2260 = vmatprep.mubr.f32.mxu1 %v7482_v0 }
 0x202   : > { %5159 = vmatprep.mubr.f32.mxu0 %v7482_v0 }
 0x204   : > { %6386 = vmatmul.mubr.msk.f32.gmra.mrb[48].mxu1 %vm215_vm1, %v6338_v16 }
 0x205   : > { %6770 = vmatmul.mubr.msk.f32.gmra.mrb[16].mxu0 %vm215_vm1, %v6722_v17  ;;  %2266 = vmatprep.mubr.f32.mxu1 %v7482_v0 }
 0x206   : > { %5165 = vmatprep.mubr.f32.mxu0 %v7482_v0 }
 0x208   : > { %6387 = vmatmul.mubr.msk.f32.gmra.mrb[50].mxu1 %vm215_vm1, %v6339_v20 }
 0x209   : > { %6771 = vmatmul.mubr.msk.f32.gmra.mrb[18].mxu0 %vm215_vm1, %v6723_v21  ;;  %2272 = vmatprep.mubr.f32.mxu1 %v7482_v0 }
 0x20a   : > { %5171 = vmatprep.mubr.f32.mxu0 %v7482_v0 }
 0x20c   : > { %6388 = vmatmul.mubr.msk.f32.gmra.mrb[52].mxu1 %vm215_vm1, %v6340_v23 }
 0x20d   : > { %6772 = vmatmul.mubr.msk.f32.gmra.mrb[20].mxu0 %vm215_vm1, %v6724_v24  ;;  %2278 = vmatprep.mubr.f32.mxu1 %v7482_v0 }
 0x20e   : > { %5177 = vmatprep.mubr.f32.mxu0 %v7482_v0 }
 0x210   : > { %6389 = vmatmul.mubr.msk.f32.gmra.mrb[54].mxu1 %vm215_vm1, %v6341_v28 }
 0x211   : > { %6773 = vmatmul.mubr.msk.f32.gmra.mrb[22].mxu0 %vm215_vm1, %v6725_v29  ;;  %2284 = vmatprep.mubr.f32.mxu1 %v7482_v0 }
 0x212   : > { %5183 = vmatprep.mubr.f32.mxu0 %v7482_v0 }
 0x214   : > { %6390 = vmatmul.mubr.msk.f32.gmra.mrb[56].mxu1 %vm215_vm1, %v6342_v33 }
 0x215   : > { %6774 = vmatmul.mubr.msk.f32.gmra.mrb[24].mxu0 %vm215_vm1, %v6726_v13  ;;  %2290 = vmatprep.mubr.f32.mxu1 %v7482_v0 }
 0x216   : > { %5189 = vmatprep.mubr.f32.mxu0 %v7482_v0 }
 0x218   : > { %6391 = vmatmul.mubr.msk.f32.gmra.mrb[58].mxu1 %vm215_vm1, %v6343_v31 }
 0x219   : > { %6775 = vmatmul.mubr.msk.f32.gmra.mrb[26].mxu0 %vm215_vm1, %v6727_v34  ;;  %2296 = vmatprep.mubr.f32.mxu1 %v7482_v0 }
 0x21a   : > { %5195 = vmatprep.mubr.f32.mxu0 %v7482_v0 }
 0x21c   : > { %6392 = vmatmul.mubr.msk.f32.gmra.mrb[60].mxu1 %vm215_vm1, %v6344_v37 }
 0x21d   : > { %6776 = vmatmul.mubr.msk.f32.gmra.mrb[28].mxu0 %vm215_vm1, %v6728_v38  ;;  %2302 = vmatprep.mubr.f32.mxu1 %v7482_v0 }
 0x21e   : > { %5201 = vmatprep.mubr.f32.mxu0 %v7482_v0 }
 0x220   : > { %6393 = vmatmul.mubr.msk.f32.gmra.mrb[62].mxu1 %vm215_vm1, %v6345_v41 }
 0x221   : > { %6777 = vmatmul.mubr.msk.f32.gmra.mrb[30].mxu0 %vm215_vm1, %v6729_v42  ;;  %2811 = vmatprep.mubr.f32.mxu1 %v7482_v0 }
 0x222   : > { %5207 = vmatprep.mubr.f32.mxu0 %v7482_v0 }
 0x224   : > { %6458 = vmatmul.mubr.msk.f32.vlgmr.msra.gmra.mrb[32].mxu1 %vm215_vm1, %v6410_v44 }
 0x225   : > { %6778 = vmatmul.mubr.msk.f32.gmra.mrb[32].mxu0 %vm215_vm1, %v6730_v45  ;;  %2817 = vmatprep.mubr.f32.mxu1 %v7482_v0 }
 0x226   : > { %5213 = vmatprep.mubr.f32.mxu0 %v7482_v0 }
 0x228   : > { %6459 = vmatmul.mubr.msk.f32.gmra.mrb[34].mxu1 %vm215_vm1, %v6411_v46 }
 0x229   : > { %6779 = vmatmul.mubr.msk.f32.gmra.mrb[34].mxu0 %vm215_vm1, %v6731_v47  ;;  %2823 = vmatprep.mubr.f32.mxu1 %v7482_v0 }
 0x22a   : > { %5219 = vmatprep.mubr.f32.mxu0 %v7482_v0 }
 0x22c   : > { %6460 = vmatmul.mubr.msk.f32.gmra.mrb[36].mxu1 %vm215_vm1, %v6412_v48 }
 0x22d   : > { %6780 = vmatmul.mubr.msk.f32.gmra.mrb[36].mxu0 %vm215_vm1, %v6732_v49  ;;  %2829 = vmatprep.mubr.f32.mxu1 %v7482_v0 }
 0x22e   : > { %5225 = vmatprep.mubr.f32.mxu0 %v7482_v0 }
 0x230   : > { %6461 = vmatmul.mubr.msk.f32.gmra.mrb[38].mxu1 %vm215_vm1, %v6413_v50 }
 0x231   : > { %6781 = vmatmul.mubr.msk.f32.gmra.mrb[38].mxu0 %vm215_vm1, %v6733_v51  ;;  %2835 = vmatprep.mubr.f32.mxu1 %v7482_v0 }
 0x232   : > { %5231 = vmatprep.mubr.f32.mxu0 %v7482_v0 }
 0x234   : > { %6462 = vmatmul.mubr.msk.f32.gmra.mrb[40].mxu1 %vm215_vm1, %v6414_v52 }
 0x235   : > { %6782 = vmatmul.mubr.msk.f32.gmra.mrb[40].mxu0 %vm215_vm1, %v6734_v53  ;;  %2841 = vmatprep.mubr.f32.mxu1 %v7482_v0 }
 0x236   : > { %5237 = vmatprep.mubr.f32.mxu0 %v7482_v0 }
 0x238   : > { %6463 = vmatmul.mubr.msk.f32.gmra.mrb[42].mxu1 %vm215_vm1, %v6415_v54 }
 0x239   : > { %6783 = vmatmul.mubr.msk.f32.gmra.mrb[42].mxu0 %vm215_vm1, %v6735_v55  ;;  %2847 = vmatprep.mubr.f32.mxu1 %v7482_v0 }
 0x23a   : > { %5243 = vmatprep.mubr.f32.mxu0 %v7482_v0 }
 0x23c   : > { %6464 = vmatmul.mubr.msk.f32.gmra.mrb[44].mxu1 %vm215_vm1, %v6416_v56 }
 0x23d   : > { %6784 = vmatmul.mubr.msk.f32.gmra.mrb[44].mxu0 %vm215_vm1, %v6736_v57  ;;  %2853 = vmatprep.mubr.f32.mxu1 %v7482_v0 }
 0x23e   : > { %5249 = vmatprep.mubr.f32.mxu0 %v7482_v0 }
 0x240   : > { %6465 = vmatmul.mubr.msk.f32.gmra.mrb[46].mxu1 %vm215_vm1, %v6417_v58 }
 0x241   : > { %6785 = vmatmul.mubr.msk.f32.gmra.mrb[46].mxu0 %vm215_vm1, %v6737_v59  ;;  %2859 = vmatprep.mubr.f32.mxu1 %v7482_v0 }
 0x242   : > { %5255 = vmatprep.mubr.f32.mxu0 %v7482_v0 }
 0x244   : > { %6466 = vmatmul.mubr.msk.f32.gmra.mrb[48].mxu1 %vm215_vm1, %v6418_v60 }
 0x245   : > { %6786 = vmatmul.mubr.msk.f32.gmra.mrb[48].mxu0 %vm215_vm1, %v6738_v61  ;;  %2865 = vmatprep.mubr.f32.mxu1 %v7482_v0 }
 0x246   : > { %5261 = vmatprep.mubr.f32.mxu0 %v7482_v0 }
 0x248   : > { %6467 = vmatmul.mubr.msk.f32.gmra.mrb[50].mxu1 %vm215_vm1, %v6419_v62 }
 0x249   : > { %6787 = vmatmul.mubr.msk.f32.gmra.mrb[50].mxu0 %vm215_vm1, %v6739_v63  ;;  %2871 = vmatprep.mubr.f32.mxu1 %v7482_v0 }
 0x24a   : > { %5267 = vmatprep.mubr.f32.mxu0 %v7482_v0 }
 0x24c   : > { %6468 = vmatmul.mubr.msk.f32.gmra.mrb[52].mxu1 %vm215_vm1, %v6420_v1 }
 0x24d   : > { %6788 = vmatmul.mubr.msk.f32.gmra.mrb[52].mxu0 %vm215_vm1, %v6740_v2  ;;  %2877 = vmatprep.mubr.f32.mxu1 %v7482_v0 }
 0x24e   : > { %5273 = vmatprep.mubr.f32.mxu0 %v7482_v0 }
 0x250   : > { %6469 = vmatmul.mubr.msk.f32.gmra.mrb[54].mxu1 %vm215_vm1, %v6421_v3 }
 0x251   : > { %6789 = vmatmul.mubr.msk.f32.gmra.mrb[54].mxu0 %vm215_vm1, %v6741_v4  ;;  %2883 = vmatprep.mubr.f32.mxu1 %v7482_v0 }
 0x252   : > { %5279 = vmatprep.mubr.f32.mxu0 %v7482_v0 }
 0x254   : > { %6470 = vmatmul.mubr.msk.f32.gmra.mrb[56].mxu1 %vm215_vm1, %v6422_v5 }
 0x255   : > { %6790 = vmatmul.mubr.msk.f32.gmra.mrb[56].mxu0 %vm215_vm1, %v6742_v6  ;;  %2889 = vmatprep.mubr.f32.mxu1 %v7482_v0 }
 0x256   : > { %5285 = vmatprep.mubr.f32.mxu0 %v7482_v0 }
 0x258   : > { %6471 = vmatmul.mubr.msk.f32.gmra.mrb[58].mxu1 %vm215_vm1, %v6423_v7 }
 0x259   : > { %6791 = vmatmul.mubr.msk.f32.gmra.mrb[58].mxu0 %vm215_vm1, %v6743_v9  ;;  %2895 = vmatprep.mubr.f32.mxu1 %v7482_v0 }
 0x25a   : > { %5291 = vmatprep.mubr.f32.mxu0 %v7482_v0 }
 0x25c   : > { %6472 = vmatmul.mubr.msk.f32.gmra.mrb[60].mxu1 %vm215_vm1, %v6424_v10 }
 0x25d   : > { %6792 = vmatmul.mubr.msk.f32.gmra.mrb[60].mxu0 %vm215_vm1, %v6744_v11  ;;  %2901 = vmatprep.mubr.f32.mxu1 %v7482_v0 }
 0x25e   : > { %5297 = vmatprep.mubr.f32.mxu0 %v7482_v0 }
 0x260   : > { %6473 = vmatmul.mubr.msk.f32.gmra.mrb[62].mxu1 %vm215_vm1, %v6425_v12 }
 0x261   : > { %6793 = vmatmul.mubr.msk.f32.gmra.mrb[62].mxu0 %vm215_vm1, %v6745_v14 }
 0x277   : > { %v2118_v8 = vpop.f32.mrb[0].mxu1 }
 0x278   : > { %v2120_v15 = vpop.f32.mrb[1].mxu1 }
 0x27b   : > { %v2124_v16 = vpop.f32.mrb[2].mxu1 }
 0x27c   : > { %v2126_v17 = vpop.f32.mrb[3].mxu1 }
 0x27f   : > { %v2130_v19 = vpop.f32.mrb[4].mxu1 }
 0x280   : > { %v2132_v20 = vpop.f32.mrb[5].mxu1 }
 0x283   : > { %v2136_v21 = vpop.f32.mrb[6].mxu1 }
 0x284   : > { %v2138_v22 = vpop.f32.mrb[7].mxu1 }
 0x287   : > { %v2142_v23 = vpop.f32.mrb[8].mxu1 }
 0x288   : > { %v2144_v24 = vpop.f32.mrb[9].mxu1 }
 0x28b   : > { %v2148_v25 = vpop.f32.mrb[10].mxu1 }
 0x28c   : > { %v2150_v0 = vpop.f32.mrb[11].mxu1 }
 0x28f   : > { %v2154_v27 = vpop.f32.mrb[12].mxu1 }
 0x290   : > { %v2156_v28 = vpop.f32.mrb[13].mxu1 }
 0x293   : > { %v2160_v29 = vpop.f32.mrb[14].mxu1 }
 0x294   : > { %v2162_v30 = vpop.f32.mrb[15].mxu1 }
 0x297   : > { %v9181_v32 = vpop.f32.mrb[16].mxu1 }
 0x298   : > { %v9183_v33 = vpop.f32.mrb[17].mxu1 }
 0x29b   : > { %v9185_v13 = vpop.f32.mrb[18].mxu1 }
 0x29c   : > { %v9187_v18 = vpop.f32.mrb[19].mxu1 }
 0x29f   : > { %v9189_v26 = vpop.f32.mrb[20].mxu1 }
 0x2a0   : > { %v9191_v31 = vpop.f32.mrb[21].mxu1 }
 0x2a3   : > { %v9193_v34 = vpop.f32.mrb[22].mxu1 }
 0x2a4   : > { %v9195_v36 = vpop.f32.mrb[23].mxu1 }
 0x2a7   : > { %v9197_v35 = vpop.f32.mrb[24].mxu1 }
 0x2a8   : > { %v9199_v37 = vpop.f32.mrb[25].mxu1 }
 0x2ab   : > { %v9201_v38 = vpop.f32.mrb[26].mxu1 }
 0x2ac   : > { %v9203_v39 = vpop.f32.mrb[27].mxu1 }
 0x2af   : > { %v9205_v40 = vpop.f32.mrb[28].mxu1 }
 0x2b0   : > { %v9207_v41 = vpop.f32.mrb[29].mxu1 }
 0x2b3   : > { %v9209_v42 = vpop.f32.mrb[30].mxu1 }
 0x2b4   : > { %v9211_v43 = vpop.f32.mrb[31].mxu1 }
 0x2b8   : > { %v5113_v44 = vpop.f32.mrb[0].mxu0 }
 0x2b9   : > { %v9213_v45 = vadd.f32 %v5113_v44, %v2118_v8  ;;  %v5115_v46 = vpop.f32.mrb[1].mxu0 }
 0x2ba   : > { %v9215_v47 = vadd.f32 %v5115_v46, %v2120_v15 }
 0x2bb   : > { %5464 = vrot.lane.b32.xlu0 %v9213_v45, %s7484_s17 }
 0x2bc   : > { %v5119_v48 = vpop.f32.mrb[2].mxu0  ;;  %5576 = vrot.lane.b32.xlu1 %v9215_v47, %s7484_s17 }
 0x2bd   : > { %v9221_v49 = vadd.f32 %v5119_v48, %v2124_v16  ;;  %v5121_v50 = vpop.f32.mrb[3].mxu0 }
 0x2be   : > { %v9223_v51 = vadd.f32 %v5121_v50, %v2126_v17 }
 0x2bf   : > { %5466 = vrot.lane.b32.xlu0 %v9221_v49, %s7484_s17 }
 0x2c0   : > { %v5125_v52 = vpop.f32.mrb[4].mxu0 }
 0x2c1   : > { %v9227_v53 = vadd.f32 %v5125_v52, %v2130_v19  ;;  %v5127_v54 = vpop.f32.mrb[5].mxu0 }
 0x2c2   : > { %v9229_v55 = vadd.f32 %v5127_v54, %v2132_v20 }
 0x2c3   : > { %5578 = vrot.lane.b32.xlu0 %v9223_v51, %s7484_s17  ;;  %5468 = vrot.lane.b32.xlu1 %v9227_v53, %s7484_s17 }
 0x2c4   : > { %v5131_v56 = vpop.f32.mrb[6].mxu0 }
 0x2c5   : > { %v9235_v57 = vadd.f32 %v5131_v56, %v2136_v21  ;;  %v5133_v58 = vpop.f32.mrb[7].mxu0 }
 0x2c6   : > { %v9237_v59 = vadd.f32 %v5133_v58, %v2138_v22 }
 0x2c7   : > { %5580 = vrot.lane.b32.xlu1 %v9229_v55, %s7484_s17 }
 0x2c8   : > { %v5137_v60 = vpop.f32.mrb[8].mxu0 }
 0x2c9   : > { %v9241_v61 = vadd.f32 %v5137_v60, %v2142_v23  ;;  %v5139_v62 = vpop.f32.mrb[9].mxu0 }
 0x2ca   : > { %v9243_v63 = vadd.f32 %v5139_v62, %v2144_v24 }
 0x2cb   : > { %5470 = vrot.lane.b32.xlu1 %v9235_v57, %s7484_s17  ;;  %5472 = vrot.lane.b32.xlu0 %v9241_v61, %s7484_s17 }
 0x2cc   : > { %v5143_v1 = vpop.f32.mrb[10].mxu0 }
 0x2cd   : > { %v9249_v2 = vadd.f32 %v5143_v1, %v2148_v25  ;;  %v5145_v3 = vpop.f32.mrb[11].mxu0 }
 0x2ce   : > { %v9251_v4 = vadd.f32 %v5145_v3, %v2150_v0 }
 0x2cf   : > { %5582 = vrot.lane.b32.xlu1 %v9237_v59, %s7484_s17 }
 0x2d0   : > { %v5149_v5 = vpop.f32.mrb[12].mxu0  ;;  %5586 = vrot.lane.b32.xlu0 %v9251_v4, %s7484_s17 }
 0x2d1   : > { %v9257_v6 = vadd.f32 %v5149_v5, %v2154_v27  ;;  %v5151_v7 = vpop.f32.mrb[13].mxu0 }
 0x2d2   : > { %v9259_v9 = vadd.f32 %v5151_v7, %v2156_v28 }
 0x2d3   : > { %5584 = vrot.lane.b32.xlu1 %v9243_v63, %s7484_s17 }
 0x2d4   : > { %v5155_v10 = vpop.f32.mrb[14].mxu0  ;;  %5476 = vrot.lane.b32.xlu0 %v9257_v6, %s7484_s17 }
 0x2d5   : > { %v9265_v11 = vadd.f32 %v5155_v10, %v2160_v29  ;;  %v5157_v12 = vpop.f32.mrb[15].mxu0 }
 0x2d6   : > { %v9267_v14 = vadd.f32 %v5157_v12, %v2162_v30 }
 0x2d7   : > { %5474 = vrot.lane.b32.xlu1 %v9249_v2, %s7484_s17 }
 0x2d8   : > { %v5161_v8 = vpop.f32.mrb[16].mxu0 }
 0x2d9   : > { %v9272_v15 = vadd.f32 %v5161_v8, %v9181_v32  ;;  %v5163_v16 = vpop.f32.mrb[17].mxu0 }
 0x2da   : > { %v9275_v17 = vadd.f32 %v5163_v16, %v9183_v33 }
 0x2db   : > { %5588 = vrot.lane.b32.xlu1 %v9259_v9, %s7484_s17  ;;  %5480 = vrot.lane.b32.xlu0 %v9272_v15, %s7484_s17 }
 0x2dc   : > { %v5167_v19 = vpop.f32.mrb[18].mxu0 }
 0x2dd   : > { %v9282_v20 = vadd.f32 %v5167_v19, %v9185_v13  ;;  %v5169_v21 = vpop.f32.mrb[19].mxu0 }
 0x2de   : > { %v9285_v22 = vadd.f32 %v5169_v21, %v9187_v18 }
 0x2df   : > { %5478 = vrot.lane.b32.xlu1 %v9265_v11, %s7484_s17 }
 0x2e0   : > { %v5173_v23 = vpop.f32.mrb[20].mxu0 }
 0x2e1   : > { %v9290_v24 = vadd.f32 %v5173_v23, %v9189_v26  ;;  %v5175_v25 = vpop.f32.mrb[21].mxu0 }
 0x2e2   : > { %v9293_v0 = vadd.f32 %v5175_v25, %v9191_v31 }
 0x2e3   : > { %5590 = vrot.lane.b32.xlu1 %v9267_v14, %s7484_s17  ;;  %5484 = vrot.lane.b32.xlu0 %v9290_v24, %s7484_s17 }
 0x2e4   : > { %v5179_v27 = vpop.f32.mrb[22].mxu0 }
 0x2e5   : > { %v9300_v28 = vadd.f32 %v5179_v27, %v9193_v34  ;;  %v5181_v29 = vpop.f32.mrb[23].mxu0 }
 0x2e6   : > { %v9303_v30 = vadd.f32 %v5181_v29, %v9195_v36  ;;  %v9320_v36 = vpop.permute.xlu0 %5882 }
 0x2e7   : > { %5592 = vrot.lane.b32.xlu1 %v9275_v17, %s7484_s17 }
 0x2e8   : > { %9787 = vst [vmem:[#allocation3_spill] sm:$0xff] %v9303_v30  ;;  %v5185_v32 = vpop.f32.mrb[24].mxu0 }
 0x2e9   : > { %v9308_v33 = vadd.f32 %v5185_v32, %v9197_v35  ;;  %v5187_v13 = vpop.f32.mrb[25].mxu0 }
 0x2ea   : > { %v9311_v18 = vadd.f32 %v5187_v13, %v9199_v37  ;;  %v9337_v48 = vpop.permute.xlu0 %5892 }
 0x2eb   : > { %9788 = vst [vmem:[#allocation4_spill] sm:$0xff] %v9308_v33  ;;  %5482 = vrot.lane.b32.xlu1 %v9282_v20, %s7484_s17  ;;  %5488 = vrot.lane.b32.xlu0 %v9308_v33, %s7484_s17 }
 0x2ec   : > { %9789 = vst [vmem:[#allocation5_spill] sm:$0xff] %v9311_v18  ;;  %v5191_v26 = vpop.f32.mrb[26].mxu0 }
 0x2ed   : > { %v9318_v31 = vadd.f32 %v5191_v26, %v9201_v38  ;;  %v5193_v34 = vpop.f32.mrb[27].mxu0 }
 0x2ee   : > { %v9323_v35 = vadd.f32 %v5193_v34, %v9203_v39  ;;  %v9353_v62 = vpop.permute.xlu0 %5902 }
 0x2ef   : > { %5594 = vrot.lane.b32.xlu1 %v9285_v22, %s7484_s17 }
 0x2f0   : > { %v5197_v37 = vpop.f32.mrb[28].mxu0  ;;  %5602 = vrot.lane.b32.xlu0 %v9323_v35, %s7484_s17 }
 0x2f1   : > { %v9330_v44 = vadd.f32 %v5197_v37, %v9205_v40  ;;  %v5199_v46 = vpop.f32.mrb[29].mxu0 }
 0x2f2   : > { %v9333_v38 = vadd.f32 %v5199_v46, %v9207_v41  ;;  %v9367_v8 = vpop.permute.xlu0 %5907 }
 0x2f3   : > { %9790 = vst [vmem:[#allocation6_spill] sm:$0xff] %v9330_v44  ;;  %5596 = vrot.lane.b32.xlu1 %v9293_v0, %s7484_s17  ;;  %9794 = vst [vmem:[#allocation10_spill] sm:$0xff] %v9367_v8 }
 0x2f4   : > { %9791 = vst [vmem:[#allocation7_spill] sm:$0xff] %v9333_v38  ;;  %v5203_v39 = vpop.f32.mrb[30].mxu0  ;;  %5492 = vrot.lane.b32.xlu0 %v9330_v44, %s7484_s17 }
 0x2f5   : > { %v9342_v50 = vadd.f32 %v5203_v39, %v9209_v42  ;;  %v5205_v52 = vpop.f32.mrb[31].mxu0 }
 0x2f6   : > { %v9345_v40 = vadd.f32 %v5205_v52, %v9211_v43  ;;  %v9381_v34 = vpop.permute.xlu0 %5912 }
 0x2f7   : > { %9792 = vst [vmem:[#allocation8_spill] sm:$0xff] %v9342_v50  ;;  %5486 = vrot.lane.b32.xlu1 %v9300_v28, %s7484_s17  ;;  %v2813_v41 = vpop.f32.mrb[32].mxu1  ;;  %9795 = vst [vmem:[#allocation11_spill] sm:$0xff] %v9381_v34 }
 0x2f8   : > { %9793 = vst [vmem:[#allocation9_spill] sm:$0xff] %v9345_v40  ;;  %v5209_v54 = vpop.f32.mrb[32].mxu0  ;;  %5604 = vrot.lane.b32.xlu0 %v9333_v38, %s7484_s17  ;;  %v2815_v56 = vpop.f32.mrb[33].mxu1 }
 0x2f9   : > { %v9351_v58 = vadd.f32 %v5209_v54, %v2813_v41  ;;  %v5211_v60 = vpop.f32.mrb[33].mxu0 }
 0x2fa   : > { %v9355_v42 = vadd.f32 %v5211_v60, %v2815_v56  ;;  %v9395_v60 = vpop.permute.xlu0 %5917 }
 0x2fb   : > { %5598 = vrot.lane.b32.xlu1 %v9303_v30, %s7484_s17  ;;  %v2819_v43 = vpop.f32.mrb[34].mxu1  ;;  %9796 = vst [vmem:[#allocation12_spill] sm:$0xff] %v9395_v60 }
 0x2fc   : > { %v5215_v1 = vpop.f32.mrb[34].mxu0  ;;  %5606 = vrot.lane.b32.xlu0 %v9345_v40, %s7484_s17  ;;  %v2821_v3 = vpop.f32.mrb[35].mxu1 }
 0x2fd   : > { %v9361_v5 = vadd.f32 %v5215_v1, %v2819_v43  ;;  %v5217_v7 = vpop.f32.mrb[35].mxu0 }
 0x2fe   : > { %v9363_v10 = vadd.f32 %v5217_v7, %v2821_v3 }
 0x2ff   : > { %5600 = vrot.lane.b32.xlu1 %v9311_v18, %s7484_s17  ;;  %v2825_v12 = vpop.f32.mrb[36].mxu1 }
 0x300   : > { %v5221_v16 = vpop.f32.mrb[36].mxu0  ;;  %5688 = vrot.lane.b32.xlu0 %v9351_v58, %s7484_s17  ;;  %v2827_v19 = vpop.f32.mrb[37].mxu1 }
 0x301   : > { %v9371_v21 = vadd.f32 %v5221_v16, %v2825_v12  ;;  %v5223_v23 = vpop.f32.mrb[37].mxu0 }
 0x302   : > { %v9373_v25 = vadd.f32 %v5223_v23, %v2827_v19 }
 0x303   : > { %5490 = vrot.lane.b32.xlu1 %v9318_v31, %s7484_s17  ;;  %v2831_v27 = vpop.f32.mrb[38].mxu1 }
 0x304   : > { %v5227_v29 = vpop.f32.mrb[38].mxu0  ;;  %5800 = vrot.lane.b32.xlu0 %v9355_v42, %s7484_s17  ;;  %v2833_v32 = vpop.f32.mrb[39].mxu1 }
 0x305   : > { %v9379_v13 = vadd.f32 %v5227_v29, %v2831_v27  ;;  %v5229_v26 = vpop.f32.mrb[39].mxu0  ;;  %v9407_v29 = vpop.permute.xlu0 %5922 }
 0x306   : > { %v9383_v37 = vadd.f32 %v5229_v26, %v2833_v32  ;;  %9797 = vst [vmem:[#allocation13_spill] sm:$0xff] %v9407_v29 }
 0x307   : > { %5494 = vrot.lane.b32.xlu1 %v9342_v50, %s7484_s17  ;;  %v2837_v46 = vpop.f32.mrb[40].mxu1 }
 0x308   : > { %v5233_v39 = vpop.f32.mrb[40].mxu0  ;;  %5692 = vrot.lane.b32.xlu0 %v9371_v21, %s7484_s17  ;;  %v2839_v52 = vpop.f32.mrb[41].mxu1 }
 0x309   : > { %v9389_v41 = vadd.f32 %v5233_v39, %v2837_v46  ;;  %v5235_v54 = vpop.f32.mrb[41].mxu0  ;;  %v9413_v39 = vpop.permute.xlu1 %5887 }
 0x30a   : > { %v9391_v56 = vadd.f32 %v5235_v54, %v2839_v52 }
 0x30b   : > { %5690 = vrot.lane.b32.xlu1 %v9361_v5, %s7484_s17  ;;  %v2843_v43 = vpop.f32.mrb[42].mxu1 }
 0x30c   : > { %v5239_v1 = vpop.f32.mrb[42].mxu0  ;;  %5696 = vrot.lane.b32.xlu0 %v9389_v41, %s7484_s17  ;;  %v2845_v3 = vpop.f32.mrb[43].mxu1 }
 0x30d   : > { %v9399_v7 = vadd.f32 %v5239_v1, %v2843_v43  ;;  %v5241_v12 = vpop.f32.mrb[43].mxu0  ;;  %v9429_v40 = vpop.permute.xlu1 %5897 }
 0x30e   : > { %v9401_v16 = vadd.f32 %v5241_v12, %v2845_v3 }
 0x30f   : > { %5802 = vrot.lane.b32.xlu1 %v9363_v10, %s7484_s17  ;;  %v2849_v19 = vpop.f32.mrb[44].mxu1 }
 0x310   : > { %v5245_v23 = vpop.f32.mrb[44].mxu0  ;;  %5698 = vrot.lane.b32.xlu0 %v9399_v7, %s7484_s17  ;;  %v2851_v27 = vpop.f32.mrb[45].mxu1 }
 0x311   : > { %v9409_v32 = vadd.f32 %v5245_v23, %v2849_v19  ;;  %v5247_v26 = vpop.f32.mrb[45].mxu0  ;;  %v9423_v19 = vpop.permute.xlu0 %5927 }
 0x312   : > { %v9411_v46 = vadd.f32 %v5247_v26, %v2851_v27  ;;  %9800 = vst [vmem:[#allocation16_spill] sm:$0xff] %v9423_v19 }
 0x313   : > { %5804 = vrot.lane.b32.xlu1 %v9373_v25, %s7484_s17  ;;  %v2855_v52 = vpop.f32.mrb[46].mxu1 }
 0x314   : > { %9798 = vst [vmem:[#allocation14_spill] sm:$0xff] %v9411_v46  ;;  %v5251_v54 = vpop.f32.mrb[46].mxu0  ;;  %5700 = vrot.lane.b32.xlu0 %v9409_v32, %s7484_s17  ;;  %v2857_v43 = vpop.f32.mrb[47].mxu1 }
 0x315   : > { %v9419_v1 = vadd.f32 %v5251_v54, %v2855_v52  ;;  %v5253_v3 = vpop.f32.mrb[47].mxu0  ;;  %v9439_v19 = vpop.permute.xlu0 %5932 }
 0x316   : > { %v9421_v12 = vadd.f32 %v5253_v3, %v2857_v43  ;;  %9802 = vst [vmem:[#allocation18_spill] sm:$0xff] %v9439_v19 }
 0x317   : > { %5694 = vrot.lane.b32.xlu1 %v9379_v13, %s7484_s17  ;;  %v2861_v23 = vpop.f32.mrb[48].mxu1 }
 0x318   : > { %9799 = vst [vmem:[#allocation15_spill] sm:$0xff] %v9421_v12  ;;  %v5257_v27 = vpop.f32.mrb[48].mxu0  ;;  %5702 = vrot.lane.b32.xlu0 %v9419_v1, %s7484_s17  ;;  %v2863_v26 = vpop.f32.mrb[49].mxu1 }
 0x319   : > { %v9431_v38 = vadd.f32 %v5257_v27, %v2861_v23  ;;  %v5259_v52 = vpop.f32.mrb[49].mxu0  ;;  %v9445_v23 = vpop.permute.xlu1 %5942 }
 0x31a   : > { %v9433_v54 = vadd.f32 %v5259_v52, %v2863_v26  ;;  %9805 = vst [vmem:[#allocation21_spill] sm:$0xff] %v9445_v23 }
 0x31b   : > { %9801 = vst [vmem:[#allocation17_spill] sm:$0xff] %v9431_v38  ;;  %5806 = vrot.lane.b32.xlu1 %v9383_v37, %s7484_s17  ;;  %v2867_v43 = vpop.f32.mrb[50].mxu1 }
 0x31c   : > { %v5263_v3 = vpop.f32.mrb[50].mxu0  ;;  %5704 = vrot.lane.b32.xlu0 %v9431_v38, %s7484_s17  ;;  %v2869_v50 = vpop.f32.mrb[51].mxu1 }
 0x31d   : > { %v9441_v44 = vadd.f32 %v5263_v3, %v2867_v43  ;;  %v5265_v29 = vpop.f32.mrb[51].mxu0  ;;  %v9455_v43 = vpop.permute.xlu0 %5937 }
 0x31e   : > { %v9443_v18 = vadd.f32 %v5265_v29, %v2869_v50  ;;  %9808 = vst [vmem:[#allocation24_spill] sm:$0xff] %v9455_v43  ;;  %v9461_v23 = vpop.permute.xlu1 %5947 }
 0x31f   : > { %9803 = vst [vmem:[#allocation19_spill] sm:$0xff] %v9441_v44  ;;  %5808 = vrot.lane.b32.xlu1 %v9391_v56, %s7484_s17  ;;  %v2873_v27 = vpop.f32.mrb[52].mxu1  ;;  %9809 = vst [vmem:[#allocation25_spill] sm:$0xff] %v9461_v23 }
 0x320   : > { %9804 = vst [vmem:[#allocation20_spill] sm:$0xff] %v9443_v18  ;;  %v5269_v26 = vpop.f32.mrb[52].mxu0  ;;  %5706 = vrot.lane.b32.xlu0 %v9441_v44, %s7484_s17  ;;  %v2875_v52 = vpop.f32.mrb[53].mxu1 }
 0x321   : > { %v9451_v60 = vadd.f32 %v5269_v26, %v2873_v27  ;;  %v5271_v33 = vpop.f32.mrb[53].mxu0  ;;  %v9471_v30 = vpop.permute.xlu0 %5957 }
 0x322   : > { %v9453_v19 = vadd.f32 %v5271_v33, %v2875_v52  ;;  %9810 = vst [vmem:[#allocation26_spill] sm:$0xff] %v9471_v30 }
 0x323   : > { %9806 = vst [vmem:[#allocation22_spill] sm:$0xff] %v9451_v60  ;;  %5810 = vrot.lane.b32.xlu1 %v9401_v16, %s7484_s17  ;;  %v2879_v50 = vpop.f32.mrb[54].mxu1 }
 0x324   : > { %9807 = vst [vmem:[#allocation23_spill] sm:$0xff] %v9453_v19  ;;  %v5275_v29 = vpop.f32.mrb[54].mxu0  ;;  %5818 = vrot.lane.b32.xlu0 %v9443_v18, %s7484_s17  ;;  %v2881_v3 = vpop.f32.mrb[55].mxu1 }
 0x325   : > { %v9463_v34 = vadd.f32 %v5275_v29, %v2879_v50  ;;  %v5277_v27 = vpop.f32.mrb[55].mxu0  ;;  %v9477_v50 = vpop.permute.xlu1 %5952 }
 0x326   : > { %v9465_v26 = vadd.f32 %v5277_v27, %v2881_v3  ;;  %9811 = vst [vmem:[#allocation27_spill] sm:$0xff] %v9477_v50 }
 0x327   : > { %5812 = vrot.lane.b32.xlu1 %v9411_v46, %s7484_s17  ;;  %v2885_v33 = vpop.f32.mrb[56].mxu1 }
 0x328   : > { %v5281_v52 = vpop.f32.mrb[56].mxu0  ;;  %5708 = vrot.lane.b32.xlu0 %v9451_v60, %s7484_s17  ;;  %v2887_v43 = vpop.f32.mrb[57].mxu1 }
 0x329   : > { %v9473_v18 = vadd.f32 %v5281_v52, %v2885_v33  ;;  %v5283_v38 = vpop.f32.mrb[57].mxu0 }
 0x32a   : > { %v9475_v23 = vadd.f32 %v5283_v38, %v2887_v43 }
 0x32b   : > { %5814 = vrot.lane.b32.xlu1 %v9421_v12, %s7484_s17  ;;  %v2891_v29 = vpop.f32.mrb[58].mxu1 }
 0x32c   : > { %v5287_v3 = vpop.f32.mrb[58].mxu0  ;;  %5820 = vrot.lane.b32.xlu0 %v9453_v19, %s7484_s17  ;;  %v2893_v27 = vpop.f32.mrb[59].mxu1 }
 0x32d   : > { %v9483_v60 = vadd.f32 %v5287_v3, %v2891_v29  ;;  %v5289_v46 = vpop.f32.mrb[59].mxu0  ;;  %v5465_v30 = vpop.permute.xlu0 %5464 }
 0x32e   : > { %v5512_v33 = vmax.f32 %v9213_v45, %v5465_v30  ;;  %v9486_v52 = vadd.f32 %v5289_v46, %v2893_v27  ;;  %v5577_v38 = vpop.permute.xlu1 %5576 }
 0x32f   : > { %5816 = vrot.lane.b32.xlu1 %v9433_v54, %s7484_s17  ;;  %v2897_v43 = vpop.f32.mrb[60].mxu1 }
 0x330   : > { %9812 = vst [vmem:[#allocation28_spill] sm:$0xff] %v9486_v52  ;;  %v5544_v50 = vmax.f32 %v5512_v33, %v9215_v47  ;;  %v5293_v12 = vpop.f32.mrb[60].mxu0  ;;  %5822 = vrot.lane.b32.xlu0 %v9465_v26, %s7484_s17  ;;  %v2899_v19 = vpop.f32.mrb[61].mxu1 }
 0x331   : > { %v9493_v29 = vadd.f32 %v5293_v12, %v2897_v43  ;;  %v5295_v3 = vpop.f32.mrb[61].mxu0  ;;  %v5467_v8 = vpop.permute.xlu0 %5466 }
 0x332   : > { %v5624_v44 = vmax.f32 %v5544_v50, %v5577_v38  ;;  %v5513_v45 = vmax.f32 %v9221_v49, %v5467_v8  ;;  %v9496_v30 = vadd.f32 %v5295_v3, %v2899_v19 }
 0x333   : > { %9813 = vst [vmem:[#allocation29_spill] sm:$0xff] %v9493_v29  ;;  %5710 = vrot.lane.b32.xlu1 %v9463_v34, %s7484_s17  ;;  %v2903_v46 = vpop.f32.mrb[62].mxu1 }
 0x334   : > { %9814 = vst [vmem:[#allocation30_spill] sm:$0xff] %v9496_v30  ;;  %v5299_v27 = vpop.f32.mrb[62].mxu0  ;;  %5716 = vrot.lane.b32.xlu0 %v9493_v29, %s7484_s17  ;;  %v5545_v47 = vmax.f32 %v5513_v45, %v9223_v51  ;;  %v2905_v33 = vpop.f32.mrb[63].mxu1  ;;  %v9504_v12 = vmax.f32 %v5624_v44, %v9351_v58 }
 0x335   : > { %v9506_v43 = vadd.f32 %v5299_v27, %v2903_v46  ;;  %v5301_v50 = vpop.f32.mrb[63].mxu0  ;;  %v5579_v49 = vpop.permute.xlu0 %5578 }
 0x336   : > { %v5625_v8 = vmax.f32 %v5545_v47, %v5579_v49  ;;  %v5469_v19 = vpop.permute.xlu1 %5468  ;;  %v9508_v38 = vadd.f32 %v5301_v50, %v2905_v33 }
 0x337   : > { %9815 = vst [vmem:[#allocation31_spill] sm:$0xff] %v9506_v43  ;;  %v5514_v3 = vmax.f32 %v9227_v53, %v5469_v19  ;;  %5712 = vrot.lane.b32.xlu1 %v9473_v18, %s7484_s17 }
 0x338   : > { %9816 = vst [vmem:[#allocation32_spill] sm:$0xff] %v9508_v38  ;;  %5826 = vrot.lane.b32.xlu0 %v9486_v52, %s7484_s17  ;;  %v9516_v51 = vmax.f32 %v5625_v8, %v9361_v5 }
 0x339   : > { %v5546_v44 = vmax.f32 %v5514_v3, %v9229_v55 }
 0x33a   : > { %v5581_v58 = vpop.permute.xlu1 %5580 }
 0x33b   : > { %v5626_v45 = vmax.f32 %v5546_v44, %v5581_v58  ;;  %5824 = vrot.lane.b32.xlu1 %v9475_v23, %s7484_s17 }
 0x33c   : > { %5830 = vrot.lane.b32.xlu0 %v9508_v38, %s7484_s17 }
 0x33d   : > { %v5473_v53 = vpop.permute.xlu0 %5472  ;;  %v9524_v46 = vmax.f32 %v5626_v45, %v9371_v21 }
 0x33e   : > { %v5471_v27 = vpop.permute.xlu1 %5470  ;;  %v5516_v55 = vmax.f32 %v9241_v61, %v5473_v53 }
 0x33f   : > { %v5515_v47 = vmax.f32 %v9235_v57, %v5471_v27  ;;  %5714 = vrot.lane.b32.xlu1 %v9483_v60, %s7484_s17 }
 0x340   : > { %v5548_v21 = vmax.f32 %v5516_v55, %v9243_v63 }
 0x341   : > { %v5547_v5 = vmax.f32 %v5515_v47, %v9237_v59 }
 0x342   : > { %v5583_v33 = vpop.permute.xlu1 %5582  ;;  %v9531_v50 = vpop.permute.xlu0 %5586 }
 0x343   : > { %v5627_v49 = vmax.f32 %v5547_v5, %v5583_v33  ;;  %5718 = vrot.lane.b32.xlu1 %v9506_v43, %s7484_s17 }
 0x345   : > { %v9537_v8 = vmax.f32 %v5627_v49, %v9379_v13 }
 0x346   : > { %v5585_v57 = vpop.permute.xlu1 %5584  ;;  %v5477_v19 = vpop.permute.xlu0 %5476 }
 0x347   : > { %v5628_v3 = vmax.f32 %v5548_v21, %v5585_v57  ;;  %5828 = vrot.lane.b32.xlu1 %v9496_v30, %s7484_s17  ;;  %v5518_v59 = vmax.f32 %v9257_v6, %v5477_v19 }
 0x349   : > { %v9543_v61 = vmax.f32 %v5628_v3, %v9389_v41  ;;  %v5550_v63 = vmax.f32 %v5518_v59, %v9259_v9 }
 0x34a   : > { %v5475_v44 = vpop.permute.xlu1 %5474 }
 0x34b   : > { %v5517_v58 = vmax.f32 %v9249_v2, %v5475_v44 }
 0x34d   : > { %v9547_v45 = vmax.f32 %v5517_v58, %v9251_v4  ;;  %v9556_v55 = vpop.permute.xlu0 %5480 }
 0x34e   : > { %v5589_v13 = vpop.permute.xlu1 %5588 }
 0x34f   : > { %v5630_v53 = vmax.f32 %v5550_v63, %v5589_v13  ;;  %v5629_v27 = vmax.f32 %v9547_v45, %v9531_v50 }
 0x351   : > { %v9553_v47 = vmax.f32 %v5630_v53, %v9409_v32 }
 0x352   : > { %v5479_v6 = vpop.permute.xlu1 %5478 }
 0x353   : > { %v5519_v41 = vmax.f32 %v9265_v11, %v5479_v6 }
 0x355   : > { %v9559_v2 = vmax.f32 %v5519_v41, %v9267_v14  ;;  %v9565_v5 = vpop.permute.xlu0 %5484 }
 0x356   : > { %v9561_v4 = vpop.permute.xlu1 %5590 }
 0x35a   : > { %v9567_v33 = vpop.permute.xlu1 %5592 }
 0x35d   : > { %v9569_v50 = vpop.permute.xlu0 %5488 }
 0x35e   : > { %v5483_v32 = vpop.permute.xlu1 %5482 }
 0x35f   : > { %v5521_v49 = vmax.f32 %v9282_v20, %v5483_v32 }
 0x361   : > { %v9573_v11 = vmax.f32 %v5521_v49, %v9285_v22 }
 0x362   : > { %v9575_v21 = vpop.permute.xlu1 %5594  ;;  %v5603_v14 = vpop.permute.xlu0 %5602 }
 0x366   : > { %v9579_v19 = vpop.permute.xlu1 %5596  ;;  %v9581_v3 = vpop.permute.xlu0 %5492 }
 0x36a   : > { %v9583_v59 = vpop.permute.xlu1 %5486  ;;  %v9585_v44 = vpop.permute.xlu0 %5604 }
 0x36e   : > { %v9587_v58 = vpop.permute.xlu1 %5598  ;;  %v9589_v20 = vpop.permute.xlu0 %5606 }
 0x372   : > { %v9591_v22 = vpop.permute.xlu1 %5600  ;;  %v5689_v45 = vpop.permute.xlu0 %5688 }
 0x373   : > { %v5736_v6 = vmax.f32 %v9504_v12, %v5689_v45 }
 0x375   : > { %v5768_v9 = vmax.f32 %v5736_v6, %v9355_v42  ;;  %v5661_v6 = vmax.f32 %v5629_v27, %v9399_v7 }
 0x376   : > { %v5491_v63 = vpop.permute.xlu1 %5490  ;;  %v5801_v13 = vpop.permute.xlu0 %5800 }
 0x377   : > { %v5525_v53 = vmax.f32 %v9318_v31, %v5491_v63  ;;  %v5848_v29 = vmax.f32 %v5768_v9, %v5801_v13 }
 0x379   : > { %v5557_v41 = vmax.f32 %v5525_v53, %v9323_v35  ;;  %v9606_v53 = vadd.f32 %v9320_v36, %v5848_v29 }
 0x37a   : > { %v9596_v32 = vpop.permute.xlu1 %5494  ;;  %v5693_v49 = vpop.permute.xlu0 %5692 }
 0x37b   : > { %v5637_v57 = vmax.f32 %v5557_v41, %v5603_v14  ;;  %v5738_v31 = vmax.f32 %v9524_v46, %v5693_v49  ;;  %v5520_v49 = vmax.f32 %v9272_v15, %v9556_v55 }
 0x37d   : > { %v9600_v30 = vmax.f32 %v5637_v57, %v9483_v60  ;;  %v5770_v60 = vmax.f32 %v5738_v31, %v9373_v25  ;;  %v5552_v7 = vmax.f32 %v5520_v49, %v9275_v17 }
 0x37e   : > { %v5691_v38 = vpop.permute.xlu1 %5690  ;;  %v5697_v43 = vpop.permute.xlu0 %5696 }
 0x37f   : > { %v5737_v52 = vmax.f32 %v9516_v51, %v5691_v38 }
 0x381   : > { %v5769_v12 = vmax.f32 %v5737_v52, %v9363_v10 }
 0x382   : > { %v5803_v45 = vpop.permute.xlu1 %5802  ;;  %v5699_v35 = vpop.permute.xlu0 %5698 }
 0x383   : > { %v5849_v63 = vmax.f32 %v5769_v12, %v5803_v45  ;;  %v5741_v31 = vmax.f32 %v5661_v6, %v5699_v35 }
 0x385   : > { %v9609_v42 = vadd.f32 %v9413_v39, %v5849_v63  ;;  %v5740_v39 = vmax.f32 %v9543_v61, %v5697_v43  ;;  %v9817_v63 = vmax.f32 %v9559_v2, %v9561_v4 }
 0x386   : > { %v5805_v14 = vpop.permute.xlu1 %5804  ;;  %v5701_v57 = vpop.permute.xlu0 %5700 }
 0x387   : > { %v5976_v38 = vmax.f32 %v9606_v53, %v9609_v42  ;;  %v5850_v51 = vmax.f32 %v5770_v60, %v5805_v14  ;;  %v5742_v15 = vmax.f32 %v9553_v47, %v5701_v57  ;;  %v5663_v17 = vmax.f32 %v9817_v63, %v9419_v1  ;;  %v9818_v14 = vld [vmem:[#allocation19_spill] sm:$0xff]  ;;  %v9820_v57 = vld [vmem:[#allocation10_spill] sm:$0xff] }
 0x389   : > { %v9615_v46 = vadd.f32 %v9337_v48, %v5850_v51  ;;  %v5522_v48 = vmax.f32 %v9290_v24, %v9565_v5  ;;  %v5773_v24 = vmax.f32 %v5741_v31, %v9401_v16  ;;  %v9819_v16 = vmax.f32 %v9573_v11, %v9575_v21  ;;  %v9825_v11 = vld [vmem:[#allocation11_spill] sm:$0xff] }
 0x38a   : > { %v5695_v10 = vpop.permute.xlu1 %5694  ;;  %v5703_v52 = vpop.permute.xlu0 %5702 }
 0x38b   : > { %v5977_v9 = vmax.f32 %v5976_v38, %v9615_v46  ;;  %v5739_v36 = vmax.f32 %v9537_v8, %v5695_v10  ;;  %v5772_v8 = vmax.f32 %v5740_v39, %v9391_v56  ;;  %v5554_v27 = vmax.f32 %v5522_v48, %v9293_v0  ;;  %v9822_v10 = vld [vmem:[#allocation17_spill] sm:$0xff]  ;;  %v9827_v48 = vld [vmem:[#allocation4_spill] sm:$0xff] }
 0x38c   : > { %v5743_v47 = vmax.f32 %v5663_v17, %v5703_v52  ;;  %v9824_v52 = vld [vmem:[#allocation3_spill] sm:$0xff]  ;;  %v5524_v31 = vmax.f32 %v9827_v48, %v9569_v50 }
 0x38d   : > { %v5771_v29 = vmax.f32 %v5739_v36, %v9383_v37  ;;  %v5634_v35 = vmax.f32 %v5554_v27, %v9579_v19  ;;  %v9821_v19 = vld [vmem:[#allocation14_spill] sm:$0xff]  ;;  %v9829_v27 = vld [vmem:[#allocation12_spill] sm:$0xff] }
 0x38e   : > { %v5807_v25 = vpop.permute.xlu1 %5806  ;;  %v5705_v13 = vpop.permute.xlu0 %5704  ;;  %v5774_v51 = vmax.f32 %v5742_v15, %v9821_v19  ;;  %v9834_v19 = vld [vmem:[#allocation16_spill] sm:$0xff] }
 0x38f   : > { %v5851_v41 = vmax.f32 %v5771_v29, %v5807_v25 }
 0x391   : > { %v9627_v12 = vadd.f32 %v9429_v40, %v5851_v41  ;;  %v5632_v40 = vmax.f32 %v5552_v7, %v9567_v33  ;;  %v5665_v33 = vmax.f32 %v9819_v16, %v9818_v14  ;;  %v9826_v41 = vld [vmem:[#allocation15_spill] sm:$0xff]  ;;  %v9832_v14 = vld [vmem:[#allocation13_spill] sm:$0xff] }
 0x392   : > { %v5809_v43 = vpop.permute.xlu1 %5808  ;;  %v5707_v61 = vpop.permute.xlu0 %5706  ;;  %v5775_v49 = vmax.f32 %v5743_v47, %v9826_v41 }
 0x393   : > { %v5978_v37 = vmax.f32 %v5977_v9, %v9627_v12  ;;  %v5852_v45 = vmax.f32 %v5772_v8, %v5809_v43  ;;  %v5664_v2 = vmax.f32 %v5632_v40, %v9822_v10  ;;  %v5745_v9 = vmax.f32 %v5665_v33, %v5707_v61  ;;  %v9828_v43 = vld [vmem:[#allocation20_spill] sm:$0xff] }
 0x395   : > { %v9635_v55 = vadd.f32 %v9353_v62, %v5852_v45  ;;  %v5523_v62 = vmax.f32 %v9300_v28, %v9583_v59  ;;  %v9823_v28 = vld [vmem:[#allocation22_spill] sm:$0xff]  ;;  %v5744_v25 = vmax.f32 %v5664_v2, %v5705_v13  ;;  %v5777_v61 = vmax.f32 %v5745_v9, %v9828_v43  ;;  %v9830_v13 = vld [vmem:[#allocation23_spill] sm:$0xff]  ;;  %v9840_v43 = vld [vmem:[#allocation21_spill] sm:$0xff] }
 0x396   : > { %v5811_v5 = vpop.permute.xlu1 %5810  ;;  %v5819_v56 = vpop.permute.xlu0 %5818  ;;  %v5666_v59 = vmax.f32 %v5634_v35, %v9823_v28  ;;  %v9836_v9 = vld [vmem:[#allocation18_spill] sm:$0xff]  ;;  %v9837_v28 = vld [vmem:[#allocation7_spill] sm:$0xff] }
 0x397   : > { %v5979_v0 = vmax.f32 %v5978_v37, %v9635_v55  ;;  %v5853_v60 = vmax.f32 %v5773_v24, %v5811_v5  ;;  %v5555_v29 = vmax.f32 %v5523_v62, %v9824_v52  ;;  %v5776_v40 = vmax.f32 %v5744_v25, %v9433_v54  ;;  %v9831_v5 = vld [vmem:[#allocation5_spill] sm:$0xff] }
 0x398   : > { %v5556_v35 = vmax.f32 %v5524_v31, %v9831_v5  ;;  %v5857_v50 = vmax.f32 %v5777_v61, %v5819_v56  ;;  %v9842_v5 = vld [vmem:[#allocation28_spill] sm:$0xff] }
 0x399   : > { %v9652_v38 = vadd.f32 %v9820_v57, %v5853_v60  ;;  %v5635_v7 = vmax.f32 %v5555_v29, %v9587_v58  ;;  %v9833_v57 = vld [vmem:[#allocation6_spill] sm:$0xff] }
 0x39a   : > { %v5813_v1 = vpop.permute.xlu1 %5812  ;;  %v5709_v4 = vpop.permute.xlu0 %5708  ;;  %v5636_v62 = vmax.f32 %v5556_v35, %v9591_v22  ;;  %v5526_v54 = vmax.f32 %v9833_v57, %v9581_v3  ;;  %v9835_v22 = vld [vmem:[#allocation8_spill] sm:$0xff] }
 0x39b   : > { %v5980_v36 = vmax.f32 %v5979_v0, %v9652_v38  ;;  %v5854_v39 = vmax.f32 %v5774_v51, %v5813_v1  ;;  %v5746_v6 = vmax.f32 %v5666_v59, %v5709_v4  ;;  %v5667_v16 = vmax.f32 %v5635_v7, %v9463_v34  ;;  %v9841_v7 = vld [vmem:[#allocation29_spill] sm:$0xff] }
 0x39c   : > { %v9683_v51 = vadd.f32 %v9834_v19, %v5857_v50  ;;  %v5668_v1 = vmax.f32 %v5636_v62, %v9473_v18  ;;  %v5527_v4 = vmax.f32 %v9835_v22, %v9596_v32  ;;  %v5558_v59 = vmax.f32 %v5526_v54, %v9837_v28  ;;  %v9839_v18 = vld [vmem:[#allocation24_spill] sm:$0xff] }
 0x39d   : > { %v9660_v21 = vadd.f32 %v9825_v11, %v5854_v39  ;;  %v5778_v24 = vmax.f32 %v5746_v6, %v9830_v13  ;;  %v9838_v11 = vld [vmem:[#allocation9_spill] sm:$0xff] }
 0x39e   : > { %v5815_v8 = vpop.permute.xlu1 %5814  ;;  %v5821_v63 = vpop.permute.xlu0 %5820  ;;  %v5559_v6 = vmax.f32 %v5527_v4, %v9838_v11  ;;  %v5638_v31 = vmax.f32 %v5558_v59, %v9585_v44  ;;  %v9843_v44 = vld [vmem:[#allocation31_spill] sm:$0xff] }
 0x39f   : > { %v5981_v37 = vmax.f32 %v5980_v36, %v9660_v21  ;;  %v5855_v45 = vmax.f32 %v5775_v49, %v5815_v8  ;;  %v5858_v47 = vmax.f32 %v5778_v24, %v5821_v63 }
 0x3a1   : > { %v9669_v15 = vadd.f32 %v9829_v27, %v5855_v45  ;;  %v9690_v36 = vadd.f32 %v9836_v9, %v5858_v47  ;;  %v5670_v27 = vmax.f32 %v5638_v31, %v9841_v7 }
 0x3a2   : > { %v5817_v17 = vpop.permute.xlu1 %5816  ;;  %v5823_v2 = vpop.permute.xlu0 %5822 }
 0x3a3   : > { %v5982_v0 = vmax.f32 %v5981_v37, %v9669_v15  ;;  %v5856_v60 = vmax.f32 %v5776_v40, %v5817_v17  ;;  %v5639_v37 = vmax.f32 %v5559_v6, %v9589_v20  ;;  %v9845_v20 = vld [vmem:[#allocation32_spill] sm:$0xff] }
 0x3a5   : > { %v9677_v58 = vadd.f32 %v9832_v14, %v5856_v60  ;;  %v5671_v63 = vmax.f32 %v5639_v37, %v9843_v44  ;;  %v9844_v60 = vld [vmem:[#allocation25_spill] sm:$0xff]  ;;  %v9846_v14 = vld [vmem:[#allocation30_spill] sm:$0xff] }
 0x3a6   : > { %v5711_v33 = vpop.permute.xlu1 %5710  ;;  %v5717_v49 = vpop.permute.xlu0 %5716 }
 0x3a7   : > { %v5983_v56 = vmax.f32 %v5982_v0, %v9677_v58  ;;  %v5747_v10 = vmax.f32 %v5667_v16, %v5711_v33  ;;  %v5750_v40 = vmax.f32 %v5670_v27, %v5717_v49 }
 0x3a9   : > { %v5984_v34 = vmax.f32 %v5983_v56, %v9683_v51  ;;  %v5779_v39 = vmax.f32 %v5747_v10, %v9465_v26  ;;  %v5782_v16 = vmax.f32 %v5750_v40, %v9846_v14  ;;  %v9847_v56 = vld [vmem:[#allocation27_spill] sm:$0xff] }
 0x3aa   : > { %v5713_v3 = vpop.permute.xlu1 %5712 }
 0x3ab   : > { %v5859_v52 = vmax.f32 %v5779_v39, %v5823_v2  ;;  %v5748_v29 = vmax.f32 %v5668_v1, %v5713_v3  ;;  %v5985_v25 = vmax.f32 %v5984_v34, %v9690_v36  ;;  %v9848_v2 = vld [vmem:[#allocation26_spill] sm:$0xff] }
 0x3ad   : > { %v9698_v41 = vadd.f32 %v9839_v18, %v5859_v52  ;;  %v5780_v32 = vmax.f32 %v5748_v29, %v9475_v23  ;;  %v5827_v23 = vpop.permute.xlu0 %5826 }
 0x3ae   : > { %v5825_v48 = vpop.permute.xlu1 %5824 }
 0x3af   : > { %v5986_v26 = vmax.f32 %v5985_v25, %v9698_v41  ;;  %v5860_v8 = vmax.f32 %v5780_v32, %v5825_v48 }
 0x3b1   : > { %v9704_v61 = vadd.f32 %v9840_v43, %v5860_v8  ;;  %v5831_v33 = vpop.permute.xlu0 %5830 }
 0x3b2   : > { %v5715_v45 = vpop.permute.xlu1 %5714 }
 0x3b3   : > { %v5987_v13 = vmax.f32 %v5986_v26, %v9704_v61  ;;  %v5749_v24 = vmax.f32 %v9600_v30, %v5715_v45 }
 0x3b5   : > { %v5781_v35 = vmax.f32 %v5749_v24, %v9842_v5 }
 0x3b6   : > { %v5719_v17 = vpop.permute.xlu1 %5718 }
 0x3b7   : > { %v5861_v50 = vmax.f32 %v5781_v35, %v5827_v23  ;;  %v5751_v0 = vmax.f32 %v5671_v63, %v5719_v17 }
 0x3b9   : > { %v9713_v62 = vadd.f32 %v9844_v60, %v5861_v50  ;;  %v5783_v47 = vmax.f32 %v5751_v0, %v9845_v20 }
 0x3ba   : > { %v5829_v57 = vpop.permute.xlu1 %5828 }
 0x3bb   : > { %v5863_v54 = vmax.f32 %v5783_v47, %v5831_v33  ;;  %v5988_v30 = vmax.f32 %v5987_v13, %v9713_v62  ;;  %v5862_v19 = vmax.f32 %v5782_v16, %v5829_v57 }
 0x3bd   : > { %v5974_v10 = vadd.f32 %v9847_v56, %v5862_v19  ;;  %v9720_v1 = vadd.f32 %v9848_v2, %v5863_v54 }
 0x3bf   : > { %v5989_v22 = vmax.f32 %v5988_v30, %v5974_v10 }
 0x3c1   : > { %v9723_v4 = vmax.f32 %v5989_v22, %v9720_v1 }
 0x3c3   : > { %v5991_v9 = vsub.f32 %v9606_v53, %v9723_v4  ;;  %v5994_v34 = vsub.f32 %v9609_v42, %v9723_v4  ;;  %v5998_v39 = vsub.f32 %v9615_v46, %v9723_v4  ;;  %v6002_v3 = vsub.f32 %v9627_v12, %v9723_v4 }
 0x3c4   : > { %v6006_v28 = vsub.f32 %v9635_v55, %v9723_v4  ;;  %v6010_v59 = vsub.f32 %v9652_v38, %v9723_v4  ;;  %v6014_v52 = vsub.f32 %v9660_v21, %v9723_v4  ;;  %v6018_v53 = vsub.f32 %v9669_v15, %v9723_v4 }
 0x3c5   : > { %v5992_v29 = vmul.f32 1.442695, %v5991_v9  ;;  %v5995_v42 = vmul.f32 1.442695, %v5994_v34  ;;  %v6022_v46 = vsub.f32 %v9677_v58, %v9723_v4  ;;  %v5999_v25 = vmul.f32 1.442695, %v5998_v39 }
 0x3c6   : > { %v6026_v12 = vsub.f32 %v9683_v51, %v9723_v4  ;;  %v6003_v55 = vmul.f32 1.442695, %v6002_v3  ;;  %v6030_v38 = vsub.f32 %v9690_v36, %v9723_v4  ;;  %v6034_v21 = vsub.f32 %v9698_v41, %v9723_v4 }
 0x3c7   : > { %7438 = vpow2.f32 %v5992_v29  ;;  %v6038_v15 = vsub.f32 %v9704_v61, %v9723_v4  ;;  %v6042_v11 = vsub.f32 %v9713_v62, %v9723_v4  ;;  %v6046_v58 = vsub.f32 %v5974_v10, %v9723_v4 }
 0x3c8   : > { %7440 = vpow2.f32 %v5995_v42  ;;  %v6007_v6 = vmul.f32 1.442695, %v6006_v28  ;;  %v6050_v51 = vsub.f32 %v9720_v1, %v9723_v4  ;;  %v6011_v18 = vmul.f32 1.442695, %v6010_v59 }
 0x3c9   : > { %7442 = vpow2.f32 %v5999_v25  ;;  %v6015_v36 = vmul.f32 1.442695, %v6014_v52  ;;  %v6019_v32 = vmul.f32 1.442695, %v6018_v53  ;;  %v6023_v48 = vmul.f32 1.442695, %v6022_v46 }
 0x3ca   : > { %7444 = vpow2.f32 %v6003_v55  ;;  %v6027_v8 = vmul.f32 1.442695, %v6026_v12  ;;  %v6031_v37 = vmul.f32 1.442695, %v6030_v38  ;;  %v6035_v27 = vmul.f32 1.442695, %v6034_v21 }
 0x3cb   : > { %7446 = vpow2.f32 %v6007_v6  ;;  %v6039_v23 = vmul.f32 1.442695, %v6038_v15  ;;  %v6043_v35 = vmul.f32 1.442695, %v6042_v11  ;;  %v6047_v17 = vmul.f32 1.442695, %v6046_v58 }
 0x3cc   : > { %7448 = vpow2.f32 %v6011_v18  ;;  %v6051_v60 = vmul.f32 1.442695, %v6050_v51 }
 0x3cd   : > { %7450 = vpow2.f32 %v6015_v36 }
 0x3ce   : > { %7452 = vpow2.f32 %v6019_v32 }
 0x3cf   : > { %7454 = vpow2.f32 %v6023_v48 }
 0x3d0   : > { %7456 = vpow2.f32 %v6027_v8 }
 0x3d1   : > { %v7439_v41 = vpop.eup %7438  ;;  %7458 = vpow2.f32 %v6031_v37 }
 0x3d2   : > { %v7441_v49 = vpop.eup %7440  ;;  %7460 = vpow2.f32 %v6035_v27 }
 0x3d3   : > { %v5997_v31 = vadd.f32 %v7441_v49, %v7439_v41  ;;  %v7443_v26 = vpop.eup %7442  ;;  %7462 = vpow2.f32 %v6039_v23 }
 0x3d4   : > { %v7445_v61 = vpop.eup %7444  ;;  %7464 = vpow2.f32 %v6043_v35 }
 0x3d5   : > { %v6001_v43 = vadd.f32 %v7443_v26, %v5997_v31  ;;  %v7447_v7 = vpop.eup %7446  ;;  %7466 = vpow2.f32 %v6047_v17 }
 0x3d6   : > { %v7449_v24 = vpop.eup %7448  ;;  %7468 = vpow2.f32 %v6051_v60 }
 0x3d7   : > { %v6005_v45 = vadd.f32 %v7445_v61, %v6001_v43  ;;  %v7451_v5 = vpop.eup %7450 }
 0x3d8   : > { %v7453_v63 = vpop.eup %7452 }
 0x3d9   : > { %v6009_v13 = vadd.f32 %v7447_v7, %v6005_v45  ;;  %v7455_v0 = vpop.eup %7454 }
 0x3da   : > { %v7457_v20 = vpop.eup %7456 }
 0x3db   : > { %v6013_v40 = vadd.f32 %v7449_v24, %v6009_v13  ;;  %v7459_v14 = vpop.eup %7458 }
 0x3dc   : > { %v7461_v33 = vpop.eup %7460 }
 0x3dd   : > { %v6017_v44 = vadd.f32 %v7451_v5, %v6013_v40  ;;  %v7463_v54 = vpop.eup %7462 }
 0x3de   : > { %v7465_v19 = vpop.eup %7464 }
 0x3df   : > { %v6021_v50 = vadd.f32 %v7453_v63, %v6017_v44  ;;  %v7467_v10 = vpop.eup %7466 }
 0x3e0   : > { %v7469_v1 = vpop.eup %7468 }
 0x3e1   : > { %v6025_v62 = vadd.f32 %v7455_v0, %v6021_v50 }
 0x3e3   : > { %v6029_v47 = vadd.f32 %v7457_v20, %v6025_v62 }
 0x3e5   : > { %v6033_v16 = vadd.f32 %v7459_v14, %v6029_v47 }
 0x3e7   : > { %v6037_v57 = vadd.f32 %v7461_v33, %v6033_v16 }
 0x3e9   : > { %v6041_v30 = vadd.f32 %v7463_v54, %v6037_v57 }
 0x3eb   : > { %v6045_v56 = vadd.f32 %v7465_v19, %v6041_v30 }
 0x3ed   : > { %v6049_v2 = vadd.f32 %v7467_v10, %v6045_v56 }
 0x3ef   : > { %v6053_v22 = vadd.f32 %v7469_v1, %v6049_v2 }
 0x3f1   : > { %7470 = vlog2.f32 %v6053_v22 }
 0x3fb   : > { %v7471_v9 = vpop.eup %7470 }
 0x3fc   : > { %v6055_v34 = vmul.f32 0.6931472, %v7471_v9 }
 0x3fe   : > { %v6056_v39 = vadd.f32 %v6055_v34, %v9723_v4 }
 0x400   : > { %v6057_v3 = vmax.f32 %v6056_v39, 0.0 }
 0x402   : > { %6059 = vst.msk [vmem:[%s168_s21] sm:$0xff] %vm6058_vm2, %v6057_v3 }
 0x403 PF: > { %s13_s12 = sadd.s32 1, %s7480_s12  }
 0x404   : > { %p10_p4 = scmp.ge.s32.totalorder %s13_s12, 4  }
 0x406   :  { %12 = sbr.rel (!%p10_p4) target bundleno = 1 (0x1), region = 78 }

</bundles_post_ra>
